<compile_context>
chip_gen: v5e
topology: v5e:2x2
jax: 0.10.0
libtpu: 0.0.40
codegen_flags: <defaults>
</compile_context>

<pallas_src>
import jax
import jax.numpy as jnp
from jax import lax
from jax.experimental import pallas as pl
from jax.experimental.pallas import tpu as pltpu

NUM_BITS = 10
LN_EPS = 1e-5
_LOGIT_PAD = 128   # logits block padded to one full lane group (2*num_bits <= 128)
TS = 8             # timesteps per grid iteration (static unroll inside the kernel)


def _seq_kernel(prex_ref, h0_ref, w1h_ref, qr_ref, ql_ref,
                p1_ref, p2_ref, g_ref, beta_ref,
                o_ref, mem_scr):
    B, H = h0_ref.shape
    ts = o_ref.shape[0]
    T_cap = mem_scr.shape[0]
    c = pl.program_id(0)
    t0 = c * ts

    @pl.when(c == 0)
    def _init():
        # init_memory(): ring starts with one all-zeros entry; zero the whole ring so
        # no uninitialized VMEM is ever read.
        mem_scr[...] = jnp.zeros_like(mem_scr)

    # h_prev at the start of this chunk: h0 for the very first step, otherwise the
    # hidden state written to the ring at the end of the previous chunk (mem[t0]).
    h = jnp.where(c == 0, h0_ref[...], mem_scr[t0])

    # Small resident vectors (1 vreg each) hoisted out of the step loop.
    p1 = p1_ref[...]
    p2 = p2_ref[...]
    g = g_ref[...]
    beta = beta_ref[...]

    for s in range(ts):                           # static unroll; ts is small
        gt = t0 + s                               # global timestep

        # ---- fused recurrent matmul: pre_x(t) + h @ [U | M] --------------------------
        # cols [0:H]       = W(x)+U(h)+sum(all linear biases)
        # cols [H:H+2nb]   = M(h) logits (+ M bias)
        # remaining cols   = exact zeros
        out1 = prex_ref[s] + jnp.dot(h, w1h_ref[...],
                                     preferred_element_type=jnp.float32)
        pre_xu = out1[:, :H]                      # (B, H)    aligned slice
        lg = out1[:, H:]                          # (B, 128)  aligned slice

        # ---- hard binary addressing: sigmoid(l) > 0.5  <=>  l > 0 --------------------
        bits = (lg > 0.0).astype(jnp.float32)     # pad cols: 0 > 0 = 0
        t_max = gt.astype(jnp.float32)            # valid_len - 1 == gt
        idx1 = jnp.clip(jnp.sum(bits * p1, axis=1, keepdims=True), 0.0, t_max)
        idx2 = jnp.clip(jnp.sum(bits * p2, axis=1, keepdims=True), 0.0, t_max)

        # ---- single fused pass over the ring: select both rows per batch -------------
        # idx is clipped to [0, gt]; slots k > gt never match, and jnp.where is a
        # select (not a multiply), so their contents are irrelevant.
        def select_body(k, carry):
            a1, a2 = carry
            slab = mem_scr[k]                     # (B, H) dynamic-index load
            kf = k.astype(jnp.float32)
            a1 = a1 + jnp.where(idx1 == kf, slab, 0.0)
            a2 = a2 + jnp.where(idx2 == kf, slab, 0.0)
            return a1, a2

        zero = jnp.zeros((B, H), jnp.float32)
        h_rec, h_long = lax.fori_loop(0, T_cap, select_body, (zero, zero))

        # ---- second matmul stage: Q_recent / Q_long (biases already in pre_xu) -------
        pre = (pre_xu
               + jnp.dot(h_rec, qr_ref[...], preferred_element_type=jnp.float32)
               + jnp.dot(h_long, ql_ref[...], preferred_element_type=jnp.float32))

        # ---- LayerNorm (biased variance) + sigmoid ------------------------------------
        mean = jnp.mean(pre, axis=-1, keepdims=True)
        cent = pre - mean
        var = jnp.mean(cent * cent, axis=-1, keepdims=True)
        normed = cent * lax.rsqrt(var + LN_EPS) * g + beta
        h = jax.nn.sigmoid(normed)

        # ---- write output / append to ring (deque.append) ----------------------------
        o_ref[s] = h
        mem_scr[gt + 1] = h


def _resident(shape):
    """BlockSpec for a weight that stays resident in VMEM across all grid steps."""
    shape = tuple(shape)
    return pl.BlockSpec(shape, lambda c: (0,) * len(shape))


@jax.jit
def binary_memory_rnn_forward(xs, h0, fused):
    """Run the whole sequence. xs: (S, B, I), h0: (B, H). Returns hs: (S, B, H)."""
    S, B, _ = xs.shape
    H = h0.shape[1]
    Hp = fused["w1x"].shape[1]
    mem_size = 2 ** NUM_BITS
    S_pad = ((S + TS - 1) // TS) * TS
    if S_pad >= mem_size:
        raise NotImplementedError("TODO(synk): ring eviction for S >= 2**num_bits")
    T_cap = S_pad + 1

    # Hoisted input projection: one big full-MXU matmul outside the serial recurrence.
    # Produces (S, B, H+128): cols [0:H] = W(x)+sum(biases), cols [H:H+2nb] = M bias,
    # remaining pad cols exactly zero.
    pre_x = jnp.einsum('sbi,ip->sbp', xs, fused["w1x"]) + fused["b1"]
    pre_x = jnp.pad(pre_x, ((0, S_pad - S), (0, 0), (0, 0)))

    grid_spec = pltpu.PrefetchScalarGridSpec(
        num_scalar_prefetch=0,
        grid=(S_pad // TS,),
        in_specs=[
            pl.BlockSpec((TS, B, Hp), lambda c: (c, 0, 0)),   # pre_x chunk
            _resident((B, H)),                  # h0
            _resident(fused["w1h"].shape),      # (H, H+128)   [U | M]
            _resident(fused["qr"].shape),       # (H, H)
            _resident(fused["ql"].shape),       # (H, H)
            _resident(fused["p1"].shape),       # (1, 128)
            _resident(fused["p2"].shape),       # (1, 128)
            _resident(fused["ln_g"].shape),     # (1, H)
            _resident(fused["ln_b"].shape),     # (1, H)
        ],
        out_specs=pl.BlockSpec((TS, B, H), lambda c: (c, 0, 0)),
        scratch_shapes=[
            pltpu.VMEM((T_cap, B, H), jnp.float32),   # memory ring buffer
        ],
    )
    hs = pl.pallas_call(
        _seq_kernel,
        out_shape=jax.ShapeDtypeStruct((S_pad, B, H), jnp.float32),
        grid_spec=grid_spec,
        compiler_params=pltpu.CompilerParams(
            dimension_semantics=("arbitrary",)),   # sequential: state carried in scratch
    )(pre_x, h0, fused["w1h"], fused["qr"], fused["ql"],
      fused["p1"], fused["p2"], fused["ln_g"], fused["ln_b"])
    return hs[:S]


# ------------------------------- host-side parameter prep -------------------------------

def _init_raw_params(key, input_size, hidden_size, num_bits):
    """torch-nn.Linear-style init; weights stored as (in, out) so y = x @ W + b."""
    def linear(k, fan_in, fan_out):
        kw, kb = jax.random.split(k)
        bound = 1.0 / jnp.sqrt(jnp.float32(fan_in))
        w = jax.random.uniform(kw, (fan_in, fan_out), jnp.float32, -bound, bound)
        b = jax.random.uniform(kb, (1, fan_out), jnp.float32, -bound, bound)
        return w, b

    ks = jax.random.split(key, 5)
    W_w, W_b = linear(ks[0], input_size, hidden_size)
    U_w, U_b = linear(ks[1], hidden_size, hidden_size)
    M_w, M_b = linear(ks[2], hidden_size, num_bits * 2)
    Qr_w, Qr_b = linear(ks[3], hidden_size, hidden_size)
    Ql_w, Ql_b = linear(ks[4], hidden_size, hidden_size)
    return dict(W_w=W_w, W_b=W_b, U_w=U_w, U_b=U_b, M_w=M_w, M_b=M_b,
                Qr_w=Qr_w, Qr_b=Qr_b, Ql_w=Ql_w, Ql_b=Ql_b,
                ln_g=jnp.ones((1, hidden_size), jnp.float32),
                ln_b=jnp.zeros((1, hidden_size), jnp.float32))


def _fuse_params(raw, input_size, hidden_size, num_bits):
    """Fuse U/M into one lane-dense recurrent matmul, pre-sum biases, build bit powers."""
    nb2 = 2 * num_bits
    assert nb2 <= _LOGIT_PAD
    Hp = hidden_size + _LOGIT_PAD
    w1x = jnp.zeros((input_size, Hp), jnp.float32).at[:, :hidden_size].set(raw["W_w"])
    w1h = (jnp.zeros((hidden_size, Hp), jnp.float32)
           .at[:, :hidden_size].set(raw["U_w"])
           .at[:, hidden_size:hidden_size + nb2].set(raw["M_w"]))
    b1 = (jnp.zeros((1, Hp), jnp.float32)
          .at[:, :hidden_size].set(raw["W_b"] + raw["U_b"] + raw["Qr_b"] + raw["Ql_b"])
          .at[:, hidden_size:hidden_size + nb2].set(raw["M_b"]))
    powers = 2.0 ** jnp.arange(num_bits - 1, -1, -1, dtype=jnp.float32)
    p1 = jnp.zeros((1, _LOGIT_PAD), jnp.float32).at[0, :num_bits].set(powers)
    p2 = jnp.zeros((1, _LOGIT_PAD), jnp.float32).at[0, num_bits:nb2].set(powers)
    return dict(w1x=w1x, w1h=w1h, b1=b1, qr=raw["Qr_w"], ql=raw["Ql_w"],
                p1=p1, p2=p2, ln_g=raw["ln_g"], ln_b=raw["ln_b"])


# ------------------------------------ pure-JAX reference --------------------------------

def _ref_forward_seq(xs, h0, raw, num_bits=NUM_BITS):
    """Mirrors the torch eval-mode forward, step by step (deque never reaches maxlen here)."""
    S, B, _ = xs.shape
    powers = 2.0 ** jnp.arange(num_bits - 1, -1, -1, dtype=jnp.float32)
    memory = [jnp.zeros((B, h0.shape[1]), jnp.float32)]
    h = h0
    outs = []
    for t in range(S):
        x = xs[t]
        logits = h @ raw["M_w"] + raw["M_b"]
        l1, l2 = logits[:, :num_bits], logits[:, num_bits:]
        b1 = (jax.nn.sigmoid(l1) > 0.5).astype(jnp.float32)
        b2 = (jax.nn.sigmoid(l2) > 0.5).astype(jnp.float32)
        mem = jnp.stack(memory, axis=0)                       # (T, B, H)
        T = mem.shape[0]
        i1 = jnp.clip(jnp.sum(b1 * powers, axis=1).astype(jnp.int32), 0, T - 1)
        i2 = jnp.clip(jnp.sum(b2 * powers, axis=1).astype(jnp.int32), 0, T - 1)
        bidx = jnp.arange(B)
        h_rec = mem[i1, bidx]
        h_long = mem[i2, bidx]
        pre = (x @ raw["W_w"] + raw["W_b"] + h @ raw["U_w"] + raw["U_b"]
               + h_rec @ raw["Qr_w"] + raw["Qr_b"] + h_long @ raw["Ql_w"] + raw["Ql_b"])
        mean = jnp.mean(pre, axis=-1, keepdims=True)
        var = jnp.mean((pre - mean) ** 2, axis=-1, keepdims=True)
        normed = (pre - mean) * lax.rsqrt(var + LN_EPS) * raw["ln_g"] + raw["ln_b"]
        h = jax.nn.sigmoid(normed)
        memory.append(h)
        outs.append(h)
    return jnp.stack(outs, axis=0)


if __name__ == "__main__":
    B, I, H, S = 8, 64, 128, 6
    key = jax.random.PRNGKey(0)
    kp, kx, kh = jax.random.split(key, 3)

    raw = _init_raw_params(kp, I, H, NUM_BITS)
    fused = _fuse_params(raw, I, H, NUM_BITS)

    xs = jax.random.normal(kx, (S, B, I), jnp.float32)
    h0 = jax.random.normal(kh, (B, H), jnp.float32) * 0.1

    hs = jax.block_until_ready(binary_memory_rnn_forward(xs, h0, fused))
    hs_ref = _ref_forward_seq(xs, h0, raw)

    if bool(jnp.allclose(hs, hs_ref, atol=1e-4, rtol=1e-4)):
        print("KERNEL_OK")
    else:
        print("MISMATCH", float(jnp.max(jnp.abs(hs - hs_ref))))
</pallas_src>

<mosaic_0001>
module attributes {stable_mosaic.version = 11 : i64} {
  func.func @_seq_kernel(%arg0: i32, %arg1: memref<8x8x256xf32, #tpu.memory_space<vmem>>, %arg2: memref<8x128xf32, #tpu.memory_space<vmem>>, %arg3: memref<128x256xf32, #tpu.memory_space<vmem>>, %arg4: memref<128x128xf32, #tpu.memory_space<vmem>>, %arg5: memref<128x128xf32, #tpu.memory_space<vmem>>, %arg6: memref<1x128xf32, #tpu.memory_space<vmem>>, %arg7: memref<1x128xf32, #tpu.memory_space<vmem>>, %arg8: memref<1x128xf32, #tpu.memory_space<vmem>>, %arg9: memref<1x128xf32, #tpu.memory_space<vmem>>, %arg10: memref<8x8x128xf32, #tpu.memory_space<vmem>>, %arg11: memref<9x8x128xf32, #tpu.memory_space<vmem>>) attributes {dimension_semantics = [#tpu.dimension_semantics<arbitrary>], iteration_bounds = array<i64: 1>, scalar_prefetch = 0 : i64, scratch_operands = 1 : i64, tpu.core_type = #tpu.core_type<tc>, window_params = [{transform_indices = @transform_0, window_bounds = array<i64: 8, 8, 256>}, {pipeline_mode = #tpu.pipeline_mode<synchronous>, transform_indices = @transform_1, window_bounds = array<i64: 8, 128>}, {pipeline_mode = #tpu.pipeline_mode<synchronous>, transform_indices = @transform_2, window_bounds = array<i64: 128, 256>}, {pipeline_mode = #tpu.pipeline_mode<synchronous>, transform_indices = @transform_3, window_bounds = array<i64: 128, 128>}, {pipeline_mode = #tpu.pipeline_mode<synchronous>, transform_indices = @transform_4, window_bounds = array<i64: 128, 128>}, {pipeline_mode = #tpu.pipeline_mode<synchronous>, transform_indices = @transform_5, window_bounds = array<i64: 1, 128>}, {pipeline_mode = #tpu.pipeline_mode<synchronous>, transform_indices = @transform_6, window_bounds = array<i64: 1, 128>}, {pipeline_mode = #tpu.pipeline_mode<synchronous>, transform_indices = @transform_7, window_bounds = array<i64: 1, 128>}, {pipeline_mode = #tpu.pipeline_mode<synchronous>, transform_indices = @transform_8, window_bounds = array<i64: 1, 128>}, {transform_indices = @transform_9, window_bounds = array<i64: 8, 8, 128>}]} {
    %c8_i32 = arith.constant 8 : i32
    %0 = arith.muli %arg0, %c8_i32 : i32
    %c0_i32 = arith.constant 0 : i32
    %1 = arith.cmpi eq, %arg0, %c0_i32 : i32
    %2 = arith.extui %1 : i1 to i32
    %c0_i32_0 = arith.constant 0 : i32
    %3 = arith.cmpi ne, %2, %c0_i32_0 : i32
    scf.if %3 {
      %cst_277 = arith.constant 0.000000e+00 : f32
      %582 = vector.broadcast %cst_277 : f32 to vector<9x8x128xf32>
      %c0_278 = arith.constant 0 : index
      %c0_279 = arith.constant 0 : index
      %c0_280 = arith.constant 0 : index
      %583 = vector.load %arg11[%c0_278, %c0_279, %c0_280] : memref<9x8x128xf32, #tpu.memory_space<vmem>>, vector<9x8x128xf32>
      tpu.vector_store %arg11[%c0_278, %c0_279, %c0_280], %582 {strides = array<i32>} : memref<9x8x128xf32, #tpu.memory_space<vmem>>, vector<9x8x128xf32>,
    } else {
    }
    %c0_i32_1 = arith.constant 0 : i32
    %4 = arith.cmpi eq, %arg0, %c0_i32_1 : i32
    %c0 = arith.constant 0 : index
    %c0_2 = arith.constant 0 : index
    %5 = vector.load %arg2[%c0, %c0_2] : memref<8x128xf32, #tpu.memory_space<vmem>>, vector<8x128xf32>
    %6 = arith.index_cast %0 : i32 to index
    %c0_3 = arith.constant 0 : index
    %c0_4 = arith.constant 0 : index
    %7 = vector.load %arg11[%6, %c0_3, %c0_4] : memref<9x8x128xf32, #tpu.memory_space<vmem>>, vector<1x8x128xf32>
    %8 = vector.shape_cast %7 : vector<1x8x128xf32> to vector<8x128xf32>
    %9 = arith.select %4, %5, %8 : vector<8x128xf32>
    %c0_5 = arith.constant 0 : index
    %c0_6 = arith.constant 0 : index
    %10 = vector.load %arg6[%c0_5, %c0_6] : memref<1x128xf32, #tpu.memory_space<vmem>>, vector<1x128xf32>
    %c0_7 = arith.constant 0 : index
    %c0_8 = arith.constant 0 : index
    %11 = vector.load %arg7[%c0_7, %c0_8] : memref<1x128xf32, #tpu.memory_space<vmem>>, vector<1x128xf32>
    %c0_9 = arith.constant 0 : index
    %c0_10 = arith.constant 0 : index
    %12 = vector.load %arg8[%c0_9, %c0_10] : memref<1x128xf32, #tpu.memory_space<vmem>>, vector<1x128xf32>
    %c0_11 = arith.constant 0 : index
    %c0_12 = arith.constant 0 : index
    %13 = vector.load %arg9[%c0_11, %c0_12] : memref<1x128xf32, #tpu.memory_space<vmem>>, vector<1x128xf32>
    %c0_i32_13 = arith.constant 0 : i32
    %14 = arith.addi %0, %c0_i32_13 : i32
    %c0_14 = arith.constant 0 : index
    %c0_15 = arith.constant 0 : index
    %c0_16 = arith.constant 0 : index
    %15 = vector.load %arg1[%c0_14, %c0_15, %c0_16] : memref<8x8x256xf32, #tpu.memory_space<vmem>>, vector<1x8x256xf32>
    %16 = vector.shape_cast %15 : vector<1x8x256xf32> to vector<8x256xf32>
    %c0_17 = arith.constant 0 : index
    %c0_18 = arith.constant 0 : index
    %17 = vector.load %arg3[%c0_17, %c0_18] : memref<128x256xf32, #tpu.memory_space<vmem>>, vector<128x256xf32>
    %cst = arith.constant dense<0.000000e+00> : vector<8x256xf32>
    %18 = tpu.matmul %9, %17, %cst {dimension_numbers = #tpu.dot_dimension_numbers<[1], [0], [0], [1], [0, 0, 1, 1], [], []>} : vector<8x128xf32>, vector<128x256xf32>, vector<8x256xf32> -> vector<8x256xf32>
    %19 = arith.addf %16, %18 : vector<8x256xf32>
    %20 = vector.extract_strided_slice %19 {offsets = [0, 0], sizes = [8, 128], strides = [1, 1]} : vector<8x256xf32> to vector<8x128xf32>
    %21 = vector.extract_strided_slice %19 {offsets = [0, 128], sizes = [8, 128], strides = [1, 1]} : vector<8x256xf32> to vector<8x128xf32>
    %cst_19 = arith.constant 0.000000e+00 : f32
    %22 = vector.broadcast %cst_19 : f32 to vector<8x128xf32>
    %23 = arith.cmpf ogt, %21, %22 : vector<8x128xf32>
    %24 = arith.extui %23 : vector<8x128xi1> to vector<8x128xi32>
    %25 = arith.sitofp %24 : vector<8x128xi32> to vector<8x128xf32>
    %26 = arith.sitofp %14 : i32 to f32
    %27 = vector.broadcast %10 : vector<1x128xf32> to vector<8x128xf32>
    %28 = arith.mulf %25, %27 : vector<8x128xf32>
    %cst_20 = arith.constant dense<0.000000e+00> : vector<8xf32>
    %29 = vector.multi_reduction <add>, %28, %cst_20 [1] : vector<8x128xf32> to vector<8xf32>
    %30 = vector.shape_cast %29 : vector<8xf32> to vector<8x1xf32>
    %cst_21 = arith.constant 0.000000e+00 : f32
    %31 = vector.broadcast %cst_21 : f32 to vector<8x1xf32>
    %32 = arith.maximumf %31, %30 : vector<8x1xf32>
    %33 = vector.broadcast %26 : f32 to vector<8x1xf32>
    %34 = arith.minimumf %33, %32 : vector<8x1xf32>
    %35 = vector.broadcast %11 : vector<1x128xf32> to vector<8x128xf32>
    %36 = arith.mulf %25, %35 : vector<8x128xf32>
    %cst_22 = arith.constant dense<0.000000e+00> : vector<8xf32>
    %37 = vector.multi_reduction <add>, %36, %cst_22 [1] : vector<8x128xf32> to vector<8xf32>
    %38 = vector.shape_cast %37 : vector<8xf32> to vector<8x1xf32>
    %cst_23 = arith.constant 0.000000e+00 : f32
    %39 = vector.broadcast %cst_23 : f32 to vector<8x1xf32>
    %40 = arith.maximumf %39, %38 : vector<8x1xf32>
    %41 = vector.broadcast %26 : f32 to vector<8x1xf32>
    %42 = arith.minimumf %41, %40 : vector<8x1xf32>
    %cst_24 = arith.constant 0.000000e+00 : f32
    %43 = vector.broadcast %cst_24 : f32 to vector<8x128xf32>
    %c0_i32_25 = arith.constant 0 : i32
    %c9_i32 = arith.constant 9 : i32
    %44 = arith.addi %c0_i32_25, %c9_i32 : i32
    %c1_i32 = arith.constant 1 : i32
    %45:2 = scf.for %arg12 = %c0_i32_25 to %44 step %c1_i32 iter_args(%arg13 = %43, %arg14 = %43) -> (vector<8x128xf32>, vector<8x128xf32>)  : i32 {
      %582 = arith.index_cast %arg12 : i32 to index
      %c0_277 = arith.constant 0 : index
      %c0_278 = arith.constant 0 : index
      %583 = vector.load %arg11[%582, %c0_277, %c0_278] : memref<9x8x128xf32, #tpu.memory_space<vmem>>, vector<1x8x128xf32>
      %584 = vector.shape_cast %583 : vector<1x8x128xf32> to vector<8x128xf32>
      %585 = arith.sitofp %arg12 : i32 to f32
      %586 = vector.broadcast %585 : f32 to vector<8x1xf32>
      %587 = arith.cmpf oeq, %34, %586 : vector<8x1xf32>
      %cst_279 = arith.constant 0.000000e+00 : f32
      %588 = vector.shape_cast %587 : vector<8x1xi1> to vector<8x1xi1>
      %589 = vector.broadcast %588 : vector<8x1xi1> to vector<8x128xi1>
      %590 = vector.broadcast %cst_279 : f32 to vector<8x128xf32>
      %591 = arith.select %589, %584, %590 : vector<8x128xi1>, vector<8x128xf32>
      %592 = arith.addf %arg13, %591 : vector<8x128xf32>
      %593 = vector.broadcast %585 : f32 to vector<8x1xf32>
      %594 = arith.cmpf oeq, %42, %593 : vector<8x1xf32>
      %cst_280 = arith.constant 0.000000e+00 : f32
      %595 = vector.shape_cast %594 : vector<8x1xi1> to vector<8x1xi1>
      %596 = vector.broadcast %595 : vector<8x1xi1> to vector<8x128xi1>
      %597 = vector.broadcast %cst_280 : f32 to vector<8x128xf32>
      %598 = arith.select %596, %584, %597 : vector<8x128xi1>, vector<8x128xf32>
      %599 = arith.addf %arg14, %598 : vector<8x128xf32>
      scf.yield %592, %599 : vector<8x128xf32>, vector<8x128xf32>
    }
    %c9_i32_26 = arith.constant 9 : i32
    %c0_27 = arith.constant 0 : index
    %c0_28 = arith.constant 0 : index
    %46 = vector.load %arg4[%c0_27, %c0_28] : memref<128x128xf32, #tpu.memory_space<vmem>>, vector<128x128xf32>
    %cst_29 = arith.constant dense<0.000000e+00> : vector<8x128xf32>
    %47 = tpu.matmul %45#0, %46, %cst_29 {dimension_numbers = #tpu.dot_dimension_numbers<[1], [0], [0], [1], [0, 0, 1, 1], [], []>} : vector<8x128xf32>, vector<128x128xf32>, vector<8x128xf32> -> vector<8x128xf32>
    %48 = arith.addf %20, %47 : vector<8x128xf32>
    %c0_30 = arith.constant 0 : index
    %c0_31 = arith.constant 0 : index
    %49 = vector.load %arg5[%c0_30, %c0_31] : memref<128x128xf32, #tpu.memory_space<vmem>>, vector<128x128xf32>
    %cst_32 = arith.constant dense<0.000000e+00> : vector<8x128xf32>
    %50 = tpu.matmul %45#1, %49, %cst_32 {dimension_numbers = #tpu.dot_dimension_numbers<[1], [0], [0], [1], [0, 0, 1, 1], [], []>} : vector<8x128xf32>, vector<128x128xf32>, vector<8x128xf32> -> vector<8x128xf32>
    %51 = arith.addf %48, %50 : vector<8x128xf32>
    %cst_33 = arith.constant dense<0.000000e+00> : vector<8xf32>
    %52 = vector.multi_reduction <add>, %51, %cst_33 [1] : vector<8x128xf32> to vector<8xf32>
    %53 = vector.shape_cast %52 : vector<8xf32> to vector<8x1xf32>
    %cst_34 = arith.constant 1.280000e+02 : f32
    %54 = vector.broadcast %cst_34 : f32 to vector<8x1xf32>
    %55 = arith.divf %53, %54 : vector<8x1xf32>
    %56 = vector.broadcast %55 : vector<8x1xf32> to vector<8x128xf32>
    %57 = arith.subf %51, %56 : vector<8x128xf32>
    %58 = arith.mulf %57, %57 : vector<8x128xf32>
    %cst_35 = arith.constant dense<0.000000e+00> : vector<8xf32>
    %59 = vector.multi_reduction <add>, %58, %cst_35 [1] : vector<8x128xf32> to vector<8xf32>
    %60 = vector.shape_cast %59 : vector<8xf32> to vector<8x1xf32>
    %cst_36 = arith.constant 1.280000e+02 : f32
    %61 = vector.broadcast %cst_36 : f32 to vector<8x1xf32>
    %62 = arith.divf %60, %61 : vector<8x1xf32>
    %cst_37 = arith.constant 9.99999974E-6 : f32
    %63 = vector.broadcast %cst_37 : f32 to vector<8x1xf32>
    %64 = arith.addf %62, %63 : vector<8x1xf32>
    %65 = math.rsqrt %64 : vector<8x1xf32>
    %66 = vector.broadcast %65 : vector<8x1xf32> to vector<8x128xf32>
    %67 = arith.mulf %57, %66 : vector<8x128xf32>
    %68 = vector.broadcast %12 : vector<1x128xf32> to vector<8x128xf32>
    %69 = arith.mulf %67, %68 : vector<8x128xf32>
    %70 = vector.broadcast %13 : vector<1x128xf32> to vector<8x128xf32>
    %71 = arith.addf %69, %70 : vector<8x128xf32>
    %72 = arith.negf %71 : vector<8x128xf32>
    %73 = math.exp %72 : vector<8x128xf32>
    %cst_38 = arith.constant 1.000000e+00 : f32
    %74 = vector.broadcast %cst_38 : f32 to vector<8x128xf32>
    %75 = arith.addf %74, %73 : vector<8x128xf32>
    %76 = arith.divf %74, %75 : vector<8x128xf32>
    %c0_39 = arith.constant 0 : index
    %c0_40 = arith.constant 0 : index
    %c0_41 = arith.constant 0 : index
    %77 = vector.load %arg10[%c0_39, %c0_40, %c0_41] : memref<8x8x128xf32, #tpu.memory_space<vmem>>, vector<1x8x128xf32>
    %78 = vector.shape_cast %77 : vector<1x8x128xf32> to vector<8x128xf32>
    %79 = vector.shape_cast %76 : vector<8x128xf32> to vector<1x8x128xf32>
    tpu.vector_store %arg10[%c0_39, %c0_40, %c0_41], %79 {strides = array<i32>} : memref<8x8x128xf32, #tpu.memory_space<vmem>>, vector<1x8x128xf32>,
    %c1_i32_42 = arith.constant 1 : i32
    %80 = arith.addi %14, %c1_i32_42 : i32
    %81 = arith.index_cast %80 : i32 to index
    %c0_43 = arith.constant 0 : index
    %c0_44 = arith.constant 0 : index
    %82 = vector.load %arg11[%81, %c0_43, %c0_44] : memref<9x8x128xf32, #tpu.memory_space<vmem>>, vector<1x8x128xf32>
    %83 = vector.shape_cast %82 : vector<1x8x128xf32> to vector<8x128xf32>
    %84 = vector.shape_cast %76 : vector<8x128xf32> to vector<1x8x128xf32>
    tpu.vector_store %arg11[%81, %c0_43, %c0_44], %84 {strides = array<i32>} : memref<9x8x128xf32, #tpu.memory_space<vmem>>, vector<1x8x128xf32>,
    %c1_i32_45 = arith.constant 1 : i32
    %85 = arith.addi %0, %c1_i32_45 : i32
    %c1 = arith.constant 1 : index
    %c0_46 = arith.constant 0 : index
    %c0_47 = arith.constant 0 : index
    %86 = vector.load %arg1[%c1, %c0_46, %c0_47] : memref<8x8x256xf32, #tpu.memory_space<vmem>>, vector<1x8x256xf32>
    %87 = vector.shape_cast %86 : vector<1x8x256xf32> to vector<8x256xf32>
    %c0_48 = arith.constant 0 : index
    %c0_49 = arith.constant 0 : index
    %88 = vector.load %arg3[%c0_48, %c0_49] : memref<128x256xf32, #tpu.memory_space<vmem>>, vector<128x256xf32>
    %cst_50 = arith.constant dense<0.000000e+00> : vector<8x256xf32>
    %89 = tpu.matmul %76, %88, %cst_50 {dimension_numbers = #tpu.dot_dimension_numbers<[1], [0], [0], [1], [0, 0, 1, 1], [], []>} : vector<8x128xf32>, vector<128x256xf32>, vector<8x256xf32> -> vector<8x256xf32>
    %90 = arith.addf %87, %89 : vector<8x256xf32>
    %91 = vector.extract_strided_slice %90 {offsets = [0, 0], sizes = [8, 128], strides = [1, 1]} : vector<8x256xf32> to vector<8x128xf32>
    %92 = vector.extract_strided_slice %90 {offsets = [0, 128], sizes = [8, 128], strides = [1, 1]} : vector<8x256xf32> to vector<8x128xf32>
    %cst_51 = arith.constant 0.000000e+00 : f32
    %93 = vector.broadcast %cst_51 : f32 to vector<8x128xf32>
    %94 = arith.cmpf ogt, %92, %93 : vector<8x128xf32>
    %95 = arith.extui %94 : vector<8x128xi1> to vector<8x128xi32>
    %96 = arith.sitofp %95 : vector<8x128xi32> to vector<8x128xf32>
    %97 = arith.sitofp %85 : i32 to f32
    %98 = vector.broadcast %10 : vector<1x128xf32> to vector<8x128xf32>
    %99 = arith.mulf %96, %98 : vector<8x128xf32>
    %cst_52 = arith.constant dense<0.000000e+00> : vector<8xf32>
    %100 = vector.multi_reduction <add>, %99, %cst_52 [1] : vector<8x128xf32> to vector<8xf32>
    %101 = vector.shape_cast %100 : vector<8xf32> to vector<8x1xf32>
    %cst_53 = arith.constant 0.000000e+00 : f32
    %102 = vector.broadcast %cst_53 : f32 to vector<8x1xf32>
    %103 = arith.maximumf %102, %101 : vector<8x1xf32>
    %104 = vector.broadcast %97 : f32 to vector<8x1xf32>
    %105 = arith.minimumf %104, %103 : vector<8x1xf32>
    %106 = vector.broadcast %11 : vector<1x128xf32> to vector<8x128xf32>
    %107 = arith.mulf %96, %106 : vector<8x128xf32>
    %cst_54 = arith.constant dense<0.000000e+00> : vector<8xf32>
    %108 = vector.multi_reduction <add>, %107, %cst_54 [1] : vector<8x128xf32> to vector<8xf32>
    %109 = vector.shape_cast %108 : vector<8xf32> to vector<8x1xf32>
    %cst_55 = arith.constant 0.000000e+00 : f32
    %110 = vector.broadcast %cst_55 : f32 to vector<8x1xf32>
    %111 = arith.maximumf %110, %109 : vector<8x1xf32>
    %112 = vector.broadcast %97 : f32 to vector<8x1xf32>
    %113 = arith.minimumf %112, %111 : vector<8x1xf32>
    %cst_56 = arith.constant 0.000000e+00 : f32
    %114 = vector.broadcast %cst_56 : f32 to vector<8x128xf32>
    %c0_i32_57 = arith.constant 0 : i32
    %c9_i32_58 = arith.constant 9 : i32
    %115 = arith.addi %c0_i32_57, %c9_i32_58 : i32
    %c1_i32_59 = arith.constant 1 : i32
    %116:2 = scf.for %arg12 = %c0_i32_57 to %115 step %c1_i32_59 iter_args(%arg13 = %114, %arg14 = %114) -> (vector<8x128xf32>, vector<8x128xf32>)  : i32 {
      %582 = arith.index_cast %arg12 : i32 to index
      %c0_277 = arith.constant 0 : index
      %c0_278 = arith.constant 0 : index
      %583 = vector.load %arg11[%582, %c0_277, %c0_278] : memref<9x8x128xf32, #tpu.memory_space<vmem>>, vector<1x8x128xf32>
      %584 = vector.shape_cast %583 : vector<1x8x128xf32> to vector<8x128xf32>
      %585 = arith.sitofp %arg12 : i32 to f32
      %586 = vector.broadcast %585 : f32 to vector<8x1xf32>
      %587 = arith.cmpf oeq, %105, %586 : vector<8x1xf32>
      %cst_279 = arith.constant 0.000000e+00 : f32
      %588 = vector.shape_cast %587 : vector<8x1xi1> to vector<8x1xi1>
      %589 = vector.broadcast %588 : vector<8x1xi1> to vector<8x128xi1>
      %590 = vector.broadcast %cst_279 : f32 to vector<8x128xf32>
      %591 = arith.select %589, %584, %590 : vector<8x128xi1>, vector<8x128xf32>
      %592 = arith.addf %arg13, %591 : vector<8x128xf32>
      %593 = vector.broadcast %585 : f32 to vector<8x1xf32>
      %594 = arith.cmpf oeq, %113, %593 : vector<8x1xf32>
      %cst_280 = arith.constant 0.000000e+00 : f32
      %595 = vector.shape_cast %594 : vector<8x1xi1> to vector<8x1xi1>
      %596 = vector.broadcast %595 : vector<8x1xi1> to vector<8x128xi1>
      %597 = vector.broadcast %cst_280 : f32 to vector<8x128xf32>
      %598 = arith.select %596, %584, %597 : vector<8x128xi1>, vector<8x128xf32>
      %599 = arith.addf %arg14, %598 : vector<8x128xf32>
      scf.yield %592, %599 : vector<8x128xf32>, vector<8x128xf32>
    }
    %c9_i32_60 = arith.constant 9 : i32
    %c0_61 = arith.constant 0 : index
    %c0_62 = arith.constant 0 : index
    %117 = vector.load %arg4[%c0_61, %c0_62] : memref<128x128xf32, #tpu.memory_space<vmem>>, vector<128x128xf32>
    %cst_63 = arith.constant dense<0.000000e+00> : vector<8x128xf32>
    %118 = tpu.matmul %116#0, %117, %cst_63 {dimension_numbers = #tpu.dot_dimension_numbers<[1], [0], [0], [1], [0, 0, 1, 1], [], []>} : vector<8x128xf32>, vector<128x128xf32>, vector<8x128xf32> -> vector<8x128xf32>
    %119 = arith.addf %91, %118 : vector<8x128xf32>
    %c0_64 = arith.constant 0 : index
    %c0_65 = arith.constant 0 : index
    %120 = vector.load %arg5[%c0_64, %c0_65] : memref<128x128xf32, #tpu.memory_space<vmem>>, vector<128x128xf32>
    %cst_66 = arith.constant dense<0.000000e+00> : vector<8x128xf32>
    %121 = tpu.matmul %116#1, %120, %cst_66 {dimension_numbers = #tpu.dot_dimension_numbers<[1], [0], [0], [1], [0, 0, 1, 1], [], []>} : vector<8x128xf32>, vector<128x128xf32>, vector<8x128xf32> -> vector<8x128xf32>
    %122 = arith.addf %119, %121 : vector<8x128xf32>
    %cst_67 = arith.constant dense<0.000000e+00> : vector<8xf32>
    %123 = vector.multi_reduction <add>, %122, %cst_67 [1] : vector<8x128xf32> to vector<8xf32>
    %124 = vector.shape_cast %123 : vector<8xf32> to vector<8x1xf32>
    %cst_68 = arith.constant 1.280000e+02 : f32
    %125 = vector.broadcast %cst_68 : f32 to vector<8x1xf32>
    %126 = arith.divf %124, %125 : vector<8x1xf32>
    %127 = vector.broadcast %126 : vector<8x1xf32> to vector<8x128xf32>
    %128 = arith.subf %122, %127 : vector<8x128xf32>
    %129 = arith.mulf %128, %128 : vector<8x128xf32>
    %cst_69 = arith.constant dense<0.000000e+00> : vector<8xf32>
    %130 = vector.multi_reduction <add>, %129, %cst_69 [1] : vector<8x128xf32> to vector<8xf32>
    %131 = vector.shape_cast %130 : vector<8xf32> to vector<8x1xf32>
    %cst_70 = arith.constant 1.280000e+02 : f32
    %132 = vector.broadcast %cst_70 : f32 to vector<8x1xf32>
    %133 = arith.divf %131, %132 : vector<8x1xf32>
    %cst_71 = arith.constant 9.99999974E-6 : f32
    %134 = vector.broadcast %cst_71 : f32 to vector<8x1xf32>
    %135 = arith.addf %133, %134 : vector<8x1xf32>
    %136 = math.rsqrt %135 : vector<8x1xf32>
    %137 = vector.broadcast %136 : vector<8x1xf32> to vector<8x128xf32>
    %138 = arith.mulf %128, %137 : vector<8x128xf32>
    %139 = vector.broadcast %12 : vector<1x128xf32> to vector<8x128xf32>
    %140 = arith.mulf %138, %139 : vector<8x128xf32>
    %141 = vector.broadcast %13 : vector<1x128xf32> to vector<8x128xf32>
    %142 = arith.addf %140, %141 : vector<8x128xf32>
    %143 = arith.negf %142 : vector<8x128xf32>
    %144 = math.exp %143 : vector<8x128xf32>
    %cst_72 = arith.constant 1.000000e+00 : f32
    %145 = vector.broadcast %cst_72 : f32 to vector<8x128xf32>
    %146 = arith.addf %145, %144 : vector<8x128xf32>
    %147 = arith.divf %145, %146 : vector<8x128xf32>
    %c1_73 = arith.constant 1 : index
    %c0_74 = arith.constant 0 : index
    %c0_75 = arith.constant 0 : index
    %148 = vector.load %arg10[%c1_73, %c0_74, %c0_75] : memref<8x8x128xf32, #tpu.memory_space<vmem>>, vector<1x8x128xf32>
    %149 = vector.shape_cast %148 : vector<1x8x128xf32> to vector<8x128xf32>
    %150 = vector.shape_cast %147 : vector<8x128xf32> to vector<1x8x128xf32>
    tpu.vector_store %arg10[%c1_73, %c0_74, %c0_75], %150 {strides = array<i32>} : memref<8x8x128xf32, #tpu.memory_space<vmem>>, vector<1x8x128xf32>,
    %c1_i32_76 = arith.constant 1 : i32
    %151 = arith.addi %85, %c1_i32_76 : i32
    %152 = arith.index_cast %151 : i32 to index
    %c0_77 = arith.constant 0 : index
    %c0_78 = arith.constant 0 : index
    %153 = vector.load %arg11[%152, %c0_77, %c0_78] : memref<9x8x128xf32, #tpu.memory_space<vmem>>, vector<1x8x128xf32>
    %154 = vector.shape_cast %153 : vector<1x8x128xf32> to vector<8x128xf32>
    %155 = vector.shape_cast %147 : vector<8x128xf32> to vector<1x8x128xf32>
    tpu.vector_store %arg11[%152, %c0_77, %c0_78], %155 {strides = array<i32>} : memref<9x8x128xf32, #tpu.memory_space<vmem>>, vector<1x8x128xf32>,
    %c2_i32 = arith.constant 2 : i32
    %156 = arith.addi %0, %c2_i32 : i32
    %c2 = arith.constant 2 : index
    %c0_79 = arith.constant 0 : index
    %c0_80 = arith.constant 0 : index
    %157 = vector.load %arg1[%c2, %c0_79, %c0_80] : memref<8x8x256xf32, #tpu.memory_space<vmem>>, vector<1x8x256xf32>
    %158 = vector.shape_cast %157 : vector<1x8x256xf32> to vector<8x256xf32>
    %c0_81 = arith.constant 0 : index
    %c0_82 = arith.constant 0 : index
    %159 = vector.load %arg3[%c0_81, %c0_82] : memref<128x256xf32, #tpu.memory_space<vmem>>, vector<128x256xf32>
    %cst_83 = arith.constant dense<0.000000e+00> : vector<8x256xf32>
    %160 = tpu.matmul %147, %159, %cst_83 {dimension_numbers = #tpu.dot_dimension_numbers<[1], [0], [0], [1], [0, 0, 1, 1], [], []>} : vector<8x128xf32>, vector<128x256xf32>, vector<8x256xf32> -> vector<8x256xf32>
    %161 = arith.addf %158, %160 : vector<8x256xf32>
    %162 = vector.extract_strided_slice %161 {offsets = [0, 0], sizes = [8, 128], strides = [1, 1]} : vector<8x256xf32> to vector<8x128xf32>
    %163 = vector.extract_strided_slice %161 {offsets = [0, 128], sizes = [8, 128], strides = [1, 1]} : vector<8x256xf32> to vector<8x128xf32>
    %cst_84 = arith.constant 0.000000e+00 : f32
    %164 = vector.broadcast %cst_84 : f32 to vector<8x128xf32>
    %165 = arith.cmpf ogt, %163, %164 : vector<8x128xf32>
    %166 = arith.extui %165 : vector<8x128xi1> to vector<8x128xi32>
    %167 = arith.sitofp %166 : vector<8x128xi32> to vector<8x128xf32>
    %168 = arith.sitofp %156 : i32 to f32
    %169 = vector.broadcast %10 : vector<1x128xf32> to vector<8x128xf32>
    %170 = arith.mulf %167, %169 : vector<8x128xf32>
    %cst_85 = arith.constant dense<0.000000e+00> : vector<8xf32>
    %171 = vector.multi_reduction <add>, %170, %cst_85 [1] : vector<8x128xf32> to vector<8xf32>
    %172 = vector.shape_cast %171 : vector<8xf32> to vector<8x1xf32>
    %cst_86 = arith.constant 0.000000e+00 : f32
    %173 = vector.broadcast %cst_86 : f32 to vector<8x1xf32>
    %174 = arith.maximumf %173, %172 : vector<8x1xf32>
    %175 = vector.broadcast %168 : f32 to vector<8x1xf32>
    %176 = arith.minimumf %175, %174 : vector<8x1xf32>
    %177 = vector.broadcast %11 : vector<1x128xf32> to vector<8x128xf32>
    %178 = arith.mulf %167, %177 : vector<8x128xf32>
    %cst_87 = arith.constant dense<0.000000e+00> : vector<8xf32>
    %179 = vector.multi_reduction <add>, %178, %cst_87 [1] : vector<8x128xf32> to vector<8xf32>
    %180 = vector.shape_cast %179 : vector<8xf32> to vector<8x1xf32>
    %cst_88 = arith.constant 0.000000e+00 : f32
    %181 = vector.broadcast %cst_88 : f32 to vector<8x1xf32>
    %182 = arith.maximumf %181, %180 : vector<8x1xf32>
    %183 = vector.broadcast %168 : f32 to vector<8x1xf32>
    %184 = arith.minimumf %183, %182 : vector<8x1xf32>
    %cst_89 = arith.constant 0.000000e+00 : f32
    %185 = vector.broadcast %cst_89 : f32 to vector<8x128xf32>
    %c0_i32_90 = arith.constant 0 : i32
    %c9_i32_91 = arith.constant 9 : i32
    %186 = arith.addi %c0_i32_90, %c9_i32_91 : i32
    %c1_i32_92 = arith.constant 1 : i32
    %187:2 = scf.for %arg12 = %c0_i32_90 to %186 step %c1_i32_92 iter_args(%arg13 = %185, %arg14 = %185) -> (vector<8x128xf32>, vector<8x128xf32>)  : i32 {
      %582 = arith.index_cast %arg12 : i32 to index
      %c0_277 = arith.constant 0 : index
      %c0_278 = arith.constant 0 : index
      %583 = vector.load %arg11[%582, %c0_277, %c0_278] : memref<9x8x128xf32, #tpu.memory_space<vmem>>, vector<1x8x128xf32>
      %584 = vector.shape_cast %583 : vector<1x8x128xf32> to vector<8x128xf32>
      %585 = arith.sitofp %arg12 : i32 to f32
      %586 = vector.broadcast %585 : f32 to vector<8x1xf32>
      %587 = arith.cmpf oeq, %176, %586 : vector<8x1xf32>
      %cst_279 = arith.constant 0.000000e+00 : f32
      %588 = vector.shape_cast %587 : vector<8x1xi1> to vector<8x1xi1>
      %589 = vector.broadcast %588 : vector<8x1xi1> to vector<8x128xi1>
      %590 = vector.broadcast %cst_279 : f32 to vector<8x128xf32>
      %591 = arith.select %589, %584, %590 : vector<8x128xi1>, vector<8x128xf32>
      %592 = arith.addf %arg13, %591 : vector<8x128xf32>
      %593 = vector.broadcast %585 : f32 to vector<8x1xf32>
      %594 = arith.cmpf oeq, %184, %593 : vector<8x1xf32>
      %cst_280 = arith.constant 0.000000e+00 : f32
      %595 = vector.shape_cast %594 : vector<8x1xi1> to vector<8x1xi1>
      %596 = vector.broadcast %595 : vector<8x1xi1> to vector<8x128xi1>
      %597 = vector.broadcast %cst_280 : f32 to vector<8x128xf32>
      %598 = arith.select %596, %584, %597 : vector<8x128xi1>, vector<8x128xf32>
      %599 = arith.addf %arg14, %598 : vector<8x128xf32>
      scf.yield %592, %599 : vector<8x128xf32>, vector<8x128xf32>
    }
    %c9_i32_93 = arith.constant 9 : i32
    %c0_94 = arith.constant 0 : index
    %c0_95 = arith.constant 0 : index
    %188 = vector.load %arg4[%c0_94, %c0_95] : memref<128x128xf32, #tpu.memory_space<vmem>>, vector<128x128xf32>
    %cst_96 = arith.constant dense<0.000000e+00> : vector<8x128xf32>
    %189 = tpu.matmul %187#0, %188, %cst_96 {dimension_numbers = #tpu.dot_dimension_numbers<[1], [0], [0], [1], [0, 0, 1, 1], [], []>} : vector<8x128xf32>, vector<128x128xf32>, vector<8x128xf32> -> vector<8x128xf32>
    %190 = arith.addf %162, %189 : vector<8x128xf32>
    %c0_97 = arith.constant 0 : index
    %c0_98 = arith.constant 0 : index
    %191 = vector.load %arg5[%c0_97, %c0_98] : memref<128x128xf32, #tpu.memory_space<vmem>>, vector<128x128xf32>
    %cst_99 = arith.constant dense<0.000000e+00> : vector<8x128xf32>
    %192 = tpu.matmul %187#1, %191, %cst_99 {dimension_numbers = #tpu.dot_dimension_numbers<[1], [0], [0], [1], [0, 0, 1, 1], [], []>} : vector<8x128xf32>, vector<128x128xf32>, vector<8x128xf32> -> vector<8x128xf32>
    %193 = arith.addf %190, %192 : vector<8x128xf32>
    %cst_100 = arith.constant dense<0.000000e+00> : vector<8xf32>
    %194 = vector.multi_reduction <add>, %193, %cst_100 [1] : vector<8x128xf32> to vector<8xf32>
    %195 = vector.shape_cast %194 : vector<8xf32> to vector<8x1xf32>
    %cst_101 = arith.constant 1.280000e+02 : f32
    %196 = vector.broadcast %cst_101 : f32 to vector<8x1xf32>
    %197 = arith.divf %195, %196 : vector<8x1xf32>
    %198 = vector.broadcast %197 : vector<8x1xf32> to vector<8x128xf32>
    %199 = arith.subf %193, %198 : vector<8x128xf32>
    %200 = arith.mulf %199, %199 : vector<8x128xf32>
    %cst_102 = arith.constant dense<0.000000e+00> : vector<8xf32>
    %201 = vector.multi_reduction <add>, %200, %cst_102 [1] : vector<8x128xf32> to vector<8xf32>
    %202 = vector.shape_cast %201 : vector<8xf32> to vector<8x1xf32>
    %cst_103 = arith.constant 1.280000e+02 : f32
    %203 = vector.broadcast %cst_103 : f32 to vector<8x1xf32>
    %204 = arith.divf %202, %203 : vector<8x1xf32>
    %cst_104 = arith.constant 9.99999974E-6 : f32
    %205 = vector.broadcast %cst_104 : f32 to vector<8x1xf32>
    %206 = arith.addf %204, %205 : vector<8x1xf32>
    %207 = math.rsqrt %206 : vector<8x1xf32>
    %208 = vector.broadcast %207 : vector<8x1xf32> to vector<8x128xf32>
    %209 = arith.mulf %199, %208 : vector<8x128xf32>
    %210 = vector.broadcast %12 : vector<1x128xf32> to vector<8x128xf32>
    %211 = arith.mulf %209, %210 : vector<8x128xf32>
    %212 = vector.broadcast %13 : vector<1x128xf32> to vector<8x128xf32>
    %213 = arith.addf %211, %212 : vector<8x128xf32>
    %214 = arith.negf %213 : vector<8x128xf32>
    %215 = math.exp %214 : vector<8x128xf32>
    %cst_105 = arith.constant 1.000000e+00 : f32
    %216 = vector.broadcast %cst_105 : f32 to vector<8x128xf32>
    %217 = arith.addf %216, %215 : vector<8x128xf32>
    %218 = arith.divf %216, %217 : vector<8x128xf32>
    %c2_106 = arith.constant 2 : index
    %c0_107 = arith.constant 0 : index
    %c0_108 = arith.constant 0 : index
    %219 = vector.load %arg10[%c2_106, %c0_107, %c0_108] : memref<8x8x128xf32, #tpu.memory_space<vmem>>, vector<1x8x128xf32>
    %220 = vector.shape_cast %219 : vector<1x8x128xf32> to vector<8x128xf32>
    %221 = vector.shape_cast %218 : vector<8x128xf32> to vector<1x8x128xf32>
    tpu.vector_store %arg10[%c2_106, %c0_107, %c0_108], %221 {strides = array<i32>} : memref<8x8x128xf32, #tpu.memory_space<vmem>>, vector<1x8x128xf32>,
    %c1_i32_109 = arith.constant 1 : i32
    %222 = arith.addi %156, %c1_i32_109 : i32
    %223 = arith.index_cast %222 : i32 to index
    %c0_110 = arith.constant 0 : index
    %c0_111 = arith.constant 0 : index
    %224 = vector.load %arg11[%223, %c0_110, %c0_111] : memref<9x8x128xf32, #tpu.memory_space<vmem>>, vector<1x8x128xf32>
    %225 = vector.shape_cast %224 : vector<1x8x128xf32> to vector<8x128xf32>
    %226 = vector.shape_cast %218 : vector<8x128xf32> to vector<1x8x128xf32>
    tpu.vector_store %arg11[%223, %c0_110, %c0_111], %226 {strides = array<i32>} : memref<9x8x128xf32, #tpu.memory_space<vmem>>, vector<1x8x128xf32>,
    %c3_i32 = arith.constant 3 : i32
    %227 = arith.addi %0, %c3_i32 : i32
    %c3 = arith.constant 3 : index
    %c0_112 = arith.constant 0 : index
    %c0_113 = arith.constant 0 : index
    %228 = vector.load %arg1[%c3, %c0_112, %c0_113] : memref<8x8x256xf32, #tpu.memory_space<vmem>>, vector<1x8x256xf32>
    %229 = vector.shape_cast %228 : vector<1x8x256xf32> to vector<8x256xf32>
    %c0_114 = arith.constant 0 : index
    %c0_115 = arith.constant 0 : index
    %230 = vector.load %arg3[%c0_114, %c0_115] : memref<128x256xf32, #tpu.memory_space<vmem>>, vector<128x256xf32>
    %cst_116 = arith.constant dense<0.000000e+00> : vector<8x256xf32>
    %231 = tpu.matmul %218, %230, %cst_116 {dimension_numbers = #tpu.dot_dimension_numbers<[1], [0], [0], [1], [0, 0, 1, 1], [], []>} : vector<8x128xf32>, vector<128x256xf32>, vector<8x256xf32> -> vector<8x256xf32>
    %232 = arith.addf %229, %231 : vector<8x256xf32>
    %233 = vector.extract_strided_slice %232 {offsets = [0, 0], sizes = [8, 128], strides = [1, 1]} : vector<8x256xf32> to vector<8x128xf32>
    %234 = vector.extract_strided_slice %232 {offsets = [0, 128], sizes = [8, 128], strides = [1, 1]} : vector<8x256xf32> to vector<8x128xf32>
    %cst_117 = arith.constant 0.000000e+00 : f32
    %235 = vector.broadcast %cst_117 : f32 to vector<8x128xf32>
    %236 = arith.cmpf ogt, %234, %235 : vector<8x128xf32>
    %237 = arith.extui %236 : vector<8x128xi1> to vector<8x128xi32>
    %238 = arith.sitofp %237 : vector<8x128xi32> to vector<8x128xf32>
    %239 = arith.sitofp %227 : i32 to f32
    %240 = vector.broadcast %10 : vector<1x128xf32> to vector<8x128xf32>
    %241 = arith.mulf %238, %240 : vector<8x128xf32>
    %cst_118 = arith.constant dense<0.000000e+00> : vector<8xf32>
    %242 = vector.multi_reduction <add>, %241, %cst_118 [1] : vector<8x128xf32> to vector<8xf32>
    %243 = vector.shape_cast %242 : vector<8xf32> to vector<8x1xf32>
    %cst_119 = arith.constant 0.000000e+00 : f32
    %244 = vector.broadcast %cst_119 : f32 to vector<8x1xf32>
    %245 = arith.maximumf %244, %243 : vector<8x1xf32>
    %246 = vector.broadcast %239 : f32 to vector<8x1xf32>
    %247 = arith.minimumf %246, %245 : vector<8x1xf32>
    %248 = vector.broadcast %11 : vector<1x128xf32> to vector<8x128xf32>
    %249 = arith.mulf %238, %248 : vector<8x128xf32>
    %cst_120 = arith.constant dense<0.000000e+00> : vector<8xf32>
    %250 = vector.multi_reduction <add>, %249, %cst_120 [1] : vector<8x128xf32> to vector<8xf32>
    %251 = vector.shape_cast %250 : vector<8xf32> to vector<8x1xf32>
    %cst_121 = arith.constant 0.000000e+00 : f32
    %252 = vector.broadcast %cst_121 : f32 to vector<8x1xf32>
    %253 = arith.maximumf %252, %251 : vector<8x1xf32>
    %254 = vector.broadcast %239 : f32 to vector<8x1xf32>
    %255 = arith.minimumf %254, %253 : vector<8x1xf32>
    %cst_122 = arith.constant 0.000000e+00 : f32
    %256 = vector.broadcast %cst_122 : f32 to vector<8x128xf32>
    %c0_i32_123 = arith.constant 0 : i32
    %c9_i32_124 = arith.constant 9 : i32
    %257 = arith.addi %c0_i32_123, %c9_i32_124 : i32
    %c1_i32_125 = arith.constant 1 : i32
    %258:2 = scf.for %arg12 = %c0_i32_123 to %257 step %c1_i32_125 iter_args(%arg13 = %256, %arg14 = %256) -> (vector<8x128xf32>, vector<8x128xf32>)  : i32 {
      %582 = arith.index_cast %arg12 : i32 to index
      %c0_277 = arith.constant 0 : index
      %c0_278 = arith.constant 0 : index
      %583 = vector.load %arg11[%582, %c0_277, %c0_278] : memref<9x8x128xf32, #tpu.memory_space<vmem>>, vector<1x8x128xf32>
      %584 = vector.shape_cast %583 : vector<1x8x128xf32> to vector<8x128xf32>
      %585 = arith.sitofp %arg12 : i32 to f32
      %586 = vector.broadcast %585 : f32 to vector<8x1xf32>
      %587 = arith.cmpf oeq, %247, %586 : vector<8x1xf32>
      %cst_279 = arith.constant 0.000000e+00 : f32
      %588 = vector.shape_cast %587 : vector<8x1xi1> to vector<8x1xi1>
      %589 = vector.broadcast %588 : vector<8x1xi1> to vector<8x128xi1>
      %590 = vector.broadcast %cst_279 : f32 to vector<8x128xf32>
      %591 = arith.select %589, %584, %590 : vector<8x128xi1>, vector<8x128xf32>
      %592 = arith.addf %arg13, %591 : vector<8x128xf32>
      %593 = vector.broadcast %585 : f32 to vector<8x1xf32>
      %594 = arith.cmpf oeq, %255, %593 : vector<8x1xf32>
      %cst_280 = arith.constant 0.000000e+00 : f32
      %595 = vector.shape_cast %594 : vector<8x1xi1> to vector<8x1xi1>
      %596 = vector.broadcast %595 : vector<8x1xi1> to vector<8x128xi1>
      %597 = vector.broadcast %cst_280 : f32 to vector<8x128xf32>
      %598 = arith.select %596, %584, %597 : vector<8x128xi1>, vector<8x128xf32>
      %599 = arith.addf %arg14, %598 : vector<8x128xf32>
      scf.yield %592, %599 : vector<8x128xf32>, vector<8x128xf32>
    }
    %c9_i32_126 = arith.constant 9 : i32
    %c0_127 = arith.constant 0 : index
    %c0_128 = arith.constant 0 : index
    %259 = vector.load %arg4[%c0_127, %c0_128] : memref<128x128xf32, #tpu.memory_space<vmem>>, vector<128x128xf32>
    %cst_129 = arith.constant dense<0.000000e+00> : vector<8x128xf32>
    %260 = tpu.matmul %258#0, %259, %cst_129 {dimension_numbers = #tpu.dot_dimension_numbers<[1], [0], [0], [1], [0, 0, 1, 1], [], []>} : vector<8x128xf32>, vector<128x128xf32>, vector<8x128xf32> -> vector<8x128xf32>
    %261 = arith.addf %233, %260 : vector<8x128xf32>
    %c0_130 = arith.constant 0 : index
    %c0_131 = arith.constant 0 : index
    %262 = vector.load %arg5[%c0_130, %c0_131] : memref<128x128xf32, #tpu.memory_space<vmem>>, vector<128x128xf32>
    %cst_132 = arith.constant dense<0.000000e+00> : vector<8x128xf32>
    %263 = tpu.matmul %258#1, %262, %cst_132 {dimension_numbers = #tpu.dot_dimension_numbers<[1], [0], [0], [1], [0, 0, 1, 1], [], []>} : vector<8x128xf32>, vector<128x128xf32>, vector<8x128xf32> -> vector<8x128xf32>
    %264 = arith.addf %261, %263 : vector<8x128xf32>
    %cst_133 = arith.constant dense<0.000000e+00> : vector<8xf32>
    %265 = vector.multi_reduction <add>, %264, %cst_133 [1] : vector<8x128xf32> to vector<8xf32>
    %266 = vector.shape_cast %265 : vector<8xf32> to vector<8x1xf32>
    %cst_134 = arith.constant 1.280000e+02 : f32
    %267 = vector.broadcast %cst_134 : f32 to vector<8x1xf32>
    %268 = arith.divf %266, %267 : vector<8x1xf32>
    %269 = vector.broadcast %268 : vector<8x1xf32> to vector<8x128xf32>
    %270 = arith.subf %264, %269 : vector<8x128xf32>
    %271 = arith.mulf %270, %270 : vector<8x128xf32>
    %cst_135 = arith.constant dense<0.000000e+00> : vector<8xf32>
    %272 = vector.multi_reduction <add>, %271, %cst_135 [1] : vector<8x128xf32> to vector<8xf32>
    %273 = vector.shape_cast %272 : vector<8xf32> to vector<8x1xf32>
    %cst_136 = arith.constant 1.280000e+02 : f32
    %274 = vector.broadcast %cst_136 : f32 to vector<8x1xf32>
    %275 = arith.divf %273, %274 : vector<8x1xf32>
    %cst_137 = arith.constant 9.99999974E-6 : f32
    %276 = vector.broadcast %cst_137 : f32 to vector<8x1xf32>
    %277 = arith.addf %275, %276 : vector<8x1xf32>
    %278 = math.rsqrt %277 : vector<8x1xf32>
    %279 = vector.broadcast %278 : vector<8x1xf32> to vector<8x128xf32>
    %280 = arith.mulf %270, %279 : vector<8x128xf32>
    %281 = vector.broadcast %12 : vector<1x128xf32> to vector<8x128xf32>
    %282 = arith.mulf %280, %281 : vector<8x128xf32>
    %283 = vector.broadcast %13 : vector<1x128xf32> to vector<8x128xf32>
    %284 = arith.addf %282, %283 : vector<8x128xf32>
    %285 = arith.negf %284 : vector<8x128xf32>
    %286 = math.exp %285 : vector<8x128xf32>
    %cst_138 = arith.constant 1.000000e+00 : f32
    %287 = vector.broadcast %cst_138 : f32 to vector<8x128xf32>
    %288 = arith.addf %287, %286 : vector<8x128xf32>
    %289 = arith.divf %287, %288 : vector<8x128xf32>
    %c3_139 = arith.constant 3 : index
    %c0_140 = arith.constant 0 : index
    %c0_141 = arith.constant 0 : index
    %290 = vector.load %arg10[%c3_139, %c0_140, %c0_141] : memref<8x8x128xf32, #tpu.memory_space<vmem>>, vector<1x8x128xf32>
    %291 = vector.shape_cast %290 : vector<1x8x128xf32> to vector<8x128xf32>
    %292 = vector.shape_cast %289 : vector<8x128xf32> to vector<1x8x128xf32>
    tpu.vector_store %arg10[%c3_139, %c0_140, %c0_141], %292 {strides = array<i32>} : memref<8x8x128xf32, #tpu.memory_space<vmem>>, vector<1x8x128xf32>,
    %c1_i32_142 = arith.constant 1 : i32
    %293 = arith.addi %227, %c1_i32_142 : i32
    %294 = arith.index_cast %293 : i32 to index
    %c0_143 = arith.constant 0 : index
    %c0_144 = arith.constant 0 : index
    %295 = vector.load %arg11[%294, %c0_143, %c0_144] : memref<9x8x128xf32, #tpu.memory_space<vmem>>, vector<1x8x128xf32>
    %296 = vector.shape_cast %295 : vector<1x8x128xf32> to vector<8x128xf32>
    %297 = vector.shape_cast %289 : vector<8x128xf32> to vector<1x8x128xf32>
    tpu.vector_store %arg11[%294, %c0_143, %c0_144], %297 {strides = array<i32>} : memref<9x8x128xf32, #tpu.memory_space<vmem>>, vector<1x8x128xf32>,
    %c4_i32 = arith.constant 4 : i32
    %298 = arith.addi %0, %c4_i32 : i32
    %c4 = arith.constant 4 : index
    %c0_145 = arith.constant 0 : index
    %c0_146 = arith.constant 0 : index
    %299 = vector.load %arg1[%c4, %c0_145, %c0_146] : memref<8x8x256xf32, #tpu.memory_space<vmem>>, vector<1x8x256xf32>
    %300 = vector.shape_cast %299 : vector<1x8x256xf32> to vector<8x256xf32>
    %c0_147 = arith.constant 0 : index
    %c0_148 = arith.constant 0 : index
    %301 = vector.load %arg3[%c0_147, %c0_148] : memref<128x256xf32, #tpu.memory_space<vmem>>, vector<128x256xf32>
    %cst_149 = arith.constant dense<0.000000e+00> : vector<8x256xf32>
    %302 = tpu.matmul %289, %301, %cst_149 {dimension_numbers = #tpu.dot_dimension_numbers<[1], [0], [0], [1], [0, 0, 1, 1], [], []>} : vector<8x128xf32>, vector<128x256xf32>, vector<8x256xf32> -> vector<8x256xf32>
    %303 = arith.addf %300, %302 : vector<8x256xf32>
    %304 = vector.extract_strided_slice %303 {offsets = [0, 0], sizes = [8, 128], strides = [1, 1]} : vector<8x256xf32> to vector<8x128xf32>
    %305 = vector.extract_strided_slice %303 {offsets = [0, 128], sizes = [8, 128], strides = [1, 1]} : vector<8x256xf32> to vector<8x128xf32>
    %cst_150 = arith.constant 0.000000e+00 : f32
    %306 = vector.broadcast %cst_150 : f32 to vector<8x128xf32>
    %307 = arith.cmpf ogt, %305, %306 : vector<8x128xf32>
    %308 = arith.extui %307 : vector<8x128xi1> to vector<8x128xi32>
    %309 = arith.sitofp %308 : vector<8x128xi32> to vector<8x128xf32>
    %310 = arith.sitofp %298 : i32 to f32
    %311 = vector.broadcast %10 : vector<1x128xf32> to vector<8x128xf32>
    %312 = arith.mulf %309, %311 : vector<8x128xf32>
    %cst_151 = arith.constant dense<0.000000e+00> : vector<8xf32>
    %313 = vector.multi_reduction <add>, %312, %cst_151 [1] : vector<8x128xf32> to vector<8xf32>
    %314 = vector.shape_cast %313 : vector<8xf32> to vector<8x1xf32>
    %cst_152 = arith.constant 0.000000e+00 : f32
    %315 = vector.broadcast %cst_152 : f32 to vector<8x1xf32>
    %316 = arith.maximumf %315, %314 : vector<8x1xf32>
    %317 = vector.broadcast %310 : f32 to vector<8x1xf32>
    %318 = arith.minimumf %317, %316 : vector<8x1xf32>
    %319 = vector.broadcast %11 : vector<1x128xf32> to vector<8x128xf32>
    %320 = arith.mulf %309, %319 : vector<8x128xf32>
    %cst_153 = arith.constant dense<0.000000e+00> : vector<8xf32>
    %321 = vector.multi_reduction <add>, %320, %cst_153 [1] : vector<8x128xf32> to vector<8xf32>
    %322 = vector.shape_cast %321 : vector<8xf32> to vector<8x1xf32>
    %cst_154 = arith.constant 0.000000e+00 : f32
    %323 = vector.broadcast %cst_154 : f32 to vector<8x1xf32>
    %324 = arith.maximumf %323, %322 : vector<8x1xf32>
    %325 = vector.broadcast %310 : f32 to vector<8x1xf32>
    %326 = arith.minimumf %325, %324 : vector<8x1xf32>
    %cst_155 = arith.constant 0.000000e+00 : f32
    %327 = vector.broadcast %cst_155 : f32 to vector<8x128xf32>
    %c0_i32_156 = arith.constant 0 : i32
    %c9_i32_157 = arith.constant 9 : i32
    %328 = arith.addi %c0_i32_156, %c9_i32_157 : i32
    %c1_i32_158 = arith.constant 1 : i32
    %329:2 = scf.for %arg12 = %c0_i32_156 to %328 step %c1_i32_158 iter_args(%arg13 = %327, %arg14 = %327) -> (vector<8x128xf32>, vector<8x128xf32>)  : i32 {
      %582 = arith.index_cast %arg12 : i32 to index
      %c0_277 = arith.constant 0 : index
      %c0_278 = arith.constant 0 : index
      %583 = vector.load %arg11[%582, %c0_277, %c0_278] : memref<9x8x128xf32, #tpu.memory_space<vmem>>, vector<1x8x128xf32>
      %584 = vector.shape_cast %583 : vector<1x8x128xf32> to vector<8x128xf32>
      %585 = arith.sitofp %arg12 : i32 to f32
      %586 = vector.broadcast %585 : f32 to vector<8x1xf32>
      %587 = arith.cmpf oeq, %318, %586 : vector<8x1xf32>
      %cst_279 = arith.constant 0.000000e+00 : f32
      %588 = vector.shape_cast %587 : vector<8x1xi1> to vector<8x1xi1>
      %589 = vector.broadcast %588 : vector<8x1xi1> to vector<8x128xi1>
      %590 = vector.broadcast %cst_279 : f32 to vector<8x128xf32>
      %591 = arith.select %589, %584, %590 : vector<8x128xi1>, vector<8x128xf32>
      %592 = arith.addf %arg13, %591 : vector<8x128xf32>
      %593 = vector.broadcast %585 : f32 to vector<8x1xf32>
      %594 = arith.cmpf oeq, %326, %593 : vector<8x1xf32>
      %cst_280 = arith.constant 0.000000e+00 : f32
      %595 = vector.shape_cast %594 : vector<8x1xi1> to vector<8x1xi1>
      %596 = vector.broadcast %595 : vector<8x1xi1> to vector<8x128xi1>
      %597 = vector.broadcast %cst_280 : f32 to vector<8x128xf32>
      %598 = arith.select %596, %584, %597 : vector<8x128xi1>, vector<8x128xf32>
      %599 = arith.addf %arg14, %598 : vector<8x128xf32>
      scf.yield %592, %599 : vector<8x128xf32>, vector<8x128xf32>
    }
    %c9_i32_159 = arith.constant 9 : i32
    %c0_160 = arith.constant 0 : index
    %c0_161 = arith.constant 0 : index
    %330 = vector.load %arg4[%c0_160, %c0_161] : memref<128x128xf32, #tpu.memory_space<vmem>>, vector<128x128xf32>
    %cst_162 = arith.constant dense<0.000000e+00> : vector<8x128xf32>
    %331 = tpu.matmul %329#0, %330, %cst_162 {dimension_numbers = #tpu.dot_dimension_numbers<[1], [0], [0], [1], [0, 0, 1, 1], [], []>} : vector<8x128xf32>, vector<128x128xf32>, vector<8x128xf32> -> vector<8x128xf32>
    %332 = arith.addf %304, %331 : vector<8x128xf32>
    %c0_163 = arith.constant 0 : index
    %c0_164 = arith.constant 0 : index
    %333 = vector.load %arg5[%c0_163, %c0_164] : memref<128x128xf32, #tpu.memory_space<vmem>>, vector<128x128xf32>
    %cst_165 = arith.constant dense<0.000000e+00> : vector<8x128xf32>
    %334 = tpu.matmul %329#1, %333, %cst_165 {dimension_numbers = #tpu.dot_dimension_numbers<[1], [0], [0], [1], [0, 0, 1, 1], [], []>} : vector<8x128xf32>, vector<128x128xf32>, vector<8x128xf32> -> vector<8x128xf32>
    %335 = arith.addf %332, %334 : vector<8x128xf32>
    %cst_166 = arith.constant dense<0.000000e+00> : vector<8xf32>
    %336 = vector.multi_reduction <add>, %335, %cst_166 [1] : vector<8x128xf32> to vector<8xf32>
    %337 = vector.shape_cast %336 : vector<8xf32> to vector<8x1xf32>
    %cst_167 = arith.constant 1.280000e+02 : f32
    %338 = vector.broadcast %cst_167 : f32 to vector<8x1xf32>
    %339 = arith.divf %337, %338 : vector<8x1xf32>
    %340 = vector.broadcast %339 : vector<8x1xf32> to vector<8x128xf32>
    %341 = arith.subf %335, %340 : vector<8x128xf32>
    %342 = arith.mulf %341, %341 : vector<8x128xf32>
    %cst_168 = arith.constant dense<0.000000e+00> : vector<8xf32>
    %343 = vector.multi_reduction <add>, %342, %cst_168 [1] : vector<8x128xf32> to vector<8xf32>
    %344 = vector.shape_cast %343 : vector<8xf32> to vector<8x1xf32>
    %cst_169 = arith.constant 1.280000e+02 : f32
    %345 = vector.broadcast %cst_169 : f32 to vector<8x1xf32>
    %346 = arith.divf %344, %345 : vector<8x1xf32>
    %cst_170 = arith.constant 9.99999974E-6 : f32
    %347 = vector.broadcast %cst_170 : f32 to vector<8x1xf32>
    %348 = arith.addf %346, %347 : vector<8x1xf32>
    %349 = math.rsqrt %348 : vector<8x1xf32>
    %350 = vector.broadcast %349 : vector<8x1xf32> to vector<8x128xf32>
    %351 = arith.mulf %341, %350 : vector<8x128xf32>
    %352 = vector.broadcast %12 : vector<1x128xf32> to vector<8x128xf32>
    %353 = arith.mulf %351, %352 : vector<8x128xf32>
    %354 = vector.broadcast %13 : vector<1x128xf32> to vector<8x128xf32>
    %355 = arith.addf %353, %354 : vector<8x128xf32>
    %356 = arith.negf %355 : vector<8x128xf32>
    %357 = math.exp %356 : vector<8x128xf32>
    %cst_171 = arith.constant 1.000000e+00 : f32
    %358 = vector.broadcast %cst_171 : f32 to vector<8x128xf32>
    %359 = arith.addf %358, %357 : vector<8x128xf32>
    %360 = arith.divf %358, %359 : vector<8x128xf32>
    %c4_172 = arith.constant 4 : index
    %c0_173 = arith.constant 0 : index
    %c0_174 = arith.constant 0 : index
    %361 = vector.load %arg10[%c4_172, %c0_173, %c0_174] : memref<8x8x128xf32, #tpu.memory_space<vmem>>, vector<1x8x128xf32>
    %362 = vector.shape_cast %361 : vector<1x8x128xf32> to vector<8x128xf32>
    %363 = vector.shape_cast %360 : vector<8x128xf32> to vector<1x8x128xf32>
    tpu.vector_store %arg10[%c4_172, %c0_173, %c0_174], %363 {strides = array<i32>} : memref<8x8x128xf32, #tpu.memory_space<vmem>>, vector<1x8x128xf32>,
    %c1_i32_175 = arith.constant 1 : i32
    %364 = arith.addi %298, %c1_i32_175 : i32
    %365 = arith.index_cast %364 : i32 to index
    %c0_176 = arith.constant 0 : index
    %c0_177 = arith.constant 0 : index
    %366 = vector.load %arg11[%365, %c0_176, %c0_177] : memref<9x8x128xf32, #tpu.memory_space<vmem>>, vector<1x8x128xf32>
    %367 = vector.shape_cast %366 : vector<1x8x128xf32> to vector<8x128xf32>
    %368 = vector.shape_cast %360 : vector<8x128xf32> to vector<1x8x128xf32>
    tpu.vector_store %arg11[%365, %c0_176, %c0_177], %368 {strides = array<i32>} : memref<9x8x128xf32, #tpu.memory_space<vmem>>, vector<1x8x128xf32>,
    %c5_i32 = arith.constant 5 : i32
    %369 = arith.addi %0, %c5_i32 : i32
    %c5 = arith.constant 5 : index
    %c0_178 = arith.constant 0 : index
    %c0_179 = arith.constant 0 : index
    %370 = vector.load %arg1[%c5, %c0_178, %c0_179] : memref<8x8x256xf32, #tpu.memory_space<vmem>>, vector<1x8x256xf32>
    %371 = vector.shape_cast %370 : vector<1x8x256xf32> to vector<8x256xf32>
    %c0_180 = arith.constant 0 : index
    %c0_181 = arith.constant 0 : index
    %372 = vector.load %arg3[%c0_180, %c0_181] : memref<128x256xf32, #tpu.memory_space<vmem>>, vector<128x256xf32>
    %cst_182 = arith.constant dense<0.000000e+00> : vector<8x256xf32>
    %373 = tpu.matmul %360, %372, %cst_182 {dimension_numbers = #tpu.dot_dimension_numbers<[1], [0], [0], [1], [0, 0, 1, 1], [], []>} : vector<8x128xf32>, vector<128x256xf32>, vector<8x256xf32> -> vector<8x256xf32>
    %374 = arith.addf %371, %373 : vector<8x256xf32>
    %375 = vector.extract_strided_slice %374 {offsets = [0, 0], sizes = [8, 128], strides = [1, 1]} : vector<8x256xf32> to vector<8x128xf32>
    %376 = vector.extract_strided_slice %374 {offsets = [0, 128], sizes = [8, 128], strides = [1, 1]} : vector<8x256xf32> to vector<8x128xf32>
    %cst_183 = arith.constant 0.000000e+00 : f32
    %377 = vector.broadcast %cst_183 : f32 to vector<8x128xf32>
    %378 = arith.cmpf ogt, %376, %377 : vector<8x128xf32>
    %379 = arith.extui %378 : vector<8x128xi1> to vector<8x128xi32>
    %380 = arith.sitofp %379 : vector<8x128xi32> to vector<8x128xf32>
    %381 = arith.sitofp %369 : i32 to f32
    %382 = vector.broadcast %10 : vector<1x128xf32> to vector<8x128xf32>
    %383 = arith.mulf %380, %382 : vector<8x128xf32>
    %cst_184 = arith.constant dense<0.000000e+00> : vector<8xf32>
    %384 = vector.multi_reduction <add>, %383, %cst_184 [1] : vector<8x128xf32> to vector<8xf32>
    %385 = vector.shape_cast %384 : vector<8xf32> to vector<8x1xf32>
    %cst_185 = arith.constant 0.000000e+00 : f32
    %386 = vector.broadcast %cst_185 : f32 to vector<8x1xf32>
    %387 = arith.maximumf %386, %385 : vector<8x1xf32>
    %388 = vector.broadcast %381 : f32 to vector<8x1xf32>
    %389 = arith.minimumf %388, %387 : vector<8x1xf32>
    %390 = vector.broadcast %11 : vector<1x128xf32> to vector<8x128xf32>
    %391 = arith.mulf %380, %390 : vector<8x128xf32>
    %cst_186 = arith.constant dense<0.000000e+00> : vector<8xf32>
    %392 = vector.multi_reduction <add>, %391, %cst_186 [1] : vector<8x128xf32> to vector<8xf32>
    %393 = vector.shape_cast %392 : vector<8xf32> to vector<8x1xf32>
    %cst_187 = arith.constant 0.000000e+00 : f32
    %394 = vector.broadcast %cst_187 : f32 to vector<8x1xf32>
    %395 = arith.maximumf %394, %393 : vector<8x1xf32>
    %396 = vector.broadcast %381 : f32 to vector<8x1xf32>
    %397 = arith.minimumf %396, %395 : vector<8x1xf32>
    %cst_188 = arith.constant 0.000000e+00 : f32
    %398 = vector.broadcast %cst_188 : f32 to vector<8x128xf32>
    %c0_i32_189 = arith.constant 0 : i32
    %c9_i32_190 = arith.constant 9 : i32
    %399 = arith.addi %c0_i32_189, %c9_i32_190 : i32
    %c1_i32_191 = arith.constant 1 : i32
    %400:2 = scf.for %arg12 = %c0_i32_189 to %399 step %c1_i32_191 iter_args(%arg13 = %398, %arg14 = %398) -> (vector<8x128xf32>, vector<8x128xf32>)  : i32 {
      %582 = arith.index_cast %arg12 : i32 to index
      %c0_277 = arith.constant 0 : index
      %c0_278 = arith.constant 0 : index
      %583 = vector.load %arg11[%582, %c0_277, %c0_278] : memref<9x8x128xf32, #tpu.memory_space<vmem>>, vector<1x8x128xf32>
      %584 = vector.shape_cast %583 : vector<1x8x128xf32> to vector<8x128xf32>
      %585 = arith.sitofp %arg12 : i32 to f32
      %586 = vector.broadcast %585 : f32 to vector<8x1xf32>
      %587 = arith.cmpf oeq, %389, %586 : vector<8x1xf32>
      %cst_279 = arith.constant 0.000000e+00 : f32
      %588 = vector.shape_cast %587 : vector<8x1xi1> to vector<8x1xi1>
      %589 = vector.broadcast %588 : vector<8x1xi1> to vector<8x128xi1>
      %590 = vector.broadcast %cst_279 : f32 to vector<8x128xf32>
      %591 = arith.select %589, %584, %590 : vector<8x128xi1>, vector<8x128xf32>
      %592 = arith.addf %arg13, %591 : vector<8x128xf32>
      %593 = vector.broadcast %585 : f32 to vector<8x1xf32>
      %594 = arith.cmpf oeq, %397, %593 : vector<8x1xf32>
      %cst_280 = arith.constant 0.000000e+00 : f32
      %595 = vector.shape_cast %594 : vector<8x1xi1> to vector<8x1xi1>
      %596 = vector.broadcast %595 : vector<8x1xi1> to vector<8x128xi1>
      %597 = vector.broadcast %cst_280 : f32 to vector<8x128xf32>
      %598 = arith.select %596, %584, %597 : vector<8x128xi1>, vector<8x128xf32>
      %599 = arith.addf %arg14, %598 : vector<8x128xf32>
      scf.yield %592, %599 : vector<8x128xf32>, vector<8x128xf32>
    }
    %c9_i32_192 = arith.constant 9 : i32
    %c0_193 = arith.constant 0 : index
    %c0_194 = arith.constant 0 : index
    %401 = vector.load %arg4[%c0_193, %c0_194] : memref<128x128xf32, #tpu.memory_space<vmem>>, vector<128x128xf32>
    %cst_195 = arith.constant dense<0.000000e+00> : vector<8x128xf32>
    %402 = tpu.matmul %400#0, %401, %cst_195 {dimension_numbers = #tpu.dot_dimension_numbers<[1], [0], [0], [1], [0, 0, 1, 1], [], []>} : vector<8x128xf32>, vector<128x128xf32>, vector<8x128xf32> -> vector<8x128xf32>
    %403 = arith.addf %375, %402 : vector<8x128xf32>
    %c0_196 = arith.constant 0 : index
    %c0_197 = arith.constant 0 : index
    %404 = vector.load %arg5[%c0_196, %c0_197] : memref<128x128xf32, #tpu.memory_space<vmem>>, vector<128x128xf32>
    %cst_198 = arith.constant dense<0.000000e+00> : vector<8x128xf32>
    %405 = tpu.matmul %400#1, %404, %cst_198 {dimension_numbers = #tpu.dot_dimension_numbers<[1], [0], [0], [1], [0, 0, 1, 1], [], []>} : vector<8x128xf32>, vector<128x128xf32>, vector<8x128xf32> -> vector<8x128xf32>
    %406 = arith.addf %403, %405 : vector<8x128xf32>
    %cst_199 = arith.constant dense<0.000000e+00> : vector<8xf32>
    %407 = vector.multi_reduction <add>, %406, %cst_199 [1] : vector<8x128xf32> to vector<8xf32>
    %408 = vector.shape_cast %407 : vector<8xf32> to vector<8x1xf32>
    %cst_200 = arith.constant 1.280000e+02 : f32
    %409 = vector.broadcast %cst_200 : f32 to vector<8x1xf32>
    %410 = arith.divf %408, %409 : vector<8x1xf32>
    %411 = vector.broadcast %410 : vector<8x1xf32> to vector<8x128xf32>
    %412 = arith.subf %406, %411 : vector<8x128xf32>
    %413 = arith.mulf %412, %412 : vector<8x128xf32>
    %cst_201 = arith.constant dense<0.000000e+00> : vector<8xf32>
    %414 = vector.multi_reduction <add>, %413, %cst_201 [1] : vector<8x128xf32> to vector<8xf32>
    %415 = vector.shape_cast %414 : vector<8xf32> to vector<8x1xf32>
    %cst_202 = arith.constant 1.280000e+02 : f32
    %416 = vector.broadcast %cst_202 : f32 to vector<8x1xf32>
    %417 = arith.divf %415, %416 : vector<8x1xf32>
    %cst_203 = arith.constant 9.99999974E-6 : f32
    %418 = vector.broadcast %cst_203 : f32 to vector<8x1xf32>
    %419 = arith.addf %417, %418 : vector<8x1xf32>
    %420 = math.rsqrt %419 : vector<8x1xf32>
    %421 = vector.broadcast %420 : vector<8x1xf32> to vector<8x128xf32>
    %422 = arith.mulf %412, %421 : vector<8x128xf32>
    %423 = vector.broadcast %12 : vector<1x128xf32> to vector<8x128xf32>
    %424 = arith.mulf %422, %423 : vector<8x128xf32>
    %425 = vector.broadcast %13 : vector<1x128xf32> to vector<8x128xf32>
    %426 = arith.addf %424, %425 : vector<8x128xf32>
    %427 = arith.negf %426 : vector<8x128xf32>
    %428 = math.exp %427 : vector<8x128xf32>
    %cst_204 = arith.constant 1.000000e+00 : f32
    %429 = vector.broadcast %cst_204 : f32 to vector<8x128xf32>
    %430 = arith.addf %429, %428 : vector<8x128xf32>
    %431 = arith.divf %429, %430 : vector<8x128xf32>
    %c5_205 = arith.constant 5 : index
    %c0_206 = arith.constant 0 : index
    %c0_207 = arith.constant 0 : index
    %432 = vector.load %arg10[%c5_205, %c0_206, %c0_207] : memref<8x8x128xf32, #tpu.memory_space<vmem>>, vector<1x8x128xf32>
    %433 = vector.shape_cast %432 : vector<1x8x128xf32> to vector<8x128xf32>
    %434 = vector.shape_cast %431 : vector<8x128xf32> to vector<1x8x128xf32>
    tpu.vector_store %arg10[%c5_205, %c0_206, %c0_207], %434 {strides = array<i32>} : memref<8x8x128xf32, #tpu.memory_space<vmem>>, vector<1x8x128xf32>,
    %c1_i32_208 = arith.constant 1 : i32
    %435 = arith.addi %369, %c1_i32_208 : i32
    %436 = arith.index_cast %435 : i32 to index
    %c0_209 = arith.constant 0 : index
    %c0_210 = arith.constant 0 : index
    %437 = vector.load %arg11[%436, %c0_209, %c0_210] : memref<9x8x128xf32, #tpu.memory_space<vmem>>, vector<1x8x128xf32>
    %438 = vector.shape_cast %437 : vector<1x8x128xf32> to vector<8x128xf32>
    %439 = vector.shape_cast %431 : vector<8x128xf32> to vector<1x8x128xf32>
    tpu.vector_store %arg11[%436, %c0_209, %c0_210], %439 {strides = array<i32>} : memref<9x8x128xf32, #tpu.memory_space<vmem>>, vector<1x8x128xf32>,
    %c6_i32 = arith.constant 6 : i32
    %440 = arith.addi %0, %c6_i32 : i32
    %c6 = arith.constant 6 : index
    %c0_211 = arith.constant 0 : index
    %c0_212 = arith.constant 0 : index
    %441 = vector.load %arg1[%c6, %c0_211, %c0_212] : memref<8x8x256xf32, #tpu.memory_space<vmem>>, vector<1x8x256xf32>
    %442 = vector.shape_cast %441 : vector<1x8x256xf32> to vector<8x256xf32>
    %c0_213 = arith.constant 0 : index
    %c0_214 = arith.constant 0 : index
    %443 = vector.load %arg3[%c0_213, %c0_214] : memref<128x256xf32, #tpu.memory_space<vmem>>, vector<128x256xf32>
    %cst_215 = arith.constant dense<0.000000e+00> : vector<8x256xf32>
    %444 = tpu.matmul %431, %443, %cst_215 {dimension_numbers = #tpu.dot_dimension_numbers<[1], [0], [0], [1], [0, 0, 1, 1], [], []>} : vector<8x128xf32>, vector<128x256xf32>, vector<8x256xf32> -> vector<8x256xf32>
    %445 = arith.addf %442, %444 : vector<8x256xf32>
    %446 = vector.extract_strided_slice %445 {offsets = [0, 0], sizes = [8, 128], strides = [1, 1]} : vector<8x256xf32> to vector<8x128xf32>
    %447 = vector.extract_strided_slice %445 {offsets = [0, 128], sizes = [8, 128], strides = [1, 1]} : vector<8x256xf32> to vector<8x128xf32>
    %cst_216 = arith.constant 0.000000e+00 : f32
    %448 = vector.broadcast %cst_216 : f32 to vector<8x128xf32>
    %449 = arith.cmpf ogt, %447, %448 : vector<8x128xf32>
    %450 = arith.extui %449 : vector<8x128xi1> to vector<8x128xi32>
    %451 = arith.sitofp %450 : vector<8x128xi32> to vector<8x128xf32>
    %452 = arith.sitofp %440 : i32 to f32
    %453 = vector.broadcast %10 : vector<1x128xf32> to vector<8x128xf32>
    %454 = arith.mulf %451, %453 : vector<8x128xf32>
    %cst_217 = arith.constant dense<0.000000e+00> : vector<8xf32>
    %455 = vector.multi_reduction <add>, %454, %cst_217 [1] : vector<8x128xf32> to vector<8xf32>
    %456 = vector.shape_cast %455 : vector<8xf32> to vector<8x1xf32>
    %cst_218 = arith.constant 0.000000e+00 : f32
    %457 = vector.broadcast %cst_218 : f32 to vector<8x1xf32>
    %458 = arith.maximumf %457, %456 : vector<8x1xf32>
    %459 = vector.broadcast %452 : f32 to vector<8x1xf32>
    %460 = arith.minimumf %459, %458 : vector<8x1xf32>
    %461 = vector.broadcast %11 : vector<1x128xf32> to vector<8x128xf32>
    %462 = arith.mulf %451, %461 : vector<8x128xf32>
    %cst_219 = arith.constant dense<0.000000e+00> : vector<8xf32>
    %463 = vector.multi_reduction <add>, %462, %cst_219 [1] : vector<8x128xf32> to vector<8xf32>
    %464 = vector.shape_cast %463 : vector<8xf32> to vector<8x1xf32>
    %cst_220 = arith.constant 0.000000e+00 : f32
    %465 = vector.broadcast %cst_220 : f32 to vector<8x1xf32>
    %466 = arith.maximumf %465, %464 : vector<8x1xf32>
    %467 = vector.broadcast %452 : f32 to vector<8x1xf32>
    %468 = arith.minimumf %467, %466 : vector<8x1xf32>
    %cst_221 = arith.constant 0.000000e+00 : f32
    %469 = vector.broadcast %cst_221 : f32 to vector<8x128xf32>
    %c0_i32_222 = arith.constant 0 : i32
    %c9_i32_223 = arith.constant 9 : i32
    %470 = arith.addi %c0_i32_222, %c9_i32_223 : i32
    %c1_i32_224 = arith.constant 1 : i32
    %471:2 = scf.for %arg12 = %c0_i32_222 to %470 step %c1_i32_224 iter_args(%arg13 = %469, %arg14 = %469) -> (vector<8x128xf32>, vector<8x128xf32>)  : i32 {
      %582 = arith.index_cast %arg12 : i32 to index
      %c0_277 = arith.constant 0 : index
      %c0_278 = arith.constant 0 : index
      %583 = vector.load %arg11[%582, %c0_277, %c0_278] : memref<9x8x128xf32, #tpu.memory_space<vmem>>, vector<1x8x128xf32>
      %584 = vector.shape_cast %583 : vector<1x8x128xf32> to vector<8x128xf32>
      %585 = arith.sitofp %arg12 : i32 to f32
      %586 = vector.broadcast %585 : f32 to vector<8x1xf32>
      %587 = arith.cmpf oeq, %460, %586 : vector<8x1xf32>
      %cst_279 = arith.constant 0.000000e+00 : f32
      %588 = vector.shape_cast %587 : vector<8x1xi1> to vector<8x1xi1>
      %589 = vector.broadcast %588 : vector<8x1xi1> to vector<8x128xi1>
      %590 = vector.broadcast %cst_279 : f32 to vector<8x128xf32>
      %591 = arith.select %589, %584, %590 : vector<8x128xi1>, vector<8x128xf32>
      %592 = arith.addf %arg13, %591 : vector<8x128xf32>
      %593 = vector.broadcast %585 : f32 to vector<8x1xf32>
      %594 = arith.cmpf oeq, %468, %593 : vector<8x1xf32>
      %cst_280 = arith.constant 0.000000e+00 : f32
      %595 = vector.shape_cast %594 : vector<8x1xi1> to vector<8x1xi1>
      %596 = vector.broadcast %595 : vector<8x1xi1> to vector<8x128xi1>
      %597 = vector.broadcast %cst_280 : f32 to vector<8x128xf32>
      %598 = arith.select %596, %584, %597 : vector<8x128xi1>, vector<8x128xf32>
      %599 = arith.addf %arg14, %598 : vector<8x128xf32>
      scf.yield %592, %599 : vector<8x128xf32>, vector<8x128xf32>
    }
    %c9_i32_225 = arith.constant 9 : i32
    %c0_226 = arith.constant 0 : index
    %c0_227 = arith.constant 0 : index
    %472 = vector.load %arg4[%c0_226, %c0_227] : memref<128x128xf32, #tpu.memory_space<vmem>>, vector<128x128xf32>
    %cst_228 = arith.constant dense<0.000000e+00> : vector<8x128xf32>
    %473 = tpu.matmul %471#0, %472, %cst_228 {dimension_numbers = #tpu.dot_dimension_numbers<[1], [0], [0], [1], [0, 0, 1, 1], [], []>} : vector<8x128xf32>, vector<128x128xf32>, vector<8x128xf32> -> vector<8x128xf32>
    %474 = arith.addf %446, %473 : vector<8x128xf32>
    %c0_229 = arith.constant 0 : index
    %c0_230 = arith.constant 0 : index
    %475 = vector.load %arg5[%c0_229, %c0_230] : memref<128x128xf32, #tpu.memory_space<vmem>>, vector<128x128xf32>
    %cst_231 = arith.constant dense<0.000000e+00> : vector<8x128xf32>
    %476 = tpu.matmul %471#1, %475, %cst_231 {dimension_numbers = #tpu.dot_dimension_numbers<[1], [0], [0], [1], [0, 0, 1, 1], [], []>} : vector<8x128xf32>, vector<128x128xf32>, vector<8x128xf32> -> vector<8x128xf32>
    %477 = arith.addf %474, %476 : vector<8x128xf32>
    %cst_232 = arith.constant dense<0.000000e+00> : vector<8xf32>
    %478 = vector.multi_reduction <add>, %477, %cst_232 [1] : vector<8x128xf32> to vector<8xf32>
    %479 = vector.shape_cast %478 : vector<8xf32> to vector<8x1xf32>
    %cst_233 = arith.constant 1.280000e+02 : f32
    %480 = vector.broadcast %cst_233 : f32 to vector<8x1xf32>
    %481 = arith.divf %479, %480 : vector<8x1xf32>
    %482 = vector.broadcast %481 : vector<8x1xf32> to vector<8x128xf32>
    %483 = arith.subf %477, %482 : vector<8x128xf32>
    %484 = arith.mulf %483, %483 : vector<8x128xf32>
    %cst_234 = arith.constant dense<0.000000e+00> : vector<8xf32>
    %485 = vector.multi_reduction <add>, %484, %cst_234 [1] : vector<8x128xf32> to vector<8xf32>
    %486 = vector.shape_cast %485 : vector<8xf32> to vector<8x1xf32>
    %cst_235 = arith.constant 1.280000e+02 : f32
    %487 = vector.broadcast %cst_235 : f32 to vector<8x1xf32>
    %488 = arith.divf %486, %487 : vector<8x1xf32>
    %cst_236 = arith.constant 9.99999974E-6 : f32
    %489 = vector.broadcast %cst_236 : f32 to vector<8x1xf32>
    %490 = arith.addf %488, %489 : vector<8x1xf32>
    %491 = math.rsqrt %490 : vector<8x1xf32>
    %492 = vector.broadcast %491 : vector<8x1xf32> to vector<8x128xf32>
    %493 = arith.mulf %483, %492 : vector<8x128xf32>
    %494 = vector.broadcast %12 : vector<1x128xf32> to vector<8x128xf32>
    %495 = arith.mulf %493, %494 : vector<8x128xf32>
    %496 = vector.broadcast %13 : vector<1x128xf32> to vector<8x128xf32>
    %497 = arith.addf %495, %496 : vector<8x128xf32>
    %498 = arith.negf %497 : vector<8x128xf32>
    %499 = math.exp %498 : vector<8x128xf32>
    %cst_237 = arith.constant 1.000000e+00 : f32
    %500 = vector.broadcast %cst_237 : f32 to vector<8x128xf32>
    %501 = arith.addf %500, %499 : vector<8x128xf32>
    %502 = arith.divf %500, %501 : vector<8x128xf32>
    %c6_238 = arith.constant 6 : index
    %c0_239 = arith.constant 0 : index
    %c0_240 = arith.constant 0 : index
    %503 = vector.load %arg10[%c6_238, %c0_239, %c0_240] : memref<8x8x128xf32, #tpu.memory_space<vmem>>, vector<1x8x128xf32>
    %504 = vector.shape_cast %503 : vector<1x8x128xf32> to vector<8x128xf32>
    %505 = vector.shape_cast %502 : vector<8x128xf32> to vector<1x8x128xf32>
    tpu.vector_store %arg10[%c6_238, %c0_239, %c0_240], %505 {strides = array<i32>} : memref<8x8x128xf32, #tpu.memory_space<vmem>>, vector<1x8x128xf32>,
    %c1_i32_241 = arith.constant 1 : i32
    %506 = arith.addi %440, %c1_i32_241 : i32
    %507 = arith.index_cast %506 : i32 to index
    %c0_242 = arith.constant 0 : index
    %c0_243 = arith.constant 0 : index
    %508 = vector.load %arg11[%507, %c0_242, %c0_243] : memref<9x8x128xf32, #tpu.memory_space<vmem>>, vector<1x8x128xf32>
    %509 = vector.shape_cast %508 : vector<1x8x128xf32> to vector<8x128xf32>
    %510 = vector.shape_cast %502 : vector<8x128xf32> to vector<1x8x128xf32>
    tpu.vector_store %arg11[%507, %c0_242, %c0_243], %510 {strides = array<i32>} : memref<9x8x128xf32, #tpu.memory_space<vmem>>, vector<1x8x128xf32>,
    %c7_i32 = arith.constant 7 : i32
    %511 = arith.addi %0, %c7_i32 : i32
    %c7 = arith.constant 7 : index
    %c0_244 = arith.constant 0 : index
    %c0_245 = arith.constant 0 : index
    %512 = vector.load %arg1[%c7, %c0_244, %c0_245] : memref<8x8x256xf32, #tpu.memory_space<vmem>>, vector<1x8x256xf32>
    %513 = vector.shape_cast %512 : vector<1x8x256xf32> to vector<8x256xf32>
    %c0_246 = arith.constant 0 : index
    %c0_247 = arith.constant 0 : index
    %514 = vector.load %arg3[%c0_246, %c0_247] : memref<128x256xf32, #tpu.memory_space<vmem>>, vector<128x256xf32>
    %cst_248 = arith.constant dense<0.000000e+00> : vector<8x256xf32>
    %515 = tpu.matmul %502, %514, %cst_248 {dimension_numbers = #tpu.dot_dimension_numbers<[1], [0], [0], [1], [0, 0, 1, 1], [], []>} : vector<8x128xf32>, vector<128x256xf32>, vector<8x256xf32> -> vector<8x256xf32>
    %516 = arith.addf %513, %515 : vector<8x256xf32>
    %517 = vector.extract_strided_slice %516 {offsets = [0, 0], sizes = [8, 128], strides = [1, 1]} : vector<8x256xf32> to vector<8x128xf32>
    %518 = vector.extract_strided_slice %516 {offsets = [0, 128], sizes = [8, 128], strides = [1, 1]} : vector<8x256xf32> to vector<8x128xf32>
    %cst_249 = arith.constant 0.000000e+00 : f32
    %519 = vector.broadcast %cst_249 : f32 to vector<8x128xf32>
    %520 = arith.cmpf ogt, %518, %519 : vector<8x128xf32>
    %521 = arith.extui %520 : vector<8x128xi1> to vector<8x128xi32>
    %522 = arith.sitofp %521 : vector<8x128xi32> to vector<8x128xf32>
    %523 = arith.sitofp %511 : i32 to f32
    %524 = vector.broadcast %10 : vector<1x128xf32> to vector<8x128xf32>
    %525 = arith.mulf %522, %524 : vector<8x128xf32>
    %cst_250 = arith.constant dense<0.000000e+00> : vector<8xf32>
    %526 = vector.multi_reduction <add>, %525, %cst_250 [1] : vector<8x128xf32> to vector<8xf32>
    %527 = vector.shape_cast %526 : vector<8xf32> to vector<8x1xf32>
    %cst_251 = arith.constant 0.000000e+00 : f32
    %528 = vector.broadcast %cst_251 : f32 to vector<8x1xf32>
    %529 = arith.maximumf %528, %527 : vector<8x1xf32>
    %530 = vector.broadcast %523 : f32 to vector<8x1xf32>
    %531 = arith.minimumf %530, %529 : vector<8x1xf32>
    %532 = vector.broadcast %11 : vector<1x128xf32> to vector<8x128xf32>
    %533 = arith.mulf %522, %532 : vector<8x128xf32>
    %cst_252 = arith.constant dense<0.000000e+00> : vector<8xf32>
    %534 = vector.multi_reduction <add>, %533, %cst_252 [1] : vector<8x128xf32> to vector<8xf32>
    %535 = vector.shape_cast %534 : vector<8xf32> to vector<8x1xf32>
    %cst_253 = arith.constant 0.000000e+00 : f32
    %536 = vector.broadcast %cst_253 : f32 to vector<8x1xf32>
    %537 = arith.maximumf %536, %535 : vector<8x1xf32>
    %538 = vector.broadcast %523 : f32 to vector<8x1xf32>
    %539 = arith.minimumf %538, %537 : vector<8x1xf32>
    %cst_254 = arith.constant 0.000000e+00 : f32
    %540 = vector.broadcast %cst_254 : f32 to vector<8x128xf32>
    %c0_i32_255 = arith.constant 0 : i32
    %c9_i32_256 = arith.constant 9 : i32
    %541 = arith.addi %c0_i32_255, %c9_i32_256 : i32
    %c1_i32_257 = arith.constant 1 : i32
    %542:2 = scf.for %arg12 = %c0_i32_255 to %541 step %c1_i32_257 iter_args(%arg13 = %540, %arg14 = %540) -> (vector<8x128xf32>, vector<8x128xf32>)  : i32 {
      %582 = arith.index_cast %arg12 : i32 to index
      %c0_277 = arith.constant 0 : index
      %c0_278 = arith.constant 0 : index
      %583 = vector.load %arg11[%582, %c0_277, %c0_278] : memref<9x8x128xf32, #tpu.memory_space<vmem>>, vector<1x8x128xf32>
      %584 = vector.shape_cast %583 : vector<1x8x128xf32> to vector<8x128xf32>
      %585 = arith.sitofp %arg12 : i32 to f32
      %586 = vector.broadcast %585 : f32 to vector<8x1xf32>
      %587 = arith.cmpf oeq, %531, %586 : vector<8x1xf32>
      %cst_279 = arith.constant 0.000000e+00 : f32
      %588 = vector.shape_cast %587 : vector<8x1xi1> to vector<8x1xi1>
      %589 = vector.broadcast %588 : vector<8x1xi1> to vector<8x128xi1>
      %590 = vector.broadcast %cst_279 : f32 to vector<8x128xf32>
      %591 = arith.select %589, %584, %590 : vector<8x128xi1>, vector<8x128xf32>
      %592 = arith.addf %arg13, %591 : vector<8x128xf32>
      %593 = vector.broadcast %585 : f32 to vector<8x1xf32>
      %594 = arith.cmpf oeq, %539, %593 : vector<8x1xf32>
      %cst_280 = arith.constant 0.000000e+00 : f32
      %595 = vector.shape_cast %594 : vector<8x1xi1> to vector<8x1xi1>
      %596 = vector.broadcast %595 : vector<8x1xi1> to vector<8x128xi1>
      %597 = vector.broadcast %cst_280 : f32 to vector<8x128xf32>
      %598 = arith.select %596, %584, %597 : vector<8x128xi1>, vector<8x128xf32>
      %599 = arith.addf %arg14, %598 : vector<8x128xf32>
      scf.yield %592, %599 : vector<8x128xf32>, vector<8x128xf32>
    }
    %c9_i32_258 = arith.constant 9 : i32
    %c0_259 = arith.constant 0 : index
    %c0_260 = arith.constant 0 : index
    %543 = vector.load %arg4[%c0_259, %c0_260] : memref<128x128xf32, #tpu.memory_space<vmem>>, vector<128x128xf32>
    %cst_261 = arith.constant dense<0.000000e+00> : vector<8x128xf32>
    %544 = tpu.matmul %542#0, %543, %cst_261 {dimension_numbers = #tpu.dot_dimension_numbers<[1], [0], [0], [1], [0, 0, 1, 1], [], []>} : vector<8x128xf32>, vector<128x128xf32>, vector<8x128xf32> -> vector<8x128xf32>
    %545 = arith.addf %517, %544 : vector<8x128xf32>
    %c0_262 = arith.constant 0 : index
    %c0_263 = arith.constant 0 : index
    %546 = vector.load %arg5[%c0_262, %c0_263] : memref<128x128xf32, #tpu.memory_space<vmem>>, vector<128x128xf32>
    %cst_264 = arith.constant dense<0.000000e+00> : vector<8x128xf32>
    %547 = tpu.matmul %542#1, %546, %cst_264 {dimension_numbers = #tpu.dot_dimension_numbers<[1], [0], [0], [1], [0, 0, 1, 1], [], []>} : vector<8x128xf32>, vector<128x128xf32>, vector<8x128xf32> -> vector<8x128xf32>
    %548 = arith.addf %545, %547 : vector<8x128xf32>
    %cst_265 = arith.constant dense<0.000000e+00> : vector<8xf32>
    %549 = vector.multi_reduction <add>, %548, %cst_265 [1] : vector<8x128xf32> to vector<8xf32>
    %550 = vector.shape_cast %549 : vector<8xf32> to vector<8x1xf32>
    %cst_266 = arith.constant 1.280000e+02 : f32
    %551 = vector.broadcast %cst_266 : f32 to vector<8x1xf32>
    %552 = arith.divf %550, %551 : vector<8x1xf32>
    %553 = vector.broadcast %552 : vector<8x1xf32> to vector<8x128xf32>
    %554 = arith.subf %548, %553 : vector<8x128xf32>
    %555 = arith.mulf %554, %554 : vector<8x128xf32>
    %cst_267 = arith.constant dense<0.000000e+00> : vector<8xf32>
    %556 = vector.multi_reduction <add>, %555, %cst_267 [1] : vector<8x128xf32> to vector<8xf32>
    %557 = vector.shape_cast %556 : vector<8xf32> to vector<8x1xf32>
    %cst_268 = arith.constant 1.280000e+02 : f32
    %558 = vector.broadcast %cst_268 : f32 to vector<8x1xf32>
    %559 = arith.divf %557, %558 : vector<8x1xf32>
    %cst_269 = arith.constant 9.99999974E-6 : f32
    %560 = vector.broadcast %cst_269 : f32 to vector<8x1xf32>
    %561 = arith.addf %559, %560 : vector<8x1xf32>
    %562 = math.rsqrt %561 : vector<8x1xf32>
    %563 = vector.broadcast %562 : vector<8x1xf32> to vector<8x128xf32>
    %564 = arith.mulf %554, %563 : vector<8x128xf32>
    %565 = vector.broadcast %12 : vector<1x128xf32> to vector<8x128xf32>
    %566 = arith.mulf %564, %565 : vector<8x128xf32>
    %567 = vector.broadcast %13 : vector<1x128xf32> to vector<8x128xf32>
    %568 = arith.addf %566, %567 : vector<8x128xf32>
    %569 = arith.negf %568 : vector<8x128xf32>
    %570 = math.exp %569 : vector<8x128xf32>
    %cst_270 = arith.constant 1.000000e+00 : f32
    %571 = vector.broadcast %cst_270 : f32 to vector<8x128xf32>
    %572 = arith.addf %571, %570 : vector<8x128xf32>
    %573 = arith.divf %571, %572 : vector<8x128xf32>
    %c7_271 = arith.constant 7 : index
    %c0_272 = arith.constant 0 : index
    %c0_273 = arith.constant 0 : index
    %574 = vector.load %arg10[%c7_271, %c0_272, %c0_273] : memref<8x8x128xf32, #tpu.memory_space<vmem>>, vector<1x8x128xf32>
    %575 = vector.shape_cast %574 : vector<1x8x128xf32> to vector<8x128xf32>
    %576 = vector.shape_cast %573 : vector<8x128xf32> to vector<1x8x128xf32>
    tpu.vector_store %arg10[%c7_271, %c0_272, %c0_273], %576 {strides = array<i32>} : memref<8x8x128xf32, #tpu.memory_space<vmem>>, vector<1x8x128xf32>,
    %c1_i32_274 = arith.constant 1 : i32
    %577 = arith.addi %511, %c1_i32_274 : i32
    %578 = arith.index_cast %577 : i32 to index
    %c0_275 = arith.constant 0 : index
    %c0_276 = arith.constant 0 : index
    %579 = vector.load %arg11[%578, %c0_275, %c0_276] : memref<9x8x128xf32, #tpu.memory_space<vmem>>, vector<1x8x128xf32>
    %580 = vector.shape_cast %579 : vector<1x8x128xf32> to vector<8x128xf32>
    %581 = vector.shape_cast %573 : vector<8x128xf32> to vector<1x8x128xf32>
    tpu.vector_store %arg11[%578, %c0_275, %c0_276], %581 {strides = array<i32>} : memref<9x8x128xf32, #tpu.memory_space<vmem>>, vector<1x8x128xf32>,
    return
  }
  func.func @transform_0(%arg0: i32) -> (i32, i32, i32) {
    %c0_i32 = arith.constant 0 : i32
    %c0_i32_0 = arith.constant 0 : i32
    %c0_i32_1 = arith.constant 0 : i32
    return %arg0, %c0_i32, %c0_i32_0 : i32, i32, i32
  }
  func.func @transform_1(%arg0: i32) -> (i32, i32) {
    %c0_i32 = arith.constant 0 : i32
    %c0_i32_0 = arith.constant 0 : i32
    %c0_i32_1 = arith.constant 0 : i32
    return %c0_i32, %c0_i32_0 : i32, i32
  }
  func.func @transform_2(%arg0: i32) -> (i32, i32) {
    %c0_i32 = arith.constant 0 : i32
    %c0_i32_0 = arith.constant 0 : i32
    %c0_i32_1 = arith.constant 0 : i32
    return %c0_i32, %c0_i32_0 : i32, i32
  }
  func.func @transform_3(%arg0: i32) -> (i32, i32) {
    %c0_i32 = arith.constant 0 : i32
    %c0_i32_0 = arith.constant 0 : i32
    %c0_i32_1 = arith.constant 0 : i32
    return %c0_i32, %c0_i32_0 : i32, i32
  }
  func.func @transform_4(%arg0: i32) -> (i32, i32) {
    %c0_i32 = arith.constant 0 : i32
    %c0_i32_0 = arith.constant 0 : i32
    %c0_i32_1 = arith.constant 0 : i32
    return %c0_i32, %c0_i32_0 : i32, i32
  }
  func.func @transform_5(%arg0: i32) -> (i32, i32) {
    %c0_i32 = arith.constant 0 : i32
    %c0_i32_0 = arith.constant 0 : i32
    %c0_i32_1 = arith.constant 0 : i32
    return %c0_i32, %c0_i32_0 : i32, i32
  }
  func.func @transform_6(%arg0: i32) -> (i32, i32) {
    %c0_i32 = arith.constant 0 : i32
    %c0_i32_0 = arith.constant 0 : i32
    %c0_i32_1 = arith.constant 0 : i32
    return %c0_i32, %c0_i32_0 : i32, i32
  }
  func.func @transform_7(%arg0: i32) -> (i32, i32) {
    %c0_i32 = arith.constant 0 : i32
    %c0_i32_0 = arith.constant 0 : i32
    %c0_i32_1 = arith.constant 0 : i32
    return %c0_i32, %c0_i32_0 : i32, i32
  }
  func.func @transform_8(%arg0: i32) -> (i32, i32) {
    %c0_i32 = arith.constant 0 : i32
    %c0_i32_0 = arith.constant 0 : i32
    %c0_i32_1 = arith.constant 0 : i32
    return %c0_i32, %c0_i32_0 : i32, i32
  }
  func.func @transform_9(%arg0: i32) -> (i32, i32, i32) {
    %c0_i32 = arith.constant 0 : i32
    %c0_i32_0 = arith.constant 0 : i32
    %c0_i32_1 = arith.constant 0 : i32
    return %arg0, %c0_i32, %c0_i32_0 : i32, i32, i32
  }
}

</mosaic_0001>

<bundles_post_ra>
// kernel: binary_memory_rnn_forward.1
= control target key start
LH: loop header
LB: loop body
LE: loop exit
PB: predicated region body
PF: predicated region fallthrough
CT: control target
= control target key end

     0   :  { %14 = vsyncpa [#allocation4], 0  ;;  %s2610_s12 = smov [#allocation3]   ;;  %s2611_s14 = smov 128   ;;  %s4111_s0 = inlined_call_operand.vmem [shape: f32[8,8,256], index: 0, kind: input, shape index: {}]   ;;  %s4112_s1 = inlined_call_operand.vmem [shape: f32[8,128], index: 1, kind: input, shape index: {}]   ;;  %s4113_s2 = inlined_call_operand.vmem [shape: f32[128,256], index: 2, kind: input, shape index: {}]   ;;  %s4114_s3 = inlined_call_operand.vmem [shape: f32[128,128], index: 3, kind: input, shape index: {}]   ;;  %s4115_s4 = inlined_call_operand.hbm [shape: f32[128,128], index: 4, kind: input, shape index: {}]   ;;  %s4116_s5 = inlined_call_operand.vmem [shape: f32[1,128], index: 5, kind: input, shape index: {}]   ;;  %s4117_s6 = inlined_call_operand.vmem [shape: f32[1,128], index: 6, kind: input, shape index: {}]   ;;  %s4118_s7 = inlined_call_operand.vmem [shape: f32[1,128], index: 7, kind: input, shape index: {}]   ;;  %s4119_s8 = inlined_call_operand.vmem [shape: f32[1,128], index: 8, kind: input, shape index: {}]   ;;  %s4120_s9 = inlined_call_operand.vmem [shape: f32[8,8,128], index: 9, kind: output, shape index: {}]  }
   0x1   :  { %s27_s11 = sshll.u32 %s4115_s4, 4  ;;  %s29_s13 = sshll.u32 %s2610_s12, 4  ;;  %s28_s11 = int_to_ptr.hbm [resolvable:$true] %s27_s11  ;;  %s30_s13 = int_to_ptr.vmem [resolvable:$true] %s29_s13 }
   0x2   :  { %s2612_s15 = smov 8  }
   0x3   :  { %35 = dma.hbm_to_vmem [thread:$0]  %s28_s11, 2048, %s30_s13, [#allocation4], %s2611_s14, %s2611_s14, %s2612_s15  }
   0x4   :  { %2512 = dma.done.wait [#allocation4], 2048  }
   0x5   :  { %2513 = vsyncadd [#allocation4], 4294965248  ;;  %v2671_v0 = vld [vmem:[%s4118_s7] sm:$0x1]  ;;  %v107_v2 = vld [vmem:[%s4113_s2 + $0xf8] sm:$0xff]  ;;  %v2613_v35 = vmov 0.0  }
   0x6   :  { %v2676_v1 = vld [vmem:[%s4119_s8] sm:$0x1]  ;;  %128 = vmatpush.msra.mxu1 %v107_v2  ;;  %v105_v3 = vld [vmem:[%s4113_s2 + $0xe8] sm:$0xff]  ;;  %v103_v4 = vld [vmem:[%s4113_s2 + $0xd8] sm:$0xff]  ;;  %53 = vst [vmem:[#allocation2] sm:$0xff] %v2613_v35  ;;  %v2514_v51 = vmov 0.0  }
   0x7   :  { %v101_v5 = vld [vmem:[%s4113_s2 + $0xc8] sm:$0xff]  ;;  %v99_v6 = vld [vmem:[%s4113_s2 + $0xb8] sm:$0xff]  ;;  %v106_v7 = vld [vmem:[%s4113_s2 + $0xf0] sm:$0xff]  ;;  %54 = vst [vmem:[#allocation2 + $0x8] sm:$0xff] %v2613_v35  ;;  %v2518_v52 = vmov 0.0  }
   0x8   :  { %129 = vmatpush.msra.mxu1 %v105_v3  ;;  %v104_v8 = vld [vmem:[%s4113_s2 + $0xe0] sm:$0xff]  ;;  %108 = vmatpush.msra.mxu0 %v106_v7  ;;  %v97_v9 = vld [vmem:[%s4113_s2 + $0xa8] sm:$0xff]  ;;  %v102_v10 = vld [vmem:[%s4113_s2 + $0xd0] sm:$0xff]  ;;  %55 = vst [vmem:[#allocation2 + $0x10] sm:$0xff] %v2613_v35 }
   0x9   :  { %v95_v11 = vld [vmem:[%s4113_s2 + $0x98] sm:$0xff]  ;;  %v100_v12 = vld [vmem:[%s4113_s2 + $0xc0] sm:$0xff]  ;;  %v93_v13 = vld [vmem:[%s4113_s2 + $0x88] sm:$0xff]  ;;  %56 = vst [vmem:[#allocation2 + $0x18] sm:$0xff] %v2613_v35 }
   0xa   :  { %130 = vmatpush.msra.mxu1 %v103_v4  ;;  %109 = vmatpush.msra.mxu0 %v104_v8  ;;  %v98_v14 = vld [vmem:[%s4113_s2 + $0xb0] sm:$0xff]  ;;  %v91_v15 = vld [vmem:[%s4113_s2 + $0x78] sm:$0xff]  ;;  %v96_v16 = vld [vmem:[%s4113_s2 + $0xa0] sm:$0xff]  ;;  %57 = vst [vmem:[#allocation2 + $0x20] sm:$0xff] %v2613_v35 }
   0xb   :  { %v89_v17 = vld [vmem:[%s4113_s2 + $0x68] sm:$0xff]  ;;  %v94_v18 = vld [vmem:[%s4113_s2 + $0x90] sm:$0xff]  ;;  %v87_v19 = vld [vmem:[%s4113_s2 + $0x58] sm:$0xff]  ;;  %58 = vst [vmem:[#allocation2 + $0x28] sm:$0xff] %v2613_v35 }
   0xc   :  { %131 = vmatpush.msra.mxu1 %v101_v5  ;;  %110 = vmatpush.msra.mxu0 %v102_v10  ;;  %v92_v20 = vld [vmem:[%s4113_s2 + $0x80] sm:$0xff]  ;;  %v85_v21 = vld [vmem:[%s4113_s2 + $0x48] sm:$0xff]  ;;  %v90_v22 = vld [vmem:[%s4113_s2 + $0x70] sm:$0xff]  ;;  %59 = vst [vmem:[#allocation2 + $0x30] sm:$0xff] %v2613_v35 }
   0xd   :  { %v83_v23 = vld [vmem:[%s4113_s2 + $0x38] sm:$0xff]  ;;  %v88_v24 = vld [vmem:[%s4113_s2 + $0x60] sm:$0xff]  ;;  %v81_v25 = vld [vmem:[%s4113_s2 + $0x28] sm:$0xff]  ;;  %60 = vst [vmem:[#allocation2 + $0x38] sm:$0xff] %v2613_v35 }
   0xe   :  { %132 = vmatpush.msra.mxu1 %v99_v6  ;;  %111 = vmatpush.msra.mxu0 %v100_v12  ;;  %v86_v26 = vld [vmem:[%s4113_s2 + $0x50] sm:$0xff]  ;;  %v79_v27 = vld [vmem:[%s4113_s2 + $0x18] sm:$0xff]  ;;  %v84_v28 = vld [vmem:[%s4113_s2 + $0x40] sm:$0xff]  ;;  %61 = vst [vmem:[#allocation2 + $0x40] sm:$0xff] %v2613_v35 }
   0xf   :  { %v77_v29 = vld [vmem:[%s4113_s2 + $0x8] sm:$0xff]  ;;  %v82_v30 = vld [vmem:[%s4113_s2 + $0x30] sm:$0xff]  ;;  %v62_v31 = vld [vmem:[%s4112_s1] sm:$0xff] }
  0x10   :  { %133 = vmatpush.msra.mxu1 %v97_v9  ;;  %112 = vmatpush.msra.mxu0 %v98_v14  ;;  %v80_v32 = vld [vmem:[%s4113_s2 + $0x20] sm:$0xff]  ;;  %v78_v33 = vld [vmem:[%s4113_s2 + $0x10] sm:$0xff]  ;;  %v75_v36 = vld [vmem:[%s4111_s0 + $0x8] sm:$0xff] }
  0x11   :  { %v76_v34 = vld [vmem:[%s4113_s2] sm:$0xff] }
  0x12   :  { %134 = vmatpush.msra.mxu1 %v95_v11  ;;  %113 = vmatpush.msra.mxu0 %v96_v16  ;;  %v2792_v39 = vld [vmem:[%s4116_s5] ss:$0 sm:$0xff]  ;;  %s2522_s5 = smov 0  }
  0x13   :  { %v2799_v42 = vld [vmem:[%s4117_s6] ss:$0 sm:$0xff] }
  0x14   :  { %135 = vmatpush.msra.mxu1 %v93_v13  ;;  %114 = vmatpush.msra.mxu0 %v94_v18  ;;  %v74_v44 = vld [vmem:[%s4111_s0] sm:$0xff] }
  0x16   :  { %136 = vmatpush.msra.mxu1 %v91_v15  ;;  %115 = vmatpush.msra.mxu0 %v92_v20 }
  0x18   :  { %137 = vmatpush.msra.mxu1 %v89_v17  ;;  %116 = vmatpush.msra.mxu0 %v90_v22 }
  0x1a   :  { %138 = vmatpush.msra.mxu1 %v87_v19  ;;  %117 = vmatpush.msra.mxu0 %v88_v24 }
  0x1c   :  { %139 = vmatpush.msra.mxu1 %v85_v21  ;;  %118 = vmatpush.msra.mxu0 %v86_v26 }
  0x1e   :  { %140 = vmatpush.msra.mxu1 %v83_v23  ;;  %119 = vmatpush.msra.mxu0 %v84_v28 }
  0x20   :  { %141 = vmatpush.msra.mxu1 %v81_v25  ;;  %120 = vmatpush.msra.mxu0 %v82_v30 }
  0x22   :  { %142 = vmatpush.msra.mxu1 %v79_v27  ;;  %121 = vmatpush.msra.mxu0 %v80_v32 }
  0x24   :  { %143 = vmatpush.msra.mxu1 %v77_v29  ;;  %122 = vmatpush.msra.mxu0 %v78_v33 }
  0x25   :  { %144 = vmatmul.f32.vlgmr.msra.gmra.mxu1 %v62_v31 }
  0x26   :  { %123 = vmatpush.msra.mxu0 %v76_v34 }
  0x27   :  { %124 = vmatmul.f32.vlgmr.msra.gmra.mxu0 %v62_v31 }
  0xa2   :  { %v145_v37 = vpop.f32.mrf.mxu1 }
  0xa3   :  { %v149_v38 = vadd.f32 %v145_v37, %v75_v36 }
  0xa4   :  { %v125_v45 = vpop.f32.mrf.mxu0 }
  0xa5   :  { %vm150_vm0 = vcmp.gt.f32.partialorder %v149_v38, 0.0  ;;  %v2805_v46 = vadd.f32 %v125_v45, %v74_v44 }
  0xa6   :  { %v2096_v40 = vsel %vm150_vm0, 1.0, %v2613_v35 }
  0xa7   :  { %v157_v41 = vmul.f32 %v2792_v39, %v2096_v40  ;;  %v166_v43 = vmul.f32 %v2799_v42, %v2096_v40 }
  0xa9   :  { %158 = vadd.xlane.f32.xlu0 %v157_v41 }
  0xb1   :  { %167 = vadd.xlane.f32.xlu0 %v166_v43 }
 0x11c   :  { %v159_v47 = vpop.xlane.xlu0 %158 }
 0x11d   :  { %v2097_v48 = vclamps-f32 %v159_v47, 0.0 }
 0x124   :  { %v168_v49 = vpop.xlane.xlu0 %167 }
 0x125   :  { %v2098_v50 = vclamps-f32 %v168_v49, 0.0 }
 0x126 LB: > { %s2099_s6 = sshll.u32 %s2524_s5, 3  ;;  %s182_s20 = scvt.s32.f32 %s2524_s5  ;;  %s2524_s5 = sphi %s2522_s5, %s176_s5   ;;  %v2520_v52 = vphi %v2518_v52, %v2519_v52   ;;  %v2516_v51 = vphi %v2514_v51, %v2515_v51  }
 0x127   : > { %s180_s21 = scalar_lea.vmem [#allocation2], %s2099_s6  ;;  %s176_s5 = sadd.s32 1, %s2524_s5  }
 0x128   : > { %v181_v53 = vld [vmem:[%s180_s21] sm:$0xff]  ;;  %v183_v54 = vstv %s182_s20  ;;  %p173_p0 = scmp.ge.s32.totalorder %s176_s5, 9  }
 0x129   : > { %vm184_vm1 = vcmp.eq.f32.partialorder %v2097_v48, %v183_v54  ;;  %vm189_vm2 = vcmp.eq.f32.partialorder %v2098_v50, %v183_v54  ;;  %v209_v59 = vld [vmem:[%s4114_s3 + $0x78] sm:$0xff] (%p173_p0)  ;;  %v208_v60 = vld [vmem:[%s4114_s3 + $0x70] sm:$0xff] (%p173_p0)  ;;  %v246_v61 = vld [vmem:[#allocation3 + $0x78] sm:$0xff] (%p173_p0)  ;;  %v2614_v33 = vmov (%p173_p0), 128.0   ;;  %s2534_s19 = smov (%p173_p0), 0  }
 0x12a   : > { %v187_v55 = vsel %vm184_vm1, %v181_v53, 0.0  ;;  %v192_v56 = vsel %vm189_vm2, %v181_v53, 0.0  ;;  %175 = sbr.rel (!%p173_p0) target bundleno = 294 (0x126), region = 151  ;;  %210 = vmatpush.msra.mxu2 (%p173_p0), %v209_v59  ;;  %247 = vmatpush.msra.mxu3 (%p173_p0), %v246_v61  ;;  %v245_v62 = vld [vmem:[#allocation3 + $0x70] sm:$0xff] (%p173_p0)  ;;  %v207_v63 = vld [vmem:[%s4114_s3 + $0x68] sm:$0xff] (%p173_p0)  ;;  %v244_v2 = vld [vmem:[#allocation3 + $0x68] sm:$0xff] (%p173_p0)  ;;  %2342 = vrcp.f32 (%p173_p0), %v2614_v33 }
 0x12b   : > { %v2807_v52 = vadd.f32 %v2520_v52, %v187_v55   ;;  %v2809_v51 = vadd.f32 %v2516_v51, %v192_v56   ;;  %v206_v3 = vld [vmem:[%s4114_s3 + $0x60] sm:$0xff] (%p173_p0)  ;;  %v243_v4 = vld [vmem:[#allocation3 + $0x60] sm:$0xff] (%p173_p0)  ;;  %v205_v5 = vld [vmem:[%s4114_s3 + $0x58] sm:$0xff] (%p173_p0) }
 0x12c   :  { %211 = vmatpush.msra.mxu2 (%p173_p0), %v208_v60  ;;  %248 = vmatpush.msra.mxu3 (%p173_p0), %v245_v62  ;;  %v242_v6 = vld [vmem:[#allocation3 + $0x58] sm:$0xff] (%p173_p0)  ;;  %v204_v7 = vld [vmem:[%s4114_s3 + $0x50] sm:$0xff] (%p173_p0)  ;;  %v241_v8 = vld [vmem:[#allocation3 + $0x50] sm:$0xff] (%p173_p0) }
 0x12d   : > { %v4121_v57 = vmov %v2807_v52  ;;  %v4122_v58 = vmov %v2809_v51  ;;  %v203_v9 = vld [vmem:[%s4114_s3 + $0x48] sm:$0xff] (%p173_p0)  ;;  %v240_v10 = vld [vmem:[#allocation3 + $0x48] sm:$0xff] (%p173_p0)  ;;  %v202_v11 = vld [vmem:[%s4114_s3 + $0x40] sm:$0xff] (%p173_p0) }
 0x12e   : > { %v2515_v51 = vmov %v4122_v58   ;;  %v2519_v52 = vmov %v4121_v57   ;;  %212 = vmatpush.msra.mxu2 (%p173_p0), %v207_v63  ;;  %249 = vmatpush.msra.mxu3 (%p173_p0), %v244_v2  ;;  %v239_v12 = vld [vmem:[#allocation3 + $0x40] sm:$0xff] (%p173_p0)  ;;  %v201_v13 = vld [vmem:[%s4114_s3 + $0x38] sm:$0xff] (%p173_p0)  ;;  %v238_v14 = vld [vmem:[#allocation3 + $0x38] sm:$0xff] (%p173_p0) }
 0x12f   :  { %v200_v15 = vld [vmem:[%s4114_s3 + $0x30] sm:$0xff]  ;;  %v237_v16 = vld [vmem:[#allocation3 + $0x30] sm:$0xff]  ;;  %v199_v17 = vld [vmem:[%s4114_s3 + $0x28] sm:$0xff] }
 0x130   :  { %213 = vmatpush.msra.mxu2 %v206_v3  ;;  %250 = vmatpush.msra.mxu3 %v243_v4  ;;  %v236_v18 = vld [vmem:[#allocation3 + $0x28] sm:$0xff]  ;;  %v198_v19 = vld [vmem:[%s4114_s3 + $0x20] sm:$0xff]  ;;  %v235_v20 = vld [vmem:[#allocation3 + $0x20] sm:$0xff]  ;;  %v2343_v34 = vpop.eup %2342 }
 0x131   :  { %v197_v21 = vld [vmem:[%s4114_s3 + $0x18] sm:$0xff]  ;;  %v234_v22 = vld [vmem:[#allocation3 + $0x18] sm:$0xff]  ;;  %v196_v23 = vld [vmem:[%s4114_s3 + $0x10] sm:$0xff]  ;;  %v271_v36 = vmul.f32 128.0, %v2343_v34  ;;  %vm275_vm3 = vweird.f32 %v2343_v34 }
 0x132   :  { %214 = vmatpush.msra.mxu2 %v205_v5  ;;  %251 = vmatpush.msra.mxu3 %v242_v6  ;;  %v233_v24 = vld [vmem:[#allocation3 + $0x10] sm:$0xff]  ;;  %v195_v25 = vld [vmem:[%s4114_s3 + $0x8] sm:$0xff]  ;;  %v232_v26 = vld [vmem:[#allocation3 + $0x8] sm:$0xff] }
 0x133   :  { %v194_v27 = vld [vmem:[%s4114_s3] sm:$0xff]  ;;  %v231_v28 = vld [vmem:[#allocation3] sm:$0xff]  ;;  %v272_v37 = vsub.f32 1.0, %v271_v36  ;;  %v360_v47 = vld [vmem:[%s4113_s2 + $0xf0] sm:$0xff] }
 0x134   :  { %215 = vmatpush.msra.mxu2 %v204_v7  ;;  %252 = vmatpush.msra.mxu3 %v241_v8  ;;  %v361_v48 = vld [vmem:[%s4113_s2 + $0xf8] sm:$0xff]  ;;  %v358_v49 = vld [vmem:[%s4113_s2 + $0xe0] sm:$0xff]  ;;  %v359_v50 = vld [vmem:[%s4113_s2 + $0xe8] sm:$0xff] }
 0x135   :  { %v273_v38 = vmul.f32 %v2343_v34, %v272_v37  ;;  %362 = vmatpush.msrb.mxu0 %v360_v47  ;;  %382 = vmatpush.msrb.mxu1 %v361_v48  ;;  %v356_v51 = vld [vmem:[%s4113_s2 + $0xd0] sm:$0xff]  ;;  %v357_v52 = vld [vmem:[%s4113_s2 + $0xd8] sm:$0xff]  ;;  %v354_v53 = vld [vmem:[%s4113_s2 + $0xc0] sm:$0xff] }
 0x136   :  { %216 = vmatpush.msra.mxu2 %v203_v9  ;;  %253 = vmatpush.msra.mxu3 %v240_v10  ;;  %v355_v54 = vld [vmem:[%s4113_s2 + $0xc8] sm:$0xff]  ;;  %v350_v60 = vld [vmem:[%s4113_s2 + $0xa0] sm:$0xff]  ;;  %v348_v62 = vld [vmem:[%s4113_s2 + $0x90] sm:$0xff] }
 0x137   :  { %v274_v40 = vadd.f32 %v2343_v34, %v273_v38  ;;  %363 = vmatpush.msrb.mxu0 %v358_v49  ;;  %383 = vmatpush.msrb.mxu1 %v359_v50  ;;  %v351_v61 = vld [vmem:[%s4113_s2 + $0xa8] sm:$0xff]  ;;  %v349_v63 = vld [vmem:[%s4113_s2 + $0x98] sm:$0xff]  ;;  %v346_v2 = vld [vmem:[%s4113_s2 + $0x80] sm:$0xff] }
 0x138   :  { %217 = vmatpush.msra.mxu2 %v202_v11  ;;  %254 = vmatpush.msra.mxu3 %v239_v12  ;;  %v347_v3 = vld [vmem:[%s4113_s2 + $0x88] sm:$0xff]  ;;  %v344_v4 = vld [vmem:[%s4113_s2 + $0x70] sm:$0xff]  ;;  %v345_v5 = vld [vmem:[%s4113_s2 + $0x78] sm:$0xff] }
 0x139   :  { %v2864_v41 = vsel %vm275_vm3, %v2343_v34, %v274_v40  ;;  %364 = vmatpush.msrb.mxu0 %v356_v51  ;;  %384 = vmatpush.msrb.mxu1 %v357_v52  ;;  %v342_v6 = vld [vmem:[%s4113_s2 + $0x60] sm:$0xff]  ;;  %v343_v7 = vld [vmem:[%s4113_s2 + $0x68] sm:$0xff]  ;;  %v340_v9 = vld [vmem:[%s4113_s2 + $0x50] sm:$0xff] }
 0x13a   :  { %218 = vmatpush.msra.mxu2 %v201_v13  ;;  %255 = vmatpush.msra.mxu3 %v238_v14  ;;  %v341_v10 = vld [vmem:[%s4113_s2 + $0x58] sm:$0xff]  ;;  %v338_v12 = vld [vmem:[%s4113_s2 + $0x40] sm:$0xff]  ;;  %v339_v13 = vld [vmem:[%s4113_s2 + $0x48] sm:$0xff] }
 0x13b   :  { %365 = vmatpush.msrb.mxu0 %v354_v53  ;;  %385 = vmatpush.msrb.mxu1 %v355_v54  ;;  %v2101_v47 = vld [vmem:[%s4111_s0 + $0x10] sm:$0xff]  ;;  %v2102_v48 = vld [vmem:[%s4111_s0 + $0x18] sm:$0xff] }
 0x13c   :  { %219 = vmatpush.msra.mxu2 %v200_v15  ;;  %256 = vmatpush.msra.mxu3 %v237_v16  ;;  %v336_v15 = vld [vmem:[%s4113_s2 + $0x30] sm:$0xff]  ;;  %v337_v16 = vld [vmem:[%s4113_s2 + $0x38] sm:$0xff] }
 0x13e   :  { %220 = vmatpush.msra.mxu2 %v199_v17  ;;  %257 = vmatpush.msra.mxu3 %v236_v18  ;;  %v334_v18 = vld [vmem:[%s4113_s2 + $0x20] sm:$0xff] }
 0x140   :  { %221 = vmatpush.msra.mxu2 %v198_v19  ;;  %258 = vmatpush.msra.mxu3 %v235_v20  ;;  %v335_v19 = vld [vmem:[%s4113_s2 + $0x28] sm:$0xff] }
 0x142   :  { %222 = vmatpush.msra.mxu2 %v197_v21  ;;  %259 = vmatpush.msra.mxu3 %v234_v22  ;;  %v332_v21 = vld [vmem:[%s4113_s2 + $0x10] sm:$0xff]  ;;  %v333_v22 = vld [vmem:[%s4113_s2 + $0x18] sm:$0xff] }
 0x144   :  { %223 = vmatpush.msra.mxu2 %v196_v23  ;;  %260 = vmatpush.msra.mxu3 %v233_v24  ;;  %v2963_v24 = vperm.slane %v2671_v0, 0 }
 0x146   :  { %224 = vmatpush.msra.mxu2 %v195_v25  ;;  %261 = vmatpush.msra.mxu3 %v232_v26  ;;  %v330_v25 = vld [vmem:[%s4113_s2] sm:$0xff]  ;;  %v331_v26 = vld [vmem:[%s4113_s2 + $0x8] sm:$0xff] }
 0x148   :  { %225 = vmatpush.msra.mxu2 %v194_v27  ;;  %262 = vmatpush.msra.mxu3 %v231_v28  ;;  %v2972_v28 = vperm.slane %v2676_v1, 0 }
 0x149   :  { %226 = vmatmul.f32.vlgmr.msra.gmra.mxu2 %v4121_v57  ;;  %263 = vmatmul.f32.vlgmr.msra.gmra.mxu3 %v4122_v58  ;;  %v352_v57 = vld [vmem:[%s4113_s2 + $0xb0] sm:$0xff]  ;;  %v353_v58 = vld [vmem:[%s4113_s2 + $0xb8] sm:$0xff] }
 0x14a   :  { %366 = vmatpush.msrb.mxu0 %v352_v57  ;;  %386 = vmatpush.msrb.mxu1 %v353_v58 }
 0x14c   :  { %367 = vmatpush.msrb.mxu0 %v350_v60  ;;  %387 = vmatpush.msrb.mxu1 %v351_v61 }
 0x14e   :  { %368 = vmatpush.msrb.mxu0 %v348_v62  ;;  %388 = vmatpush.msrb.mxu1 %v349_v63  ;;  %v2526_v62 = vmov 0.0   ;;  %v2530_v63 = vmov 0.0  }
 0x150   :  { %369 = vmatpush.msrb.mxu0 %v346_v2  ;;  %389 = vmatpush.msrb.mxu1 %v347_v3 }
 0x152   :  { %370 = vmatpush.msrb.mxu0 %v344_v4  ;;  %390 = vmatpush.msrb.mxu1 %v345_v5 }
 0x154   :  { %371 = vmatpush.msrb.mxu0 %v342_v6  ;;  %391 = vmatpush.msrb.mxu1 %v343_v7 }
 0x156   :  { %372 = vmatpush.msrb.mxu0 %v340_v9  ;;  %392 = vmatpush.msrb.mxu1 %v341_v10 }
 0x158   :  { %373 = vmatpush.msrb.mxu0 %v338_v12  ;;  %393 = vmatpush.msrb.mxu1 %v339_v13 }
 0x15a   :  { %374 = vmatpush.msrb.mxu0 %v336_v15  ;;  %394 = vmatpush.msrb.mxu1 %v337_v16 }
 0x15c   :  { %375 = vmatpush.msrb.mxu0 %v334_v18  ;;  %395 = vmatpush.msrb.mxu1 %v335_v19 }
 0x15e   :  { %376 = vmatpush.msrb.mxu0 %v332_v21  ;;  %396 = vmatpush.msrb.mxu1 %v333_v22 }
 0x160   :  { %377 = vmatpush.msrb.mxu0 %v330_v25  ;;  %397 = vmatpush.msrb.mxu1 %v331_v26 }
 0x1cc   :  { %v227_v29 = vpop.f32.mrf.mxu2  ;;  %v264_v30 = vpop.f32.mrf.mxu3 }
 0x1cd   :  { %v230_v31 = vadd.f32 %v227_v29, %v2805_v46 }
 0x1cf   :  { %v267_v32 = vadd.f32 %v264_v30, %v230_v31 }
 0x1d1   :  { %268 = vadd.xlane.f32.xlu0 %v267_v32 }
 0x244   :  { %v269_v43 = vpop.xlane.xlu0 %268 }
 0x245   :  { %v277_v44 = vmul.f32 %v2864_v41, %v269_v43 }
 0x247   :  { %v2867_v45 = vsub.f32 %v267_v32, %v277_v44 }
 0x249   :  { %v279_v46 = vmul.f32 %v2867_v45, %v2867_v45 }
 0x24b   :  { %280 = vadd.xlane.f32.xlu0 %v279_v46 }
 0x2be   :  { %v281_v55 = vpop.xlane.xlu0 %280 }
 0x2bf   :  { %v282_v56 = vmul.f32 %v281_v55, %v2864_v41 }
 0x2c1   :  { %v283_v59 = vadd.f32 1e-05, %v282_v56 }
 0x2c3   :  { %2344 = vrsqrt.f32 %v283_v59  ;;  %vm290_vm5 = vweird.f32 %v283_v59 }
 0x2c9   :  { %v2345_v8 = vpop.eup %2344 }
 0x2ca   :  { %v285_v11 = vmul.f32 %v2345_v8, %v283_v59  ;;  %vm291_vm4 = vweird.f32 %v2345_v8 }
 0x2cb   :  { %vm292_vm6 = vmor %vm290_vm5, %vm291_vm4 }
 0x2cc   :  { %v286_v14 = vmul.f32 %v2345_v8, %v285_v11 }
 0x2ce   :  { %v287_v17 = vmul.f32 0.5, %v286_v14 }
 0x2d0   :  { %v288_v20 = vsub.f32 1.5, %v287_v17 }
 0x2d2   :  { %v289_v23 = vmul.f32 %v2345_v8, %v288_v20 }
 0x2d4   :  { %v293_v27 = vsel %vm292_vm6, %v2345_v8, %v289_v23 }
 0x2d5   :  { %v294_v29 = vmul.f32 %v293_v27, %v2867_v45 }
 0x2d7   :  { %v298_v0 = vmul.f32 %v2963_v24, %v294_v29 }
 0x2d9   :  { %v302_v30 = vadd.f32 %v2972_v28, %v298_v0 }
 0x2db   :  { %v2100_v31 = vmul.f32 -1.442695, %v302_v30 }
 0x2dd   :  { %2346 = vpow2.f32 %v2100_v31 }
 0x2e3   :  { %v2347_v32 = vpop.eup %2346 }
 0x2e4   :  { %v306_v33 = vadd.f32 1.0, %v2347_v32 }
 0x2e6   :  { %2348 = vrcp.f32 %v306_v33  ;;  %v318_v38 = vand.u32 2147483648, %v306_v33  ;;  %v316_v1 = vand.u32 2147483647, %v306_v33  ;;  %vm312_vm8 = vweird.f32 %v306_v33 }
 0x2e8   :  { %v319_v44 = vor.u32 1.1754944e-38, %v318_v38  ;;  %vm317_vm10 = vcmp.eq.f32.partialorder %v316_v1, 8.507059e+37 }
 0x2ec   :  { %v2349_v34 = vpop.eup %2348 }
 0x2ed   :  { %v308_v36 = vmul.f32 %v2349_v34, %v306_v33  ;;  %vm313_vm7 = vweird.f32 %v2349_v34 }
 0x2ee   :  { %vm314_vm9 = vmor %vm312_vm8, %vm313_vm7 }
 0x2ef   :  { %v309_v37 = vsub.f32 1.0, %v308_v36 }
 0x2f1   :  { %v310_v40 = vmul.f32 %v2349_v34, %v309_v37 }
 0x2f3   :  { %v311_v43 = vadd.f32 %v2349_v34, %v310_v40 }
 0x2f5   :  { %v315_v45 = vsel %vm314_vm9, %v2349_v34, %v311_v43 }
 0x2f6   :  { %v320_v46 = vsel %vm317_vm10, %v319_v44, %v315_v45 }
 0x2f7   :  { %322 = vst [vmem:[%s4120_s9] sm:$0xff] %v320_v46  ;;  %378 = vmatmul.f32.vlgmr.msrb.gmra.mxu0 %v320_v46  ;;  %398 = vmatmul.f32.vlgmr.msrb.gmra.mxu1 %v320_v46 }
 0x2f8   :  { %326 = vst [vmem:[#allocation2 + $0x8] sm:$0xff] %v320_v46 }
 0x374   :  { %v379_v49 = vpop.f32.mrf.mxu0  ;;  %v399_v50 = vpop.f32.mrf.mxu1 }
 0x375   :  { %v2986_v51 = vadd.f32 %v2101_v47, %v379_v49  ;;  %v403_v52 = vadd.f32 %v2102_v48, %v399_v50 }
 0x377   :  { %vm404_vm11 = vcmp.gt.f32.partialorder %v403_v52, 0.0 }
 0x378   :  { %v2103_v53 = vsel %vm404_vm11, 1.0, %v2613_v35 }
 0x379   :  { %v408_v54 = vmul.f32 %v2792_v39, %v2103_v53  ;;  %v414_v55 = vmul.f32 %v2799_v42, %v2103_v53 }
 0x37b   :  { %409 = vadd.xlane.f32.xlu1 %v408_v54 }
 0x383   :  { %415 = vadd.xlane.f32.xlu1 %v414_v55 }
 0x3ee   :  { %v410_v56 = vpop.xlane.xlu1 %409 }
 0x3ef   :  { %v411_v57 = vmax.f32 %v410_v56, 0.0 }
 0x3f1   :  { %v413_v58 = vmin.f32 %v411_v57, 1.0 }
 0x3f6   :  { %v416_v59 = vpop.xlane.xlu1 %415 }
 0x3f7   :  { %v417_v60 = vmax.f32 %v416_v59, 0.0 }
 0x3f9   :  { %v418_v61 = vmin.f32 %v417_v60, 1.0 }
 0x3fa LB: > { %s2104_s4 = sshll.u32 %s2536_s19, 3  ;;  %s430_s5 = scvt.s32.f32 %s2536_s19  ;;  %s2536_s19 = sphi %s2534_s19, %s424_s19   ;;  %v2532_v63 = vphi %v2530_v63, %v2531_v63   ;;  %v2528_v62 = vphi %v2526_v62, %v2527_v62  }
 0x3fb   : > { %s428_s6 = scalar_lea.vmem [#allocation2], %s2104_s4  ;;  %s424_s19 = sadd.s32 1, %s2536_s19  }
 0x3fc   : > { %v429_v2 = vld [vmem:[%s428_s6] sm:$0xff]  ;;  %v431_v3 = vstv %s430_s5  ;;  %p421_p1 = scmp.ge.s32.totalorder %s424_s19, 9  }
 0x3fd   : > { %vm432_vm12 = vcmp.eq.f32.partialorder %v413_v58, %v431_v3  ;;  %vm437_vm13 = vcmp.eq.f32.partialorder %v418_v61, %v431_v3  ;;  %v457_v8 = vld [vmem:[%s4114_s3 + $0x78] sm:$0xff] (%p421_p1)  ;;  %v456_v9 = vld [vmem:[%s4114_s3 + $0x70] sm:$0xff] (%p421_p1)  ;;  %v494_v10 = vld [vmem:[#allocation3 + $0x78] sm:$0xff] (%p421_p1)  ;;  %s2546_s17 = smov (%p421_p1), 0  }
 0x3fe   : > { %v435_v4 = vsel %vm432_vm12, %v429_v2, 0.0  ;;  %v440_v5 = vsel %vm437_vm13, %v429_v2, 0.0  ;;  %423 = sbr.rel (!%p421_p1) target bundleno = 1018 (0x3fa), region = 162  ;;  %458 = vmatpush.msrb.mxu2 (%p421_p1), %v457_v8  ;;  %495 = vmatpush.msrb.mxu3 (%p421_p1), %v494_v10  ;;  %v493_v11 = vld [vmem:[#allocation3 + $0x70] sm:$0xff] (%p421_p1)  ;;  %v455_v12 = vld [vmem:[%s4114_s3 + $0x68] sm:$0xff] (%p421_p1)  ;;  %v492_v13 = vld [vmem:[#allocation3 + $0x68] sm:$0xff] (%p421_p1) }
 0x3ff   : > { %v2991_v63 = vadd.f32 %v2532_v63, %v435_v4   ;;  %v2993_v62 = vadd.f32 %v2528_v62, %v440_v5   ;;  %v454_v14 = vld [vmem:[%s4114_s3 + $0x60] sm:$0xff] (%p421_p1)  ;;  %v491_v15 = vld [vmem:[#allocation3 + $0x60] sm:$0xff] (%p421_p1)  ;;  %v453_v16 = vld [vmem:[%s4114_s3 + $0x58] sm:$0xff] (%p421_p1) }
 0x400   :  { %459 = vmatpush.msrb.mxu2 (%p421_p1), %v456_v9  ;;  %496 = vmatpush.msrb.mxu3 (%p421_p1), %v493_v11  ;;  %v490_v17 = vld [vmem:[#allocation3 + $0x58] sm:$0xff] (%p421_p1)  ;;  %v452_v18 = vld [vmem:[%s4114_s3 + $0x50] sm:$0xff] (%p421_p1)  ;;  %v489_v19 = vld [vmem:[#allocation3 + $0x50] sm:$0xff] (%p421_p1) }
 0x401   : > { %v4123_v6 = vmov %v2991_v63  ;;  %v4124_v7 = vmov %v2993_v62  ;;  %v451_v20 = vld [vmem:[%s4114_s3 + $0x48] sm:$0xff] (%p421_p1)  ;;  %v488_v21 = vld [vmem:[#allocation3 + $0x48] sm:$0xff] (%p421_p1)  ;;  %v450_v22 = vld [vmem:[%s4114_s3 + $0x40] sm:$0xff] (%p421_p1) }
 0x402   : > { %v2527_v62 = vmov %v4124_v7   ;;  %v2531_v63 = vmov %v4123_v6   ;;  %460 = vmatpush.msrb.mxu2 (%p421_p1), %v455_v12  ;;  %497 = vmatpush.msrb.mxu3 (%p421_p1), %v492_v13  ;;  %v487_v23 = vld [vmem:[#allocation3 + $0x40] sm:$0xff] (%p421_p1)  ;;  %v449_v25 = vld [vmem:[%s4114_s3 + $0x38] sm:$0xff] (%p421_p1)  ;;  %v486_v26 = vld [vmem:[#allocation3 + $0x38] sm:$0xff] (%p421_p1) }
 0x403   :  { %v448_v27 = vld [vmem:[%s4114_s3 + $0x30] sm:$0xff]  ;;  %v485_v29 = vld [vmem:[#allocation3 + $0x30] sm:$0xff]  ;;  %v447_v0 = vld [vmem:[%s4114_s3 + $0x28] sm:$0xff] }
 0x404   :  { %461 = vmatpush.msrb.mxu2 %v454_v14  ;;  %498 = vmatpush.msrb.mxu3 %v491_v15  ;;  %v484_v30 = vld [vmem:[#allocation3 + $0x28] sm:$0xff]  ;;  %v446_v31 = vld [vmem:[%s4114_s3 + $0x20] sm:$0xff]  ;;  %v483_v32 = vld [vmem:[#allocation3 + $0x20] sm:$0xff] }
 0x405   :  { %v445_v33 = vld [vmem:[%s4114_s3 + $0x18] sm:$0xff]  ;;  %v482_v34 = vld [vmem:[#allocation3 + $0x18] sm:$0xff]  ;;  %v444_v36 = vld [vmem:[%s4114_s3 + $0x10] sm:$0xff] }
 0x406   :  { %462 = vmatpush.msrb.mxu2 %v453_v16  ;;  %499 = vmatpush.msrb.mxu3 %v490_v17  ;;  %v481_v37 = vld [vmem:[#allocation3 + $0x10] sm:$0xff]  ;;  %v443_v38 = vld [vmem:[%s4114_s3 + $0x8] sm:$0xff]  ;;  %v480_v40 = vld [vmem:[#allocation3 + $0x8] sm:$0xff] }
 0x407   :  { %v442_v1 = vld [vmem:[%s4114_s3] sm:$0xff]  ;;  %v479_v43 = vld [vmem:[#allocation3] sm:$0xff]  ;;  %v596_v53 = vld [vmem:[%s4113_s2 + $0xf0] sm:$0xff] }
 0x408   :  { %463 = vmatpush.msrb.mxu2 %v452_v18  ;;  %500 = vmatpush.msrb.mxu3 %v489_v19  ;;  %v597_v54 = vld [vmem:[%s4113_s2 + $0xf8] sm:$0xff]  ;;  %v595_v55 = vld [vmem:[%s4113_s2 + $0xe8] sm:$0xff]  ;;  %v592_v56 = vld [vmem:[%s4113_s2 + $0xd0] sm:$0xff] }
 0x409   :  { %598 = vmatpush.msra.mxu0 %v596_v53  ;;  %618 = vmatpush.msra.mxu1 %v597_v54  ;;  %v593_v57 = vld [vmem:[%s4113_s2 + $0xd8] sm:$0xff]  ;;  %v590_v58 = vld [vmem:[%s4113_s2 + $0xc0] sm:$0xff]  ;;  %v591_v59 = vld [vmem:[%s4113_s2 + $0xc8] sm:$0xff] }
 0x40a   :  { %464 = vmatpush.msrb.mxu2 %v451_v20  ;;  %501 = vmatpush.msrb.mxu3 %v488_v21  ;;  %v588_v62 = vld [vmem:[%s4113_s2 + $0xb0] sm:$0xff]  ;;  %v589_v63 = vld [vmem:[%s4113_s2 + $0xb8] sm:$0xff]  ;;  %v586_v3 = vld [vmem:[%s4113_s2 + $0xa0] sm:$0xff] }
 0x40b   :  { %619 = vmatpush.msra.mxu1 %v595_v55  ;;  %v587_v4 = vld [vmem:[%s4113_s2 + $0xa8] sm:$0xff]  ;;  %v584_v5 = vld [vmem:[%s4113_s2 + $0x90] sm:$0xff]  ;;  %v581_v10 = vld [vmem:[%s4113_s2 + $0x78] sm:$0xff] }
 0x40c   :  { %465 = vmatpush.msrb.mxu2 %v450_v22  ;;  %502 = vmatpush.msrb.mxu3 %v487_v23  ;;  %v583_v8 = vld [vmem:[%s4113_s2 + $0x88] sm:$0xff]  ;;  %v580_v9 = vld [vmem:[%s4113_s2 + $0x70] sm:$0xff]  ;;  %v578_v11 = vld [vmem:[%s4113_s2 + $0x60] sm:$0xff] }
 0x40d   :  { %620 = vmatpush.msra.mxu1 %v593_v57  ;;  %v579_v12 = vld [vmem:[%s4113_s2 + $0x68] sm:$0xff]  ;;  %v576_v14 = vld [vmem:[%s4113_s2 + $0x50] sm:$0xff]  ;;  %v577_v15 = vld [vmem:[%s4113_s2 + $0x58] sm:$0xff] }
 0x40e   :  { %466 = vmatpush.msrb.mxu2 %v449_v25  ;;  %503 = vmatpush.msrb.mxu3 %v486_v26  ;;  %v574_v17 = vld [vmem:[%s4113_s2 + $0x40] sm:$0xff]  ;;  %v575_v18 = vld [vmem:[%s4113_s2 + $0x48] sm:$0xff]  ;;  %v572_v20 = vld [vmem:[%s4113_s2 + $0x30] sm:$0xff] }
 0x40f   :  { %621 = vmatpush.msra.mxu1 %v591_v59  ;;  %v573_v21 = vld [vmem:[%s4113_s2 + $0x38] sm:$0xff]  ;;  %v570_v23 = vld [vmem:[%s4113_s2 + $0x20] sm:$0xff]  ;;  %v571_v25 = vld [vmem:[%s4113_s2 + $0x28] sm:$0xff] }
 0x410   :  { %467 = vmatpush.msrb.mxu2 %v448_v27  ;;  %504 = vmatpush.msrb.mxu3 %v485_v29  ;;  %v568_v27 = vld [vmem:[%s4113_s2 + $0x10] sm:$0xff]  ;;  %v569_v29 = vld [vmem:[%s4113_s2 + $0x18] sm:$0xff]  ;;  %v2107_v53 = vld [vmem:[%s4111_s0 + $0x20] sm:$0xff] }
 0x411   :  { %622 = vmatpush.msra.mxu1 %v589_v63  ;;  %v2108_v54 = vld [vmem:[%s4111_s0 + $0x28] sm:$0xff] }
 0x412   :  { %468 = vmatpush.msrb.mxu2 %v447_v0  ;;  %505 = vmatpush.msrb.mxu3 %v484_v30  ;;  %v566_v30 = vld [vmem:[%s4113_s2] sm:$0xff] }
 0x413   :  { %623 = vmatpush.msra.mxu1 %v587_v4 }
 0x414   :  { %469 = vmatpush.msrb.mxu2 %v446_v31  ;;  %506 = vmatpush.msrb.mxu3 %v483_v32  ;;  %v567_v31 = vld [vmem:[%s4113_s2 + $0x8] sm:$0xff] }
 0x416   :  { %470 = vmatpush.msrb.mxu2 %v445_v33  ;;  %507 = vmatpush.msrb.mxu3 %v482_v34 }
 0x418   :  { %471 = vmatpush.msrb.mxu2 %v444_v36  ;;  %508 = vmatpush.msrb.mxu3 %v481_v37 }
 0x41a   :  { %472 = vmatpush.msrb.mxu2 %v443_v38  ;;  %509 = vmatpush.msrb.mxu3 %v480_v40 }
 0x41c   :  { %473 = vmatpush.msrb.mxu2 %v442_v1  ;;  %510 = vmatpush.msrb.mxu3 %v479_v43 }
 0x41d   :  { %474 = vmatmul.f32.vlgmr.msrb.gmra.mxu2 %v4123_v6  ;;  %511 = vmatmul.f32.vlgmr.msrb.gmra.mxu3 %v4124_v7  ;;  %v585_v6 = vld [vmem:[%s4113_s2 + $0x98] sm:$0xff]  ;;  %v582_v7 = vld [vmem:[%s4113_s2 + $0x80] sm:$0xff] }
 0x41e   :  { %624 = vmatpush.msra.mxu1 %v585_v6  ;;  %v2542_v6 = vmov 0.0  }
 0x420   :  { %625 = vmatpush.msra.mxu1 %v583_v8 }
 0x422   :  { %626 = vmatpush.msra.mxu1 %v581_v10 }
 0x424   :  { %627 = vmatpush.msra.mxu1 %v579_v12 }
 0x426   :  { %628 = vmatpush.msra.mxu1 %v577_v15 }
 0x428   :  { %629 = vmatpush.msra.mxu1 %v575_v18 }
 0x42a   :  { %630 = vmatpush.msra.mxu1 %v573_v21 }
 0x42c   :  { %631 = vmatpush.msra.mxu1 %v571_v25 }
 0x42e   :  { %632 = vmatpush.msra.mxu1 %v569_v29 }
 0x430   :  { %633 = vmatpush.msra.mxu1 %v567_v31 }
 0x4a0   :  { %v475_v44 = vpop.f32.mrf.mxu2  ;;  %v512_v45 = vpop.f32.mrf.mxu3 }
 0x4a1   :  { %v478_v46 = vadd.f32 %v475_v44, %v2986_v51  ;;  %v594_v51 = vld [vmem:[%s4113_s2 + $0xe0] sm:$0xff] }
 0x4a2   :  { %599 = vmatpush.msra.mxu0 %v594_v51 }
 0x4a3   :  { %v515_v47 = vadd.f32 %v512_v45, %v478_v46 }
 0x4a4   :  { %600 = vmatpush.msra.mxu0 %v592_v56 }
 0x4a5   :  { %516 = vadd.xlane.f32.xlu0 %v515_v47 }
 0x4a6   :  { %601 = vmatpush.msra.mxu0 %v590_v58 }
 0x4a8   :  { %602 = vmatpush.msra.mxu0 %v588_v62 }
 0x4aa   :  { %603 = vmatpush.msra.mxu0 %v586_v3 }
 0x4ac   :  { %604 = vmatpush.msra.mxu0 %v584_v5  ;;  %v2538_v5 = vmov 0.0  }
 0x4ae   :  { %605 = vmatpush.msra.mxu0 %v582_v7 }
 0x4b0   :  { %606 = vmatpush.msra.mxu0 %v580_v9 }
 0x4b2   :  { %607 = vmatpush.msra.mxu0 %v578_v11 }
 0x4b4   :  { %608 = vmatpush.msra.mxu0 %v576_v14 }
 0x4b6   :  { %609 = vmatpush.msra.mxu0 %v574_v17 }
 0x4b8   :  { %610 = vmatpush.msra.mxu0 %v572_v20 }
 0x4ba   :  { %611 = vmatpush.msra.mxu0 %v570_v23 }
 0x4bc   :  { %612 = vmatpush.msra.mxu0 %v568_v27 }
 0x4be   :  { %613 = vmatpush.msra.mxu0 %v566_v30 }
 0x518   :  { %v517_v48 = vpop.xlane.xlu0 %516 }
 0x519   :  { %v518_v49 = vmul.f32 %v517_v48, %v2864_v41 }
 0x51b   :  { %v3049_v50 = vsub.f32 %v515_v47, %v518_v49 }
 0x51d   :  { %v520_v52 = vmul.f32 %v3049_v50, %v3049_v50 }
 0x51f   :  { %521 = vadd.xlane.f32.xlu0 %v520_v52 }
 0x592   :  { %v522_v60 = vpop.xlane.xlu0 %521 }
 0x593   :  { %v523_v61 = vmul.f32 %v522_v60, %v2864_v41 }
 0x595   :  { %v524_v2 = vadd.f32 1e-05, %v523_v61 }
 0x597   :  { %2350 = vrsqrt.f32 %v524_v2  ;;  %vm531_vm15 = vweird.f32 %v524_v2 }
 0x59d   :  { %v2351_v13 = vpop.eup %2350 }
 0x59e   :  { %v526_v16 = vmul.f32 %v2351_v13, %v524_v2  ;;  %vm532_vm14 = vweird.f32 %v2351_v13 }
 0x59f   :  { %vm533_vm0 = vmor %vm531_vm15, %vm532_vm14 }
 0x5a0   :  { %v527_v19 = vmul.f32 %v2351_v13, %v526_v16 }
 0x5a2   :  { %v528_v22 = vmul.f32 0.5, %v527_v19 }
 0x5a4   :  { %v529_v26 = vsub.f32 1.5, %v528_v22 }
 0x5a6   :  { %v530_v0 = vmul.f32 %v2351_v13, %v529_v26 }
 0x5a8   :  { %v534_v32 = vsel %vm533_vm0, %v2351_v13, %v530_v0 }
 0x5a9   :  { %v535_v33 = vmul.f32 %v534_v32, %v3049_v50 }
 0x5ab   :  { %v536_v34 = vmul.f32 %v535_v33, %v2963_v24 }
 0x5ad   :  { %v537_v36 = vadd.f32 %v536_v34, %v2972_v28 }
 0x5af   :  { %v2105_v37 = vmul.f32 -1.442695, %v537_v36 }
 0x5b1   :  { %2352 = vpow2.f32 %v2105_v37 }
 0x5b7   :  { %v2353_v38 = vpop.eup %2352 }
 0x5b8   :  { %v541_v40 = vadd.f32 1.0, %v2353_v38 }
 0x5ba   :  { %2354 = vrcp.f32 %v541_v40  ;;  %v553_v45 = vand.u32 2147483648, %v541_v40  ;;  %v551_v47 = vand.u32 2147483647, %v541_v40  ;;  %vm547_vm2 = vweird.f32 %v541_v40 }
 0x5bc   :  { %v554_v49 = vor.u32 1.1754944e-38, %v553_v45  ;;  %vm552_vm4 = vcmp.eq.f32.partialorder %v551_v47, 8.507059e+37 }
 0x5c0   :  { %v2355_v1 = vpop.eup %2354 }
 0x5c1   :  { %v543_v43 = vmul.f32 %v2355_v1, %v541_v40  ;;  %vm548_vm1 = vweird.f32 %v2355_v1 }
 0x5c2   :  { %vm549_vm3 = vmor %vm547_vm2, %vm548_vm1 }
 0x5c3   :  { %v544_v44 = vsub.f32 1.0, %v543_v43 }
 0x5c5   :  { %v545_v46 = vmul.f32 %v2355_v1, %v544_v44 }
 0x5c7   :  { %v546_v48 = vadd.f32 %v2355_v1, %v545_v46 }
 0x5c9   :  { %v550_v50 = vsel %vm549_vm3, %v2355_v1, %v546_v48 }
 0x5ca   :  { %v555_v52 = vsel %vm552_vm4, %v554_v49, %v550_v50 }
 0x5cb   :  { %2106 = vst [vmem:[%s4120_s9 + $0x8] sm:$0xff] %v555_v52  ;;  %614 = vmatmul.f32.vlgmr.msra.gmra.mxu0 %v555_v52  ;;  %634 = vmatmul.f32.vlgmr.msra.gmra.mxu1 %v555_v52 }
 0x5cc   :  { %562 = vst [vmem:[#allocation2 + $0x10] sm:$0xff] %v555_v52 }
 0x648   :  { %v615_v51 = vpop.f32.mrf.mxu0  ;;  %v635_v55 = vpop.f32.mrf.mxu1 }
 0x649   :  { %v3162_v56 = vadd.f32 %v2107_v53, %v615_v51  ;;  %v639_v57 = vadd.f32 %v2108_v54, %v635_v55 }
 0x64b   :  { %vm640_vm5 = vcmp.gt.f32.partialorder %v639_v57, 0.0 }
 0x64c   :  { %v2109_v58 = vsel %vm640_vm5, 1.0, %v2613_v35 }
 0x64d   :  { %v644_v59 = vmul.f32 %v2792_v39, %v2109_v58  ;;  %v650_v60 = vmul.f32 %v2799_v42, %v2109_v58 }
 0x64f   :  { %645 = vadd.xlane.f32.xlu1 %v644_v59 }
 0x657   :  { %651 = vadd.xlane.f32.xlu1 %v650_v60 }
 0x6c2   :  { %v646_v61 = vpop.xlane.xlu1 %645 }
 0x6c3   :  { %v647_v62 = vmax.f32 %v646_v61, 0.0 }
 0x6c5   :  { %v649_v63 = vmin.f32 %v647_v62, 2.0 }
 0x6ca   :  { %v652_v2 = vpop.xlane.xlu1 %651 }
 0x6cb   :  { %v653_v3 = vmax.f32 %v652_v2, 0.0 }
 0x6cd   :  { %v654_v4 = vmin.f32 %v653_v3, 2.0 }
 0x6ce LB: > { %s2110_s18 = sshll.u32 %s2548_s17, 3  ;;  %s666_s19 = scvt.s32.f32 %s2548_s17  ;;  %s2548_s17 = sphi %s2546_s17, %s660_s17   ;;  %v2544_v6 = vphi %v2542_v6, %v2543_v6   ;;  %v2540_v5 = vphi %v2538_v5, %v2539_v5  }
 0x6cf   : > { %s664_s4 = scalar_lea.vmem [#allocation2], %s2110_s18  ;;  %s660_s17 = sadd.s32 1, %s2548_s17  }
 0x6d0   : > { %v665_v7 = vld [vmem:[%s664_s4] sm:$0xff]  ;;  %v667_v8 = vstv %s666_s19  ;;  %p657_p2 = scmp.ge.s32.totalorder %s660_s17, 9  }
 0x6d1   : > { %vm668_vm6 = vcmp.eq.f32.partialorder %v649_v63, %v667_v8  ;;  %vm673_vm7 = vcmp.eq.f32.partialorder %v654_v4, %v667_v8  ;;  %v693_v13 = vld [vmem:[%s4114_s3 + $0x78] sm:$0xff] (%p657_p2)  ;;  %v692_v14 = vld [vmem:[%s4114_s3 + $0x70] sm:$0xff] (%p657_p2)  ;;  %v730_v15 = vld [vmem:[#allocation3 + $0x78] sm:$0xff] (%p657_p2)  ;;  %s2558_s15 = smov (%p657_p2), 0  }
 0x6d2   : > { %v671_v9 = vsel %vm668_vm6, %v665_v7, 0.0  ;;  %v676_v10 = vsel %vm673_vm7, %v665_v7, 0.0  ;;  %659 = sbr.rel (!%p657_p2) target bundleno = 1742 (0x6ce), region = 173  ;;  %694 = vmatpush.msra.mxu2 (%p657_p2), %v693_v13  ;;  %731 = vmatpush.msra.mxu3 (%p657_p2), %v730_v15  ;;  %v729_v16 = vld [vmem:[#allocation3 + $0x70] sm:$0xff] (%p657_p2)  ;;  %v691_v17 = vld [vmem:[%s4114_s3 + $0x68] sm:$0xff] (%p657_p2)  ;;  %v728_v18 = vld [vmem:[#allocation3 + $0x68] sm:$0xff] (%p657_p2) }
 0x6d3   : > { %v3167_v6 = vadd.f32 %v2544_v6, %v671_v9   ;;  %v3169_v5 = vadd.f32 %v2540_v5, %v676_v10   ;;  %v690_v19 = vld [vmem:[%s4114_s3 + $0x60] sm:$0xff] (%p657_p2)  ;;  %v727_v20 = vld [vmem:[#allocation3 + $0x60] sm:$0xff] (%p657_p2)  ;;  %v689_v21 = vld [vmem:[%s4114_s3 + $0x58] sm:$0xff] (%p657_p2) }
 0x6d4   :  { %695 = vmatpush.msra.mxu2 (%p657_p2), %v692_v14  ;;  %732 = vmatpush.msra.mxu3 (%p657_p2), %v729_v16  ;;  %v726_v22 = vld [vmem:[#allocation3 + $0x58] sm:$0xff] (%p657_p2)  ;;  %v688_v23 = vld [vmem:[%s4114_s3 + $0x50] sm:$0xff] (%p657_p2)  ;;  %v725_v25 = vld [vmem:[#allocation3 + $0x50] sm:$0xff] (%p657_p2) }
 0x6d5   : > { %v4125_v11 = vmov %v3167_v6  ;;  %v4126_v12 = vmov %v3169_v5  ;;  %v687_v26 = vld [vmem:[%s4114_s3 + $0x48] sm:$0xff] (%p657_p2)  ;;  %v724_v27 = vld [vmem:[#allocation3 + $0x48] sm:$0xff] (%p657_p2)  ;;  %v686_v29 = vld [vmem:[%s4114_s3 + $0x40] sm:$0xff] (%p657_p2) }
 0x6d6   : > { %v2539_v5 = vmov %v4126_v12   ;;  %v2543_v6 = vmov %v4125_v11   ;;  %696 = vmatpush.msra.mxu2 (%p657_p2), %v691_v17  ;;  %733 = vmatpush.msra.mxu3 (%p657_p2), %v728_v18  ;;  %v723_v0 = vld [vmem:[#allocation3 + $0x40] sm:$0xff] (%p657_p2)  ;;  %v685_v30 = vld [vmem:[%s4114_s3 + $0x38] sm:$0xff] (%p657_p2)  ;;  %v722_v31 = vld [vmem:[#allocation3 + $0x38] sm:$0xff] (%p657_p2) }
 0x6d7   :  { %v684_v32 = vld [vmem:[%s4114_s3 + $0x30] sm:$0xff]  ;;  %v721_v33 = vld [vmem:[#allocation3 + $0x30] sm:$0xff]  ;;  %v683_v34 = vld [vmem:[%s4114_s3 + $0x28] sm:$0xff] }
 0x6d8   :  { %697 = vmatpush.msra.mxu2 %v690_v19  ;;  %734 = vmatpush.msra.mxu3 %v727_v20  ;;  %v720_v36 = vld [vmem:[#allocation3 + $0x28] sm:$0xff]  ;;  %v682_v37 = vld [vmem:[%s4114_s3 + $0x20] sm:$0xff]  ;;  %v719_v38 = vld [vmem:[#allocation3 + $0x20] sm:$0xff] }
 0x6d9   :  { %v681_v40 = vld [vmem:[%s4114_s3 + $0x18] sm:$0xff]  ;;  %v718_v1 = vld [vmem:[#allocation3 + $0x18] sm:$0xff]  ;;  %v680_v43 = vld [vmem:[%s4114_s3 + $0x10] sm:$0xff] }
 0x6da   :  { %698 = vmatpush.msra.mxu2 %v689_v21  ;;  %735 = vmatpush.msra.mxu3 %v726_v22  ;;  %v717_v44 = vld [vmem:[#allocation3 + $0x10] sm:$0xff]  ;;  %v679_v45 = vld [vmem:[%s4114_s3 + $0x8] sm:$0xff]  ;;  %v716_v46 = vld [vmem:[#allocation3 + $0x8] sm:$0xff] }
 0x6db   :  { %v678_v47 = vld [vmem:[%s4114_s3] sm:$0xff]  ;;  %v715_v48 = vld [vmem:[#allocation3] sm:$0xff]  ;;  %v832_v58 = vld [vmem:[%s4113_s2 + $0xf0] sm:$0xff] }
 0x6dc   :  { %699 = vmatpush.msra.mxu2 %v688_v23  ;;  %736 = vmatpush.msra.mxu3 %v725_v25  ;;  %v833_v59 = vld [vmem:[%s4113_s2 + $0xf8] sm:$0xff]  ;;  %v831_v60 = vld [vmem:[%s4113_s2 + $0xe8] sm:$0xff]  ;;  %v828_v61 = vld [vmem:[%s4113_s2 + $0xd0] sm:$0xff] }
 0x6dd   :  { %834 = vmatpush.msrb.mxu0 %v832_v58  ;;  %854 = vmatpush.msrb.mxu1 %v833_v59  ;;  %v829_v62 = vld [vmem:[%s4113_s2 + $0xd8] sm:$0xff]  ;;  %v826_v63 = vld [vmem:[%s4113_s2 + $0xc0] sm:$0xff]  ;;  %v827_v2 = vld [vmem:[%s4113_s2 + $0xc8] sm:$0xff] }
 0x6de   :  { %700 = vmatpush.msra.mxu2 %v687_v26  ;;  %737 = vmatpush.msra.mxu3 %v724_v27  ;;  %v824_v5 = vld [vmem:[%s4113_s2 + $0xb0] sm:$0xff]  ;;  %v825_v6 = vld [vmem:[%s4113_s2 + $0xb8] sm:$0xff]  ;;  %v822_v8 = vld [vmem:[%s4113_s2 + $0xa0] sm:$0xff] }
 0x6df   :  { %855 = vmatpush.msrb.mxu1 %v831_v60  ;;  %v823_v9 = vld [vmem:[%s4113_s2 + $0xa8] sm:$0xff]  ;;  %v820_v10 = vld [vmem:[%s4113_s2 + $0x90] sm:$0xff]  ;;  %v817_v15 = vld [vmem:[%s4113_s2 + $0x78] sm:$0xff] }
 0x6e0   :  { %701 = vmatpush.msra.mxu2 %v686_v29  ;;  %738 = vmatpush.msra.mxu3 %v723_v0  ;;  %v819_v13 = vld [vmem:[%s4113_s2 + $0x88] sm:$0xff]  ;;  %v816_v14 = vld [vmem:[%s4113_s2 + $0x70] sm:$0xff]  ;;  %v814_v16 = vld [vmem:[%s4113_s2 + $0x60] sm:$0xff] }
 0x6e1   :  { %856 = vmatpush.msrb.mxu1 %v829_v62  ;;  %v815_v17 = vld [vmem:[%s4113_s2 + $0x68] sm:$0xff]  ;;  %v812_v19 = vld [vmem:[%s4113_s2 + $0x50] sm:$0xff]  ;;  %v813_v20 = vld [vmem:[%s4113_s2 + $0x58] sm:$0xff] }
 0x6e2   :  { %702 = vmatpush.msra.mxu2 %v685_v30  ;;  %739 = vmatpush.msra.mxu3 %v722_v31  ;;  %v810_v22 = vld [vmem:[%s4113_s2 + $0x40] sm:$0xff]  ;;  %v811_v23 = vld [vmem:[%s4113_s2 + $0x48] sm:$0xff]  ;;  %v808_v26 = vld [vmem:[%s4113_s2 + $0x30] sm:$0xff] }
 0x6e3   :  { %857 = vmatpush.msrb.mxu1 %v827_v2  ;;  %v809_v27 = vld [vmem:[%s4113_s2 + $0x38] sm:$0xff]  ;;  %v806_v0 = vld [vmem:[%s4113_s2 + $0x20] sm:$0xff]  ;;  %v807_v30 = vld [vmem:[%s4113_s2 + $0x28] sm:$0xff] }
 0x6e4   :  { %703 = vmatpush.msra.mxu2 %v684_v32  ;;  %740 = vmatpush.msra.mxu3 %v721_v33  ;;  %v804_v32 = vld [vmem:[%s4113_s2 + $0x10] sm:$0xff]  ;;  %v805_v33 = vld [vmem:[%s4113_s2 + $0x18] sm:$0xff] }
 0x6e5   :  { %858 = vmatpush.msrb.mxu1 %v825_v6  ;;  %v2113_v58 = vld [vmem:[%s4111_s0 + $0x30] sm:$0xff]  ;;  %v2114_v59 = vld [vmem:[%s4111_s0 + $0x38] sm:$0xff] }
 0x6e6   :  { %704 = vmatpush.msra.mxu2 %v683_v34  ;;  %741 = vmatpush.msra.mxu3 %v720_v36  ;;  %v802_v36 = vld [vmem:[%s4113_s2] sm:$0xff] }
 0x6e7   :  { %859 = vmatpush.msrb.mxu1 %v823_v9 }
 0x6e8   :  { %705 = vmatpush.msra.mxu2 %v682_v37  ;;  %742 = vmatpush.msra.mxu3 %v719_v38  ;;  %v803_v37 = vld [vmem:[%s4113_s2 + $0x8] sm:$0xff] }
 0x6ea   :  { %706 = vmatpush.msra.mxu2 %v681_v40  ;;  %743 = vmatpush.msra.mxu3 %v718_v1 }
 0x6ec   :  { %707 = vmatpush.msra.mxu2 %v680_v43  ;;  %744 = vmatpush.msra.mxu3 %v717_v44 }
 0x6ee   :  { %708 = vmatpush.msra.mxu2 %v679_v45  ;;  %745 = vmatpush.msra.mxu3 %v716_v46 }
 0x6f0   :  { %709 = vmatpush.msra.mxu2 %v678_v47  ;;  %746 = vmatpush.msra.mxu3 %v715_v48 }
 0x6f1   :  { %710 = vmatmul.f32.vlgmr.msra.gmra.mxu2 %v4125_v11  ;;  %747 = vmatmul.f32.vlgmr.msra.gmra.mxu3 %v4126_v12  ;;  %v821_v11 = vld [vmem:[%s4113_s2 + $0x98] sm:$0xff]  ;;  %v818_v12 = vld [vmem:[%s4113_s2 + $0x80] sm:$0xff] }
 0x6f2   :  { %860 = vmatpush.msrb.mxu1 %v821_v11  ;;  %v2554_v11 = vmov 0.0  }
 0x6f4   :  { %861 = vmatpush.msrb.mxu1 %v819_v13 }
 0x6f6   :  { %862 = vmatpush.msrb.mxu1 %v817_v15 }
 0x6f8   :  { %863 = vmatpush.msrb.mxu1 %v815_v17 }
 0x6fa   :  { %864 = vmatpush.msrb.mxu1 %v813_v20 }
 0x6fc   :  { %865 = vmatpush.msrb.mxu1 %v811_v23 }
 0x6fe   :  { %866 = vmatpush.msrb.mxu1 %v809_v27 }
 0x700   :  { %867 = vmatpush.msrb.mxu1 %v807_v30 }
 0x702   :  { %868 = vmatpush.msrb.mxu1 %v805_v33 }
 0x704   :  { %869 = vmatpush.msrb.mxu1 %v803_v37 }
 0x774   :  { %v711_v49 = vpop.f32.mrf.mxu2  ;;  %v748_v50 = vpop.f32.mrf.mxu3 }
 0x775   :  { %v714_v52 = vadd.f32 %v711_v49, %v3162_v56  ;;  %v830_v56 = vld [vmem:[%s4113_s2 + $0xe0] sm:$0xff] }
 0x776   :  { %835 = vmatpush.msrb.mxu0 %v830_v56 }
 0x777   :  { %v751_v53 = vadd.f32 %v748_v50, %v714_v52 }
 0x778   :  { %836 = vmatpush.msrb.mxu0 %v828_v61 }
 0x779   :  { %752 = vadd.xlane.f32.xlu0 %v751_v53 }
 0x77a   :  { %837 = vmatpush.msrb.mxu0 %v826_v63 }
 0x77c   :  { %838 = vmatpush.msrb.mxu0 %v824_v5 }
 0x77e   :  { %839 = vmatpush.msrb.mxu0 %v822_v8 }
 0x780   :  { %840 = vmatpush.msrb.mxu0 %v820_v10  ;;  %v2550_v10 = vmov 0.0  }
 0x782   :  { %841 = vmatpush.msrb.mxu0 %v818_v12 }
 0x784   :  { %842 = vmatpush.msrb.mxu0 %v816_v14 }
 0x786   :  { %843 = vmatpush.msrb.mxu0 %v814_v16 }
 0x788   :  { %844 = vmatpush.msrb.mxu0 %v812_v19 }
 0x78a   :  { %845 = vmatpush.msrb.mxu0 %v810_v22 }
 0x78c   :  { %846 = vmatpush.msrb.mxu0 %v808_v26 }
 0x78e   :  { %847 = vmatpush.msrb.mxu0 %v806_v0 }
 0x790   :  { %848 = vmatpush.msrb.mxu0 %v804_v32 }
 0x792   :  { %849 = vmatpush.msrb.mxu0 %v802_v36 }
 0x7ec   :  { %v753_v54 = vpop.xlane.xlu0 %752 }
 0x7ed   :  { %v754_v51 = vmul.f32 %v753_v54, %v2864_v41 }
 0x7ef   :  { %v3225_v55 = vsub.f32 %v751_v53, %v754_v51 }
 0x7f1   :  { %v756_v57 = vmul.f32 %v3225_v55, %v3225_v55 }
 0x7f3   :  { %757 = vadd.xlane.f32.xlu0 %v756_v57 }
 0x866   :  { %v758_v3 = vpop.xlane.xlu0 %757 }
 0x867   :  { %v759_v4 = vmul.f32 %v758_v3, %v2864_v41 }
 0x869   :  { %v760_v7 = vadd.f32 1e-05, %v759_v4 }
 0x86b   :  { %2356 = vrsqrt.f32 %v760_v7  ;;  %vm767_vm9 = vweird.f32 %v760_v7 }
 0x871   :  { %v2357_v18 = vpop.eup %2356 }
 0x872   :  { %v762_v21 = vmul.f32 %v2357_v18, %v760_v7  ;;  %vm768_vm8 = vweird.f32 %v2357_v18 }
 0x873   :  { %vm769_vm10 = vmor %vm767_vm9, %vm768_vm8 }
 0x874   :  { %v763_v25 = vmul.f32 %v2357_v18, %v762_v21 }
 0x876   :  { %v764_v29 = vmul.f32 0.5, %v763_v25 }
 0x878   :  { %v765_v31 = vsub.f32 1.5, %v764_v29 }
 0x87a   :  { %v766_v34 = vmul.f32 %v2357_v18, %v765_v31 }
 0x87c   :  { %v770_v38 = vsel %vm769_vm10, %v2357_v18, %v766_v34 }
 0x87d   :  { %v771_v40 = vmul.f32 %v770_v38, %v3225_v55 }
 0x87f   :  { %v772_v1 = vmul.f32 %v771_v40, %v2963_v24 }
 0x881   :  { %v773_v43 = vadd.f32 %v772_v1, %v2972_v28 }
 0x883   :  { %v2111_v44 = vmul.f32 -1.442695, %v773_v43 }
 0x885   :  { %2358 = vpow2.f32 %v2111_v44 }
 0x88b   :  { %v2359_v45 = vpop.eup %2358 }
 0x88c   :  { %v777_v46 = vadd.f32 1.0, %v2359_v45 }
 0x88e   :  { %2360 = vrcp.f32 %v777_v46  ;;  %v789_v50 = vand.u32 2147483648, %v777_v46  ;;  %v787_v53 = vand.u32 2147483647, %v777_v46  ;;  %vm783_vm12 = vweird.f32 %v777_v46 }
 0x890   :  { %v790_v51 = vor.u32 1.1754944e-38, %v789_v50  ;;  %vm788_vm14 = vcmp.eq.f32.partialorder %v787_v53, 8.507059e+37 }
 0x894   :  { %v2361_v47 = vpop.eup %2360 }
 0x895   :  { %v779_v48 = vmul.f32 %v2361_v47, %v777_v46  ;;  %vm784_vm11 = vweird.f32 %v2361_v47 }
 0x896   :  { %vm785_vm13 = vmor %vm783_vm12, %vm784_vm11 }
 0x897   :  { %v780_v49 = vsub.f32 1.0, %v779_v48 }
 0x899   :  { %v781_v52 = vmul.f32 %v2361_v47, %v780_v49 }
 0x89b   :  { %v782_v54 = vadd.f32 %v2361_v47, %v781_v52 }
 0x89d   :  { %v786_v55 = vsel %vm785_vm13, %v2361_v47, %v782_v54 }
 0x89e   :  { %v791_v57 = vsel %vm788_vm14, %v790_v51, %v786_v55 }
 0x89f   :  { %2112 = vst [vmem:[%s4120_s9 + $0x10] sm:$0xff] %v791_v57  ;;  %850 = vmatmul.f32.vlgmr.msrb.gmra.mxu0 %v791_v57  ;;  %870 = vmatmul.f32.vlgmr.msrb.gmra.mxu1 %v791_v57 }
 0x8a0   :  { %798 = vst [vmem:[#allocation2 + $0x18] sm:$0xff] %v791_v57 }
 0x91c   :  { %v851_v56 = vpop.f32.mrf.mxu0  ;;  %v871_v60 = vpop.f32.mrf.mxu1 }
 0x91d   :  { %v3338_v61 = vadd.f32 %v2113_v58, %v851_v56  ;;  %v875_v62 = vadd.f32 %v2114_v59, %v871_v60 }
 0x91f   :  { %vm876_vm15 = vcmp.gt.f32.partialorder %v875_v62, 0.0 }
 0x920   :  { %v2115_v63 = vsel %vm876_vm15, 1.0, %v2613_v35 }
 0x921   :  { %v880_v2 = vmul.f32 %v2792_v39, %v2115_v63  ;;  %v886_v3 = vmul.f32 %v2799_v42, %v2115_v63 }
 0x923   :  { %881 = vadd.xlane.f32.xlu1 %v880_v2 }
 0x92b   :  { %887 = vadd.xlane.f32.xlu1 %v886_v3 }
 0x996   :  { %v882_v4 = vpop.xlane.xlu1 %881 }
 0x997   :  { %v883_v5 = vmax.f32 %v882_v4, 0.0 }
 0x999   :  { %v885_v6 = vmin.f32 %v883_v5, 3.0 }
 0x99e   :  { %v888_v7 = vpop.xlane.xlu1 %887 }
 0x99f   :  { %v889_v8 = vmax.f32 %v888_v7, 0.0 }
 0x9a1   :  { %v890_v9 = vmin.f32 %v889_v8, 3.0 }
 0x9a2 LB: > { %s2116_s16 = sshll.u32 %s2560_s15, 3  ;;  %s902_s17 = scvt.s32.f32 %s2560_s15  ;;  %s2560_s15 = sphi %s2558_s15, %s896_s15   ;;  %v2556_v11 = vphi %v2554_v11, %v2555_v11   ;;  %v2552_v10 = vphi %v2550_v10, %v2551_v10  }
 0x9a3   : > { %s900_s18 = scalar_lea.vmem [#allocation2], %s2116_s16  ;;  %s896_s15 = sadd.s32 1, %s2560_s15  }
 0x9a4   : > { %v901_v12 = vld [vmem:[%s900_s18] sm:$0xff]  ;;  %v903_v13 = vstv %s902_s17  ;;  %p893_p3 = scmp.ge.s32.totalorder %s896_s15, 9  }
 0x9a5   : > { %vm904_vm0 = vcmp.eq.f32.partialorder %v885_v6, %v903_v13  ;;  %vm909_vm1 = vcmp.eq.f32.partialorder %v890_v9, %v903_v13  ;;  %v929_v18 = vld [vmem:[%s4114_s3 + $0x78] sm:$0xff] (%p893_p3)  ;;  %v928_v19 = vld [vmem:[%s4114_s3 + $0x70] sm:$0xff] (%p893_p3)  ;;  %v966_v20 = vld [vmem:[#allocation3 + $0x78] sm:$0xff] (%p893_p3)  ;;  %s2570_s1 = smov (%p893_p3), 0  }
 0x9a6   : > { %v907_v14 = vsel %vm904_vm0, %v901_v12, 0.0  ;;  %v912_v15 = vsel %vm909_vm1, %v901_v12, 0.0  ;;  %895 = sbr.rel (!%p893_p3) target bundleno = 2466 (0x9a2), region = 184  ;;  %930 = vmatpush.msrb.mxu2 (%p893_p3), %v929_v18  ;;  %967 = vmatpush.msrb.mxu3 (%p893_p3), %v966_v20  ;;  %v965_v21 = vld [vmem:[#allocation3 + $0x70] sm:$0xff] (%p893_p3)  ;;  %v927_v22 = vld [vmem:[%s4114_s3 + $0x68] sm:$0xff] (%p893_p3)  ;;  %v964_v23 = vld [vmem:[#allocation3 + $0x68] sm:$0xff] (%p893_p3) }
 0x9a7   : > { %v3343_v11 = vadd.f32 %v2556_v11, %v907_v14   ;;  %v3345_v10 = vadd.f32 %v2552_v10, %v912_v15   ;;  %v926_v25 = vld [vmem:[%s4114_s3 + $0x60] sm:$0xff] (%p893_p3)  ;;  %v963_v26 = vld [vmem:[#allocation3 + $0x60] sm:$0xff] (%p893_p3)  ;;  %v925_v27 = vld [vmem:[%s4114_s3 + $0x58] sm:$0xff] (%p893_p3) }
 0x9a8   :  { %931 = vmatpush.msrb.mxu2 (%p893_p3), %v928_v19  ;;  %968 = vmatpush.msrb.mxu3 (%p893_p3), %v965_v21  ;;  %v962_v29 = vld [vmem:[#allocation3 + $0x58] sm:$0xff] (%p893_p3)  ;;  %v924_v0 = vld [vmem:[%s4114_s3 + $0x50] sm:$0xff] (%p893_p3)  ;;  %v961_v30 = vld [vmem:[#allocation3 + $0x50] sm:$0xff] (%p893_p3) }
 0x9a9   : > { %v4127_v16 = vmov %v3343_v11  ;;  %v4128_v17 = vmov %v3345_v10  ;;  %v923_v31 = vld [vmem:[%s4114_s3 + $0x48] sm:$0xff] (%p893_p3)  ;;  %v960_v32 = vld [vmem:[#allocation3 + $0x48] sm:$0xff] (%p893_p3)  ;;  %v922_v33 = vld [vmem:[%s4114_s3 + $0x40] sm:$0xff] (%p893_p3) }
 0x9aa   : > { %v2551_v10 = vmov %v4128_v17   ;;  %v2555_v11 = vmov %v4127_v16   ;;  %932 = vmatpush.msrb.mxu2 (%p893_p3), %v927_v22  ;;  %969 = vmatpush.msrb.mxu3 (%p893_p3), %v964_v23  ;;  %v959_v34 = vld [vmem:[#allocation3 + $0x40] sm:$0xff] (%p893_p3)  ;;  %v921_v36 = vld [vmem:[%s4114_s3 + $0x38] sm:$0xff] (%p893_p3)  ;;  %v958_v37 = vld [vmem:[#allocation3 + $0x38] sm:$0xff] (%p893_p3) }
 0x9ab   :  { %v920_v38 = vld [vmem:[%s4114_s3 + $0x30] sm:$0xff]  ;;  %v957_v40 = vld [vmem:[#allocation3 + $0x30] sm:$0xff]  ;;  %v919_v1 = vld [vmem:[%s4114_s3 + $0x28] sm:$0xff] }
 0x9ac   :  { %933 = vmatpush.msrb.mxu2 %v926_v25  ;;  %970 = vmatpush.msrb.mxu3 %v963_v26  ;;  %v956_v43 = vld [vmem:[#allocation3 + $0x28] sm:$0xff]  ;;  %v918_v44 = vld [vmem:[%s4114_s3 + $0x20] sm:$0xff]  ;;  %v955_v45 = vld [vmem:[#allocation3 + $0x20] sm:$0xff] }
 0x9ad   :  { %v917_v46 = vld [vmem:[%s4114_s3 + $0x18] sm:$0xff]  ;;  %v954_v47 = vld [vmem:[#allocation3 + $0x18] sm:$0xff]  ;;  %v916_v48 = vld [vmem:[%s4114_s3 + $0x10] sm:$0xff] }
 0x9ae   :  { %934 = vmatpush.msrb.mxu2 %v925_v27  ;;  %971 = vmatpush.msrb.mxu3 %v962_v29  ;;  %v953_v49 = vld [vmem:[#allocation3 + $0x10] sm:$0xff]  ;;  %v915_v50 = vld [vmem:[%s4114_s3 + $0x8] sm:$0xff]  ;;  %v952_v52 = vld [vmem:[#allocation3 + $0x8] sm:$0xff] }
 0x9af   :  { %v914_v53 = vld [vmem:[%s4114_s3] sm:$0xff]  ;;  %v951_v54 = vld [vmem:[#allocation3] sm:$0xff]  ;;  %v1068_v63 = vld [vmem:[%s4113_s2 + $0xf0] sm:$0xff] }
 0x9b0   :  { %935 = vmatpush.msrb.mxu2 %v924_v0  ;;  %972 = vmatpush.msrb.mxu3 %v961_v30  ;;  %v1069_v2 = vld [vmem:[%s4113_s2 + $0xf8] sm:$0xff]  ;;  %v1067_v3 = vld [vmem:[%s4113_s2 + $0xe8] sm:$0xff]  ;;  %v1064_v4 = vld [vmem:[%s4113_s2 + $0xd0] sm:$0xff] }
 0x9b1   :  { %1070 = vmatpush.msra.mxu0 %v1068_v63  ;;  %1090 = vmatpush.msra.mxu1 %v1069_v2  ;;  %v1065_v5 = vld [vmem:[%s4113_s2 + $0xd8] sm:$0xff]  ;;  %v1062_v6 = vld [vmem:[%s4113_s2 + $0xc0] sm:$0xff]  ;;  %v1063_v7 = vld [vmem:[%s4113_s2 + $0xc8] sm:$0xff] }
 0x9b2   :  { %936 = vmatpush.msrb.mxu2 %v923_v31  ;;  %973 = vmatpush.msrb.mxu3 %v960_v32  ;;  %v1060_v10 = vld [vmem:[%s4113_s2 + $0xb0] sm:$0xff]  ;;  %v1061_v11 = vld [vmem:[%s4113_s2 + $0xb8] sm:$0xff]  ;;  %v1058_v13 = vld [vmem:[%s4113_s2 + $0xa0] sm:$0xff] }
 0x9b3   :  { %1091 = vmatpush.msra.mxu1 %v1067_v3  ;;  %v1059_v14 = vld [vmem:[%s4113_s2 + $0xa8] sm:$0xff]  ;;  %v1056_v15 = vld [vmem:[%s4113_s2 + $0x90] sm:$0xff]  ;;  %v1053_v20 = vld [vmem:[%s4113_s2 + $0x78] sm:$0xff] }
 0x9b4   :  { %937 = vmatpush.msrb.mxu2 %v922_v33  ;;  %974 = vmatpush.msrb.mxu3 %v959_v34  ;;  %v1055_v18 = vld [vmem:[%s4113_s2 + $0x88] sm:$0xff]  ;;  %v1052_v19 = vld [vmem:[%s4113_s2 + $0x70] sm:$0xff]  ;;  %v1050_v21 = vld [vmem:[%s4113_s2 + $0x60] sm:$0xff] }
 0x9b5   :  { %1092 = vmatpush.msra.mxu1 %v1065_v5  ;;  %v1051_v22 = vld [vmem:[%s4113_s2 + $0x68] sm:$0xff]  ;;  %v1048_v25 = vld [vmem:[%s4113_s2 + $0x50] sm:$0xff]  ;;  %v1049_v26 = vld [vmem:[%s4113_s2 + $0x58] sm:$0xff] }
 0x9b6   :  { %938 = vmatpush.msrb.mxu2 %v921_v36  ;;  %975 = vmatpush.msrb.mxu3 %v958_v37  ;;  %v1046_v29 = vld [vmem:[%s4113_s2 + $0x40] sm:$0xff]  ;;  %v1047_v0 = vld [vmem:[%s4113_s2 + $0x48] sm:$0xff]  ;;  %v1044_v31 = vld [vmem:[%s4113_s2 + $0x30] sm:$0xff] }
 0x9b7   :  { %1093 = vmatpush.msra.mxu1 %v1063_v7  ;;  %v1045_v32 = vld [vmem:[%s4113_s2 + $0x38] sm:$0xff]  ;;  %v1042_v34 = vld [vmem:[%s4113_s2 + $0x20] sm:$0xff]  ;;  %v1043_v36 = vld [vmem:[%s4113_s2 + $0x28] sm:$0xff] }
 0x9b8   :  { %939 = vmatpush.msrb.mxu2 %v920_v38  ;;  %976 = vmatpush.msrb.mxu3 %v957_v40  ;;  %v1040_v38 = vld [vmem:[%s4113_s2 + $0x10] sm:$0xff]  ;;  %v1041_v40 = vld [vmem:[%s4113_s2 + $0x18] sm:$0xff]  ;;  %v2119_v63 = vld [vmem:[%s4111_s0 + $0x40] sm:$0xff] }
 0x9b9   :  { %1094 = vmatpush.msra.mxu1 %v1061_v11  ;;  %v2120_v2 = vld [vmem:[%s4111_s0 + $0x48] sm:$0xff] }
 0x9ba   :  { %940 = vmatpush.msrb.mxu2 %v919_v1  ;;  %977 = vmatpush.msrb.mxu3 %v956_v43  ;;  %v1038_v43 = vld [vmem:[%s4113_s2] sm:$0xff] }
 0x9bb   :  { %1095 = vmatpush.msra.mxu1 %v1059_v14 }
 0x9bc   :  { %941 = vmatpush.msrb.mxu2 %v918_v44  ;;  %978 = vmatpush.msrb.mxu3 %v955_v45  ;;  %v1039_v44 = vld [vmem:[%s4113_s2 + $0x8] sm:$0xff] }
 0x9be   :  { %942 = vmatpush.msrb.mxu2 %v917_v46  ;;  %979 = vmatpush.msrb.mxu3 %v954_v47 }
 0x9c0   :  { %943 = vmatpush.msrb.mxu2 %v916_v48  ;;  %980 = vmatpush.msrb.mxu3 %v953_v49 }
 0x9c2   :  { %944 = vmatpush.msrb.mxu2 %v915_v50  ;;  %981 = vmatpush.msrb.mxu3 %v952_v52 }
 0x9c4   :  { %945 = vmatpush.msrb.mxu2 %v914_v53  ;;  %982 = vmatpush.msrb.mxu3 %v951_v54 }
 0x9c5   :  { %946 = vmatmul.f32.vlgmr.msrb.gmra.mxu2 %v4127_v16  ;;  %983 = vmatmul.f32.vlgmr.msrb.gmra.mxu3 %v4128_v17  ;;  %v1057_v16 = vld [vmem:[%s4113_s2 + $0x98] sm:$0xff]  ;;  %v1054_v17 = vld [vmem:[%s4113_s2 + $0x80] sm:$0xff] }
 0x9c6   :  { %1096 = vmatpush.msra.mxu1 %v1057_v16  ;;  %v2566_v16 = vmov 0.0  }
 0x9c8   :  { %1097 = vmatpush.msra.mxu1 %v1055_v18 }
 0x9ca   :  { %1098 = vmatpush.msra.mxu1 %v1053_v20 }
 0x9cc   :  { %1099 = vmatpush.msra.mxu1 %v1051_v22 }
 0x9ce   :  { %1100 = vmatpush.msra.mxu1 %v1049_v26 }
 0x9d0   :  { %1101 = vmatpush.msra.mxu1 %v1047_v0 }
 0x9d2   :  { %1102 = vmatpush.msra.mxu1 %v1045_v32 }
 0x9d4   :  { %1103 = vmatpush.msra.mxu1 %v1043_v36 }
 0x9d6   :  { %1104 = vmatpush.msra.mxu1 %v1041_v40 }
 0x9d8   :  { %1105 = vmatpush.msra.mxu1 %v1039_v44 }
 0xa48   :  { %v947_v51 = vpop.f32.mrf.mxu2  ;;  %v984_v55 = vpop.f32.mrf.mxu3 }
 0xa49   :  { %v950_v57 = vadd.f32 %v947_v51, %v3338_v61  ;;  %v1066_v61 = vld [vmem:[%s4113_s2 + $0xe0] sm:$0xff] }
 0xa4a   :  { %1071 = vmatpush.msra.mxu0 %v1066_v61 }
 0xa4b   :  { %v987_v58 = vadd.f32 %v984_v55, %v950_v57 }
 0xa4c   :  { %1072 = vmatpush.msra.mxu0 %v1064_v4 }
 0xa4d   :  { %988 = vadd.xlane.f32.xlu0 %v987_v58 }
 0xa4e   :  { %1073 = vmatpush.msra.mxu0 %v1062_v6 }
 0xa50   :  { %1074 = vmatpush.msra.mxu0 %v1060_v10 }
 0xa52   :  { %1075 = vmatpush.msra.mxu0 %v1058_v13 }
 0xa54   :  { %1076 = vmatpush.msra.mxu0 %v1056_v15  ;;  %v2562_v15 = vmov 0.0  }
 0xa56   :  { %1077 = vmatpush.msra.mxu0 %v1054_v17 }
 0xa58   :  { %1078 = vmatpush.msra.mxu0 %v1052_v19 }
 0xa5a   :  { %1079 = vmatpush.msra.mxu0 %v1050_v21 }
 0xa5c   :  { %1080 = vmatpush.msra.mxu0 %v1048_v25 }
 0xa5e   :  { %1081 = vmatpush.msra.mxu0 %v1046_v29 }
 0xa60   :  { %1082 = vmatpush.msra.mxu0 %v1044_v31 }
 0xa62   :  { %1083 = vmatpush.msra.mxu0 %v1042_v34 }
 0xa64   :  { %1084 = vmatpush.msra.mxu0 %v1040_v38 }
 0xa66   :  { %1085 = vmatpush.msra.mxu0 %v1038_v43 }
 0xac0   :  { %v989_v59 = vpop.xlane.xlu0 %988 }
 0xac1   :  { %v990_v56 = vmul.f32 %v989_v59, %v2864_v41 }
 0xac3   :  { %v3401_v60 = vsub.f32 %v987_v58, %v990_v56 }
 0xac5   :  { %v992_v62 = vmul.f32 %v3401_v60, %v3401_v60 }
 0xac7   :  { %993 = vadd.xlane.f32.xlu0 %v992_v62 }
 0xb3a   :  { %v994_v8 = vpop.xlane.xlu0 %993 }
 0xb3b   :  { %v995_v9 = vmul.f32 %v994_v8, %v2864_v41 }
 0xb3d   :  { %v996_v12 = vadd.f32 1e-05, %v995_v9 }
 0xb3f   :  { %2362 = vrsqrt.f32 %v996_v12  ;;  %vm1003_vm3 = vweird.f32 %v996_v12 }
 0xb45   :  { %v2363_v23 = vpop.eup %2362 }
 0xb46   :  { %v998_v27 = vmul.f32 %v2363_v23, %v996_v12  ;;  %vm1004_vm2 = vweird.f32 %v2363_v23 }
 0xb47   :  { %vm1005_vm4 = vmor %vm1003_vm3, %vm1004_vm2 }
 0xb48   :  { %v999_v30 = vmul.f32 %v2363_v23, %v998_v27 }
 0xb4a   :  { %v1000_v33 = vmul.f32 0.5, %v999_v30 }
 0xb4c   :  { %v1001_v37 = vsub.f32 1.5, %v1000_v33 }
 0xb4e   :  { %v1002_v1 = vmul.f32 %v2363_v23, %v1001_v37 }
 0xb50   :  { %v1006_v45 = vsel %vm1005_vm4, %v2363_v23, %v1002_v1 }
 0xb51   :  { %v1007_v46 = vmul.f32 %v1006_v45, %v3401_v60 }
 0xb53   :  { %v1008_v47 = vmul.f32 %v1007_v46, %v2963_v24 }
 0xb55   :  { %v1009_v48 = vadd.f32 %v1008_v47, %v2972_v28 }
 0xb57   :  { %v2117_v49 = vmul.f32 -1.442695, %v1009_v48 }
 0xb59   :  { %2364 = vpow2.f32 %v2117_v49 }
 0xb5f   :  { %v2365_v50 = vpop.eup %2364 }
 0xb60   :  { %v1013_v52 = vadd.f32 1.0, %v2365_v50 }
 0xb62   :  { %2366 = vrcp.f32 %v1013_v52  ;;  %v1025_v55 = vand.u32 2147483648, %v1013_v52  ;;  %v1023_v58 = vand.u32 2147483647, %v1013_v52  ;;  %vm1019_vm6 = vweird.f32 %v1013_v52 }
 0xb64   :  { %v1026_v56 = vor.u32 1.1754944e-38, %v1025_v55  ;;  %vm1024_vm8 = vcmp.eq.f32.partialorder %v1023_v58, 8.507059e+37 }
 0xb68   :  { %v2367_v53 = vpop.eup %2366 }
 0xb69   :  { %v1015_v54 = vmul.f32 %v2367_v53, %v1013_v52  ;;  %vm1020_vm5 = vweird.f32 %v2367_v53 }
 0xb6a   :  { %vm1021_vm7 = vmor %vm1019_vm6, %vm1020_vm5 }
 0xb6b   :  { %v1016_v51 = vsub.f32 1.0, %v1015_v54 }
 0xb6d   :  { %v1017_v57 = vmul.f32 %v2367_v53, %v1016_v51 }
 0xb6f   :  { %v1018_v59 = vadd.f32 %v2367_v53, %v1017_v57 }
 0xb71   :  { %v1022_v60 = vsel %vm1021_vm7, %v2367_v53, %v1018_v59 }
 0xb72   :  { %v1027_v62 = vsel %vm1024_vm8, %v1026_v56, %v1022_v60 }
 0xb73   :  { %2118 = vst [vmem:[%s4120_s9 + $0x18] sm:$0xff] %v1027_v62  ;;  %1086 = vmatmul.f32.vlgmr.msra.gmra.mxu0 %v1027_v62  ;;  %1106 = vmatmul.f32.vlgmr.msra.gmra.mxu1 %v1027_v62 }
 0xb74   :  { %1034 = vst [vmem:[#allocation2 + $0x20] sm:$0xff] %v1027_v62 }
 0xbf0   :  { %v1087_v61 = vpop.f32.mrf.mxu0  ;;  %v1107_v3 = vpop.f32.mrf.mxu1 }
 0xbf1   :  { %v3514_v4 = vadd.f32 %v2119_v63, %v1087_v61  ;;  %v1111_v5 = vadd.f32 %v2120_v2, %v1107_v3 }
 0xbf3   :  { %vm1112_vm9 = vcmp.gt.f32.partialorder %v1111_v5, 0.0 }
 0xbf4   :  { %v2121_v6 = vsel %vm1112_vm9, 1.0, %v2613_v35 }
 0xbf5   :  { %v1116_v7 = vmul.f32 %v2792_v39, %v2121_v6  ;;  %v1122_v8 = vmul.f32 %v2799_v42, %v2121_v6 }
 0xbf7   :  { %1117 = vadd.xlane.f32.xlu1 %v1116_v7 }
 0xbff   :  { %1123 = vadd.xlane.f32.xlu1 %v1122_v8 }
 0xc6a   :  { %v1118_v9 = vpop.xlane.xlu1 %1117 }
 0xc6b   :  { %v1119_v10 = vmax.f32 %v1118_v9, 0.0 }
 0xc6d   :  { %v1121_v11 = vmin.f32 %v1119_v10, 4.0 }
 0xc72   :  { %v1124_v12 = vpop.xlane.xlu1 %1123 }
 0xc73   :  { %v1125_v13 = vmax.f32 %v1124_v12, 0.0 }
 0xc75   :  { %v1126_v14 = vmin.f32 %v1125_v13, 4.0 }
 0xc76 LB: > { %s2122_s14 = sshll.u32 %s2572_s1, 3  ;;  %s1138_s15 = scvt.s32.f32 %s2572_s1  ;;  %s2572_s1 = sphi %s2570_s1, %s1132_s1   ;;  %v2568_v16 = vphi %v2566_v16, %v2567_v16   ;;  %v2564_v15 = vphi %v2562_v15, %v2563_v15  }
 0xc77   : > { %s1136_s16 = scalar_lea.vmem [#allocation2], %s2122_s14  ;;  %s1132_s1 = sadd.s32 1, %s2572_s1  }
 0xc78   : > { %v1137_v17 = vld [vmem:[%s1136_s16] sm:$0xff]  ;;  %v1139_v18 = vstv %s1138_s15  ;;  %p1129_p4 = scmp.ge.s32.totalorder %s1132_s1, 9  }
 0xc79   : > { %vm1140_vm10 = vcmp.eq.f32.partialorder %v1121_v11, %v1139_v18  ;;  %vm1145_vm11 = vcmp.eq.f32.partialorder %v1126_v14, %v1139_v18  ;;  %v1165_v23 = vld [vmem:[%s4114_s3 + $0x78] sm:$0xff] (%p1129_p4)  ;;  %v1164_v25 = vld [vmem:[%s4114_s3 + $0x70] sm:$0xff] (%p1129_p4)  ;;  %v1202_v26 = vld [vmem:[#allocation3 + $0x78] sm:$0xff] (%p1129_p4)  ;;  %s2582_s12 = smov (%p1129_p4), 0  }
 0xc7a   : > { %v1143_v19 = vsel %vm1140_vm10, %v1137_v17, 0.0  ;;  %v1148_v20 = vsel %vm1145_vm11, %v1137_v17, 0.0  ;;  %1131 = sbr.rel (!%p1129_p4) target bundleno = 3190 (0xc76), region = 195  ;;  %1166 = vmatpush.msra.mxu2 (%p1129_p4), %v1165_v23  ;;  %1203 = vmatpush.msra.mxu3 (%p1129_p4), %v1202_v26  ;;  %v1201_v27 = vld [vmem:[#allocation3 + $0x70] sm:$0xff] (%p1129_p4)  ;;  %v1163_v29 = vld [vmem:[%s4114_s3 + $0x68] sm:$0xff] (%p1129_p4)  ;;  %v1200_v0 = vld [vmem:[#allocation3 + $0x68] sm:$0xff] (%p1129_p4) }
 0xc7b   : > { %v3519_v16 = vadd.f32 %v2568_v16, %v1143_v19   ;;  %v3521_v15 = vadd.f32 %v2564_v15, %v1148_v20   ;;  %v1162_v30 = vld [vmem:[%s4114_s3 + $0x60] sm:$0xff] (%p1129_p4)  ;;  %v1199_v31 = vld [vmem:[#allocation3 + $0x60] sm:$0xff] (%p1129_p4)  ;;  %v1161_v32 = vld [vmem:[%s4114_s3 + $0x58] sm:$0xff] (%p1129_p4) }
 0xc7c   :  { %1167 = vmatpush.msra.mxu2 (%p1129_p4), %v1164_v25  ;;  %1204 = vmatpush.msra.mxu3 (%p1129_p4), %v1201_v27  ;;  %v1198_v33 = vld [vmem:[#allocation3 + $0x58] sm:$0xff] (%p1129_p4)  ;;  %v1160_v34 = vld [vmem:[%s4114_s3 + $0x50] sm:$0xff] (%p1129_p4)  ;;  %v1197_v36 = vld [vmem:[#allocation3 + $0x50] sm:$0xff] (%p1129_p4) }
 0xc7d   : > { %v4129_v21 = vmov %v3519_v16  ;;  %v4130_v22 = vmov %v3521_v15  ;;  %v1159_v37 = vld [vmem:[%s4114_s3 + $0x48] sm:$0xff] (%p1129_p4)  ;;  %v1196_v38 = vld [vmem:[#allocation3 + $0x48] sm:$0xff] (%p1129_p4)  ;;  %v1158_v40 = vld [vmem:[%s4114_s3 + $0x40] sm:$0xff] (%p1129_p4) }
 0xc7e   : > { %v2563_v15 = vmov %v4130_v22   ;;  %v2567_v16 = vmov %v4129_v21   ;;  %1168 = vmatpush.msra.mxu2 (%p1129_p4), %v1163_v29  ;;  %1205 = vmatpush.msra.mxu3 (%p1129_p4), %v1200_v0  ;;  %v1195_v1 = vld [vmem:[#allocation3 + $0x40] sm:$0xff] (%p1129_p4)  ;;  %v1157_v43 = vld [vmem:[%s4114_s3 + $0x38] sm:$0xff] (%p1129_p4)  ;;  %v1194_v44 = vld [vmem:[#allocation3 + $0x38] sm:$0xff] (%p1129_p4) }
 0xc7f   :  { %v1156_v45 = vld [vmem:[%s4114_s3 + $0x30] sm:$0xff]  ;;  %v1193_v46 = vld [vmem:[#allocation3 + $0x30] sm:$0xff]  ;;  %v1155_v47 = vld [vmem:[%s4114_s3 + $0x28] sm:$0xff] }
 0xc80   :  { %1169 = vmatpush.msra.mxu2 %v1162_v30  ;;  %1206 = vmatpush.msra.mxu3 %v1199_v31  ;;  %v1192_v48 = vld [vmem:[#allocation3 + $0x28] sm:$0xff]  ;;  %v1154_v49 = vld [vmem:[%s4114_s3 + $0x20] sm:$0xff]  ;;  %v1191_v50 = vld [vmem:[#allocation3 + $0x20] sm:$0xff] }
 0xc81   :  { %v1153_v52 = vld [vmem:[%s4114_s3 + $0x18] sm:$0xff]  ;;  %v1190_v53 = vld [vmem:[#allocation3 + $0x18] sm:$0xff]  ;;  %v1152_v54 = vld [vmem:[%s4114_s3 + $0x10] sm:$0xff] }
 0xc82   :  { %1170 = vmatpush.msra.mxu2 %v1161_v32  ;;  %1207 = vmatpush.msra.mxu3 %v1198_v33  ;;  %v1189_v51 = vld [vmem:[#allocation3 + $0x10] sm:$0xff]  ;;  %v1151_v55 = vld [vmem:[%s4114_s3 + $0x8] sm:$0xff]  ;;  %v1188_v57 = vld [vmem:[#allocation3 + $0x8] sm:$0xff] }
 0xc83   :  { %v1150_v58 = vld [vmem:[%s4114_s3] sm:$0xff]  ;;  %v1187_v59 = vld [vmem:[#allocation3] sm:$0xff]  ;;  %v1304_v6 = vld [vmem:[%s4113_s2 + $0xf0] sm:$0xff] }
 0xc84   :  { %1171 = vmatpush.msra.mxu2 %v1160_v34  ;;  %1208 = vmatpush.msra.mxu3 %v1197_v36  ;;  %v1305_v7 = vld [vmem:[%s4113_s2 + $0xf8] sm:$0xff]  ;;  %v1303_v8 = vld [vmem:[%s4113_s2 + $0xe8] sm:$0xff]  ;;  %v1300_v9 = vld [vmem:[%s4113_s2 + $0xd0] sm:$0xff] }
 0xc85   :  { %1306 = vmatpush.msrb.mxu0 %v1304_v6  ;;  %1326 = vmatpush.msrb.mxu1 %v1305_v7  ;;  %v1301_v10 = vld [vmem:[%s4113_s2 + $0xd8] sm:$0xff]  ;;  %v1298_v11 = vld [vmem:[%s4113_s2 + $0xc0] sm:$0xff]  ;;  %v1299_v12 = vld [vmem:[%s4113_s2 + $0xc8] sm:$0xff] }
 0xc86   :  { %1172 = vmatpush.msra.mxu2 %v1159_v37  ;;  %1209 = vmatpush.msra.mxu3 %v1196_v38  ;;  %v1296_v15 = vld [vmem:[%s4113_s2 + $0xb0] sm:$0xff]  ;;  %v1297_v16 = vld [vmem:[%s4113_s2 + $0xb8] sm:$0xff]  ;;  %v1294_v18 = vld [vmem:[%s4113_s2 + $0xa0] sm:$0xff] }
 0xc87   :  { %1327 = vmatpush.msrb.mxu1 %v1303_v8  ;;  %v1295_v19 = vld [vmem:[%s4113_s2 + $0xa8] sm:$0xff]  ;;  %v1292_v20 = vld [vmem:[%s4113_s2 + $0x90] sm:$0xff]  ;;  %v1289_v26 = vld [vmem:[%s4113_s2 + $0x78] sm:$0xff] }
 0xc88   :  { %1173 = vmatpush.msra.mxu2 %v1158_v40  ;;  %1210 = vmatpush.msra.mxu3 %v1195_v1  ;;  %v1291_v23 = vld [vmem:[%s4113_s2 + $0x88] sm:$0xff]  ;;  %v1288_v25 = vld [vmem:[%s4113_s2 + $0x70] sm:$0xff]  ;;  %v1286_v27 = vld [vmem:[%s4113_s2 + $0x60] sm:$0xff] }
 0xc89   :  { %1328 = vmatpush.msrb.mxu1 %v1301_v10  ;;  %v1287_v29 = vld [vmem:[%s4113_s2 + $0x68] sm:$0xff]  ;;  %v1284_v30 = vld [vmem:[%s4113_s2 + $0x50] sm:$0xff]  ;;  %v1285_v31 = vld [vmem:[%s4113_s2 + $0x58] sm:$0xff] }
 0xc8a   :  { %1174 = vmatpush.msra.mxu2 %v1157_v43  ;;  %1211 = vmatpush.msra.mxu3 %v1194_v44  ;;  %v1282_v33 = vld [vmem:[%s4113_s2 + $0x40] sm:$0xff]  ;;  %v1283_v34 = vld [vmem:[%s4113_s2 + $0x48] sm:$0xff]  ;;  %v1280_v37 = vld [vmem:[%s4113_s2 + $0x30] sm:$0xff] }
 0xc8b   :  { %1329 = vmatpush.msrb.mxu1 %v1299_v12  ;;  %v1281_v38 = vld [vmem:[%s4113_s2 + $0x38] sm:$0xff]  ;;  %v1278_v1 = vld [vmem:[%s4113_s2 + $0x20] sm:$0xff]  ;;  %v1279_v43 = vld [vmem:[%s4113_s2 + $0x28] sm:$0xff] }
 0xc8c   :  { %1175 = vmatpush.msra.mxu2 %v1156_v45  ;;  %1212 = vmatpush.msra.mxu3 %v1193_v46  ;;  %v1276_v45 = vld [vmem:[%s4113_s2 + $0x10] sm:$0xff]  ;;  %v1277_v46 = vld [vmem:[%s4113_s2 + $0x18] sm:$0xff] }
 0xc8d   :  { %1330 = vmatpush.msrb.mxu1 %v1297_v16  ;;  %v2125_v6 = vld [vmem:[%s4111_s0 + $0x50] sm:$0xff]  ;;  %v2126_v7 = vld [vmem:[%s4111_s0 + $0x58] sm:$0xff] }
 0xc8e   :  { %1176 = vmatpush.msra.mxu2 %v1155_v47  ;;  %1213 = vmatpush.msra.mxu3 %v1192_v48  ;;  %v1274_v48 = vld [vmem:[%s4113_s2] sm:$0xff] }
 0xc8f   :  { %1331 = vmatpush.msrb.mxu1 %v1295_v19 }
 0xc90   :  { %1177 = vmatpush.msra.mxu2 %v1154_v49  ;;  %1214 = vmatpush.msra.mxu3 %v1191_v50  ;;  %v1275_v49 = vld [vmem:[%s4113_s2 + $0x8] sm:$0xff] }
 0xc92   :  { %1178 = vmatpush.msra.mxu2 %v1153_v52  ;;  %1215 = vmatpush.msra.mxu3 %v1190_v53 }
 0xc94   :  { %1179 = vmatpush.msra.mxu2 %v1152_v54  ;;  %1216 = vmatpush.msra.mxu3 %v1189_v51 }
 0xc96   :  { %1180 = vmatpush.msra.mxu2 %v1151_v55  ;;  %1217 = vmatpush.msra.mxu3 %v1188_v57 }
 0xc98   :  { %1181 = vmatpush.msra.mxu2 %v1150_v58  ;;  %1218 = vmatpush.msra.mxu3 %v1187_v59 }
 0xc99   :  { %1182 = vmatmul.f32.vlgmr.msra.gmra.mxu2 %v4129_v21  ;;  %1219 = vmatmul.f32.vlgmr.msra.gmra.mxu3 %v4130_v22  ;;  %v1293_v21 = vld [vmem:[%s4113_s2 + $0x98] sm:$0xff]  ;;  %v1290_v22 = vld [vmem:[%s4113_s2 + $0x80] sm:$0xff] }
 0xc9a   :  { %1332 = vmatpush.msrb.mxu1 %v1293_v21  ;;  %v2578_v21 = vmov 0.0  }
 0xc9c   :  { %1333 = vmatpush.msrb.mxu1 %v1291_v23 }
 0xc9e   :  { %1334 = vmatpush.msrb.mxu1 %v1289_v26 }
 0xca0   :  { %1335 = vmatpush.msrb.mxu1 %v1287_v29 }
 0xca2   :  { %1336 = vmatpush.msrb.mxu1 %v1285_v31 }
 0xca4   :  { %1337 = vmatpush.msrb.mxu1 %v1283_v34 }
 0xca6   :  { %1338 = vmatpush.msrb.mxu1 %v1281_v38 }
 0xca8   :  { %1339 = vmatpush.msrb.mxu1 %v1279_v43 }
 0xcaa   :  { %1340 = vmatpush.msrb.mxu1 %v1277_v46 }
 0xcac   :  { %1341 = vmatpush.msrb.mxu1 %v1275_v49 }
 0xd1c   :  { %v1183_v56 = vpop.f32.mrf.mxu2  ;;  %v1220_v60 = vpop.f32.mrf.mxu3 }
 0xd1d   :  { %v1186_v62 = vadd.f32 %v1183_v56, %v3514_v4  ;;  %v1302_v4 = vld [vmem:[%s4113_s2 + $0xe0] sm:$0xff] }
 0xd1e   :  { %1307 = vmatpush.msrb.mxu0 %v1302_v4 }
 0xd1f   :  { %v1223_v63 = vadd.f32 %v1220_v60, %v1186_v62 }
 0xd20   :  { %1308 = vmatpush.msrb.mxu0 %v1300_v9 }
 0xd21   :  { %1224 = vadd.xlane.f32.xlu0 %v1223_v63 }
 0xd22   :  { %1309 = vmatpush.msrb.mxu0 %v1298_v11 }
 0xd24   :  { %1310 = vmatpush.msrb.mxu0 %v1296_v15 }
 0xd26   :  { %1311 = vmatpush.msrb.mxu0 %v1294_v18 }
 0xd28   :  { %1312 = vmatpush.msrb.mxu0 %v1292_v20  ;;  %v2574_v20 = vmov 0.0  }
 0xd2a   :  { %1313 = vmatpush.msrb.mxu0 %v1290_v22 }
 0xd2c   :  { %1314 = vmatpush.msrb.mxu0 %v1288_v25 }
 0xd2e   :  { %1315 = vmatpush.msrb.mxu0 %v1286_v27 }
 0xd30   :  { %1316 = vmatpush.msrb.mxu0 %v1284_v30 }
 0xd32   :  { %1317 = vmatpush.msrb.mxu0 %v1282_v33 }
 0xd34   :  { %1318 = vmatpush.msrb.mxu0 %v1280_v37 }
 0xd36   :  { %1319 = vmatpush.msrb.mxu0 %v1278_v1 }
 0xd38   :  { %1320 = vmatpush.msrb.mxu0 %v1276_v45 }
 0xd3a   :  { %1321 = vmatpush.msrb.mxu0 %v1274_v48 }
 0xd94   :  { %v1225_v2 = vpop.xlane.xlu0 %1224 }
 0xd95   :  { %v1226_v61 = vmul.f32 %v1225_v2, %v2864_v41 }
 0xd97   :  { %v3577_v3 = vsub.f32 %v1223_v63, %v1226_v61 }
 0xd99   :  { %v1228_v5 = vmul.f32 %v3577_v3, %v3577_v3 }
 0xd9b   :  { %1229 = vadd.xlane.f32.xlu0 %v1228_v5 }
 0xe0e   :  { %v1230_v13 = vpop.xlane.xlu0 %1229 }
 0xe0f   :  { %v1231_v14 = vmul.f32 %v1230_v13, %v2864_v41 }
 0xe11   :  { %v1232_v17 = vadd.f32 1e-05, %v1231_v14 }
 0xe13   :  { %2368 = vrsqrt.f32 %v1232_v17  ;;  %vm1239_vm13 = vweird.f32 %v1232_v17 }
 0xe19   :  { %v2369_v0 = vpop.eup %2368 }
 0xe1a   :  { %v1234_v32 = vmul.f32 %v2369_v0, %v1232_v17  ;;  %vm1240_vm12 = vweird.f32 %v2369_v0 }
 0xe1b   :  { %vm1241_vm14 = vmor %vm1239_vm13, %vm1240_vm12 }
 0xe1c   :  { %v1235_v36 = vmul.f32 %v2369_v0, %v1234_v32 }
 0xe1e   :  { %v1236_v40 = vmul.f32 0.5, %v1235_v36 }
 0xe20   :  { %v1237_v44 = vsub.f32 1.5, %v1236_v40 }
 0xe22   :  { %v1238_v47 = vmul.f32 %v2369_v0, %v1237_v44 }
 0xe24   :  { %v1242_v50 = vsel %vm1241_vm14, %v2369_v0, %v1238_v47 }
 0xe25   :  { %v1243_v52 = vmul.f32 %v1242_v50, %v3577_v3 }
 0xe27   :  { %v1244_v53 = vmul.f32 %v1243_v52, %v2963_v24 }
 0xe29   :  { %v1245_v54 = vadd.f32 %v1244_v53, %v2972_v28 }
 0xe2b   :  { %v2123_v51 = vmul.f32 -1.442695, %v1245_v54 }
 0xe2d   :  { %2370 = vpow2.f32 %v2123_v51 }
 0xe33   :  { %v2371_v55 = vpop.eup %2370 }
 0xe34   :  { %v1249_v57 = vadd.f32 1.0, %v2371_v55 }
 0xe36   :  { %2372 = vrcp.f32 %v1249_v57  ;;  %v1261_v60 = vand.u32 2147483648, %v1249_v57  ;;  %v1259_v63 = vand.u32 2147483647, %v1249_v57  ;;  %vm1255_vm0 = vweird.f32 %v1249_v57 }
 0xe38   :  { %v1262_v61 = vor.u32 1.1754944e-38, %v1261_v60  ;;  %vm1260_vm2 = vcmp.eq.f32.partialorder %v1259_v63, 8.507059e+37 }
 0xe3c   :  { %v2373_v58 = vpop.eup %2372 }
 0xe3d   :  { %v1251_v59 = vmul.f32 %v2373_v58, %v1249_v57  ;;  %vm1256_vm15 = vweird.f32 %v2373_v58 }
 0xe3e   :  { %vm1257_vm1 = vmor %vm1255_vm0, %vm1256_vm15 }
 0xe3f   :  { %v1252_v56 = vsub.f32 1.0, %v1251_v59 }
 0xe41   :  { %v1253_v62 = vmul.f32 %v2373_v58, %v1252_v56 }
 0xe43   :  { %v1254_v2 = vadd.f32 %v2373_v58, %v1253_v62 }
 0xe45   :  { %v1258_v3 = vsel %vm1257_vm1, %v2373_v58, %v1254_v2 }
 0xe46   :  { %v1263_v5 = vsel %vm1260_vm2, %v1262_v61, %v1258_v3 }
 0xe47   :  { %2124 = vst [vmem:[%s4120_s9 + $0x20] sm:$0xff] %v1263_v5  ;;  %1322 = vmatmul.f32.vlgmr.msrb.gmra.mxu0 %v1263_v5  ;;  %1342 = vmatmul.f32.vlgmr.msrb.gmra.mxu1 %v1263_v5 }
 0xe48   :  { %1270 = vst [vmem:[#allocation2 + $0x28] sm:$0xff] %v1263_v5 }
 0xec4   :  { %v1323_v4 = vpop.f32.mrf.mxu0  ;;  %v1343_v8 = vpop.f32.mrf.mxu1 }
 0xec5   :  { %v3690_v9 = vadd.f32 %v2125_v6, %v1323_v4  ;;  %v1347_v10 = vadd.f32 %v2126_v7, %v1343_v8 }
 0xec7   :  { %vm1348_vm3 = vcmp.gt.f32.partialorder %v1347_v10, 0.0 }
 0xec8   :  { %v2127_v11 = vsel %vm1348_vm3, 1.0, %v2613_v35 }
 0xec9   :  { %v1352_v12 = vmul.f32 %v2792_v39, %v2127_v11  ;;  %v1358_v13 = vmul.f32 %v2799_v42, %v2127_v11 }
 0xecb   :  { %1353 = vadd.xlane.f32.xlu1 %v1352_v12 }
 0xed3   :  { %1359 = vadd.xlane.f32.xlu1 %v1358_v13 }
 0xf3e   :  { %v1354_v14 = vpop.xlane.xlu1 %1353 }
 0xf3f   :  { %v1355_v15 = vmax.f32 %v1354_v14, 0.0 }
 0xf41   :  { %v1357_v16 = vmin.f32 %v1355_v15, 5.0 }
 0xf46   :  { %v1360_v17 = vpop.xlane.xlu1 %1359 }
 0xf47   :  { %v1361_v18 = vmax.f32 %v1360_v17, 0.0 }
 0xf49   :  { %v1362_v19 = vmin.f32 %v1361_v18, 5.0 }
 0xf4a LB: > { %s2128_s13 = sshll.u32 %s2584_s12, 3  ;;  %s1374_s1 = scvt.s32.f32 %s2584_s12  ;;  %s2584_s12 = sphi %s2582_s12, %s1368_s12   ;;  %v2580_v21 = vphi %v2578_v21, %v2579_v21   ;;  %v2576_v20 = vphi %v2574_v20, %v2575_v20  }
 0xf4b   : > { %s1372_s14 = scalar_lea.vmem [#allocation2], %s2128_s13  ;;  %s1368_s12 = sadd.s32 1, %s2584_s12  }
 0xf4c   : > { %v1373_v22 = vld [vmem:[%s1372_s14] sm:$0xff]  ;;  %v1375_v23 = vstv %s1374_s1  ;;  %p1365_p5 = scmp.ge.s32.totalorder %s1368_s12, 9  }
 0xf4d   : > { %vm1376_vm4 = vcmp.eq.f32.partialorder %v1357_v16, %v1375_v23  ;;  %vm1381_vm5 = vcmp.eq.f32.partialorder %v1362_v19, %v1375_v23  ;;  %v1401_v0 = vld [vmem:[%s4114_s3 + $0x78] sm:$0xff] (%p1365_p5)  ;;  %v1400_v30 = vld [vmem:[%s4114_s3 + $0x70] sm:$0xff] (%p1365_p5)  ;;  %v1438_v31 = vld [vmem:[#allocation3 + $0x78] sm:$0xff] (%p1365_p5)  ;;  %s2594_s10 = smov (%p1365_p5), 0  }
 0xf4e   : > { %v1379_v25 = vsel %vm1376_vm4, %v1373_v22, 0.0  ;;  %v1384_v26 = vsel %vm1381_vm5, %v1373_v22, 0.0  ;;  %1367 = sbr.rel (!%p1365_p5) target bundleno = 3914 (0xf4a), region = 206  ;;  %1402 = vmatpush.msrb.mxu2 (%p1365_p5), %v1401_v0  ;;  %1439 = vmatpush.msrb.mxu3 (%p1365_p5), %v1438_v31  ;;  %v1437_v32 = vld [vmem:[#allocation3 + $0x70] sm:$0xff] (%p1365_p5)  ;;  %v1399_v33 = vld [vmem:[%s4114_s3 + $0x68] sm:$0xff] (%p1365_p5)  ;;  %v1436_v34 = vld [vmem:[#allocation3 + $0x68] sm:$0xff] (%p1365_p5) }
 0xf4f   : > { %v3695_v21 = vadd.f32 %v2580_v21, %v1379_v25   ;;  %v3697_v20 = vadd.f32 %v2576_v20, %v1384_v26   ;;  %v1398_v36 = vld [vmem:[%s4114_s3 + $0x60] sm:$0xff] (%p1365_p5)  ;;  %v1435_v37 = vld [vmem:[#allocation3 + $0x60] sm:$0xff] (%p1365_p5)  ;;  %v1397_v38 = vld [vmem:[%s4114_s3 + $0x58] sm:$0xff] (%p1365_p5) }
 0xf50   :  { %1403 = vmatpush.msrb.mxu2 (%p1365_p5), %v1400_v30  ;;  %1440 = vmatpush.msrb.mxu3 (%p1365_p5), %v1437_v32  ;;  %v1434_v40 = vld [vmem:[#allocation3 + $0x58] sm:$0xff] (%p1365_p5)  ;;  %v1396_v1 = vld [vmem:[%s4114_s3 + $0x50] sm:$0xff] (%p1365_p5)  ;;  %v1433_v43 = vld [vmem:[#allocation3 + $0x50] sm:$0xff] (%p1365_p5) }
 0xf51   : > { %v4131_v27 = vmov %v3695_v21  ;;  %v4132_v29 = vmov %v3697_v20  ;;  %v1395_v44 = vld [vmem:[%s4114_s3 + $0x48] sm:$0xff] (%p1365_p5)  ;;  %v1432_v45 = vld [vmem:[#allocation3 + $0x48] sm:$0xff] (%p1365_p5)  ;;  %v1394_v46 = vld [vmem:[%s4114_s3 + $0x40] sm:$0xff] (%p1365_p5) }
 0xf52   : > { %v2575_v20 = vmov %v4132_v29   ;;  %v2579_v21 = vmov %v4131_v27   ;;  %1404 = vmatpush.msrb.mxu2 (%p1365_p5), %v1399_v33  ;;  %1441 = vmatpush.msrb.mxu3 (%p1365_p5), %v1436_v34  ;;  %v1431_v47 = vld [vmem:[#allocation3 + $0x40] sm:$0xff] (%p1365_p5)  ;;  %v1393_v48 = vld [vmem:[%s4114_s3 + $0x38] sm:$0xff] (%p1365_p5)  ;;  %v1430_v49 = vld [vmem:[#allocation3 + $0x38] sm:$0xff] (%p1365_p5) }
 0xf53   :  { %v1392_v50 = vld [vmem:[%s4114_s3 + $0x30] sm:$0xff]  ;;  %v1429_v52 = vld [vmem:[#allocation3 + $0x30] sm:$0xff]  ;;  %v1391_v53 = vld [vmem:[%s4114_s3 + $0x28] sm:$0xff] }
 0xf54   :  { %1405 = vmatpush.msrb.mxu2 %v1398_v36  ;;  %1442 = vmatpush.msrb.mxu3 %v1435_v37  ;;  %v1428_v54 = vld [vmem:[#allocation3 + $0x28] sm:$0xff]  ;;  %v1390_v51 = vld [vmem:[%s4114_s3 + $0x20] sm:$0xff]  ;;  %v1427_v55 = vld [vmem:[#allocation3 + $0x20] sm:$0xff] }
 0xf55   :  { %v1389_v57 = vld [vmem:[%s4114_s3 + $0x18] sm:$0xff]  ;;  %v1426_v58 = vld [vmem:[#allocation3 + $0x18] sm:$0xff]  ;;  %v1388_v59 = vld [vmem:[%s4114_s3 + $0x10] sm:$0xff] }
 0xf56   :  { %1406 = vmatpush.msrb.mxu2 %v1397_v38  ;;  %1443 = vmatpush.msrb.mxu3 %v1434_v40  ;;  %v1425_v56 = vld [vmem:[#allocation3 + $0x10] sm:$0xff]  ;;  %v1387_v60 = vld [vmem:[%s4114_s3 + $0x8] sm:$0xff]  ;;  %v1424_v62 = vld [vmem:[#allocation3 + $0x8] sm:$0xff] }
 0xf57   :  { %v1386_v63 = vld [vmem:[%s4114_s3] sm:$0xff]  ;;  %v1423_v2 = vld [vmem:[#allocation3] sm:$0xff]  ;;  %v1540_v11 = vld [vmem:[%s4113_s2 + $0xf0] sm:$0xff] }
 0xf58   :  { %1407 = vmatpush.msrb.mxu2 %v1396_v1  ;;  %1444 = vmatpush.msrb.mxu3 %v1433_v43  ;;  %v1541_v12 = vld [vmem:[%s4113_s2 + $0xf8] sm:$0xff]  ;;  %v1539_v13 = vld [vmem:[%s4113_s2 + $0xe8] sm:$0xff]  ;;  %v1536_v14 = vld [vmem:[%s4113_s2 + $0xd0] sm:$0xff] }
 0xf59   :  { %1542 = vmatpush.msra.mxu0 %v1540_v11  ;;  %1562 = vmatpush.msra.mxu1 %v1541_v12  ;;  %v1537_v15 = vld [vmem:[%s4113_s2 + $0xd8] sm:$0xff]  ;;  %v1534_v16 = vld [vmem:[%s4113_s2 + $0xc0] sm:$0xff]  ;;  %v1535_v17 = vld [vmem:[%s4113_s2 + $0xc8] sm:$0xff] }
 0xf5a   :  { %1408 = vmatpush.msrb.mxu2 %v1395_v44  ;;  %1445 = vmatpush.msrb.mxu3 %v1432_v45  ;;  %v1532_v20 = vld [vmem:[%s4113_s2 + $0xb0] sm:$0xff]  ;;  %v1533_v21 = vld [vmem:[%s4113_s2 + $0xb8] sm:$0xff]  ;;  %v1530_v23 = vld [vmem:[%s4113_s2 + $0xa0] sm:$0xff] }
 0xf5b   :  { %1563 = vmatpush.msra.mxu1 %v1539_v13  ;;  %v1531_v25 = vld [vmem:[%s4113_s2 + $0xa8] sm:$0xff]  ;;  %v1528_v26 = vld [vmem:[%s4113_s2 + $0x90] sm:$0xff]  ;;  %v1525_v31 = vld [vmem:[%s4113_s2 + $0x78] sm:$0xff] }
 0xf5c   :  { %1409 = vmatpush.msrb.mxu2 %v1394_v46  ;;  %1446 = vmatpush.msrb.mxu3 %v1431_v47  ;;  %v1527_v0 = vld [vmem:[%s4113_s2 + $0x88] sm:$0xff]  ;;  %v1524_v30 = vld [vmem:[%s4113_s2 + $0x70] sm:$0xff]  ;;  %v1522_v32 = vld [vmem:[%s4113_s2 + $0x60] sm:$0xff] }
 0xf5d   :  { %1564 = vmatpush.msra.mxu1 %v1537_v15  ;;  %v1523_v33 = vld [vmem:[%s4113_s2 + $0x68] sm:$0xff]  ;;  %v1520_v36 = vld [vmem:[%s4113_s2 + $0x50] sm:$0xff]  ;;  %v1521_v37 = vld [vmem:[%s4113_s2 + $0x58] sm:$0xff] }
 0xf5e   :  { %1410 = vmatpush.msrb.mxu2 %v1393_v48  ;;  %1447 = vmatpush.msrb.mxu3 %v1430_v49  ;;  %v1518_v40 = vld [vmem:[%s4113_s2 + $0x40] sm:$0xff]  ;;  %v1519_v1 = vld [vmem:[%s4113_s2 + $0x48] sm:$0xff]  ;;  %v1516_v44 = vld [vmem:[%s4113_s2 + $0x30] sm:$0xff] }
 0xf5f   :  { %1565 = vmatpush.msra.mxu1 %v1535_v17  ;;  %v1517_v45 = vld [vmem:[%s4113_s2 + $0x38] sm:$0xff]  ;;  %v1514_v47 = vld [vmem:[%s4113_s2 + $0x20] sm:$0xff]  ;;  %v1515_v48 = vld [vmem:[%s4113_s2 + $0x28] sm:$0xff] }
 0xf60   :  { %1411 = vmatpush.msrb.mxu2 %v1392_v50  ;;  %1448 = vmatpush.msrb.mxu3 %v1429_v52  ;;  %v1512_v50 = vld [vmem:[%s4113_s2 + $0x10] sm:$0xff]  ;;  %v1513_v52 = vld [vmem:[%s4113_s2 + $0x18] sm:$0xff]  ;;  %v2131_v11 = vld [vmem:[%s4111_s0 + $0x60] sm:$0xff] }
 0xf61   :  { %1566 = vmatpush.msra.mxu1 %v1533_v21  ;;  %v2132_v12 = vld [vmem:[%s4111_s0 + $0x68] sm:$0xff] }
 0xf62   :  { %1412 = vmatpush.msrb.mxu2 %v1391_v53  ;;  %1449 = vmatpush.msrb.mxu3 %v1428_v54  ;;  %v1510_v54 = vld [vmem:[%s4113_s2] sm:$0xff] }
 0xf63   :  { %1567 = vmatpush.msra.mxu1 %v1531_v25 }
 0xf64   :  { %1413 = vmatpush.msrb.mxu2 %v1390_v51  ;;  %1450 = vmatpush.msrb.mxu3 %v1427_v55  ;;  %v1511_v51 = vld [vmem:[%s4113_s2 + $0x8] sm:$0xff] }
 0xf66   :  { %1414 = vmatpush.msrb.mxu2 %v1389_v57  ;;  %1451 = vmatpush.msrb.mxu3 %v1426_v58 }
 0xf68   :  { %1415 = vmatpush.msrb.mxu2 %v1388_v59  ;;  %1452 = vmatpush.msrb.mxu3 %v1425_v56 }
 0xf6a   :  { %1416 = vmatpush.msrb.mxu2 %v1387_v60  ;;  %1453 = vmatpush.msrb.mxu3 %v1424_v62 }
 0xf6c   :  { %1417 = vmatpush.msrb.mxu2 %v1386_v63  ;;  %1454 = vmatpush.msrb.mxu3 %v1423_v2 }
 0xf6d   :  { %1418 = vmatmul.f32.vlgmr.msrb.gmra.mxu2 %v4131_v27  ;;  %1455 = vmatmul.f32.vlgmr.msrb.gmra.mxu3 %v4132_v29  ;;  %v1529_v27 = vld [vmem:[%s4113_s2 + $0x98] sm:$0xff]  ;;  %v1526_v29 = vld [vmem:[%s4113_s2 + $0x80] sm:$0xff] }
 0xf6e   :  { %1568 = vmatpush.msra.mxu1 %v1529_v27  ;;  %v2590_v27 = vmov 0.0  }
 0xf70   :  { %1569 = vmatpush.msra.mxu1 %v1527_v0 }
 0xf72   :  { %1570 = vmatpush.msra.mxu1 %v1525_v31 }
 0xf74   :  { %1571 = vmatpush.msra.mxu1 %v1523_v33 }
 0xf76   :  { %1572 = vmatpush.msra.mxu1 %v1521_v37 }
 0xf78   :  { %1573 = vmatpush.msra.mxu1 %v1519_v1 }
 0xf7a   :  { %1574 = vmatpush.msra.mxu1 %v1517_v45 }
 0xf7c   :  { %1575 = vmatpush.msra.mxu1 %v1515_v48 }
 0xf7e   :  { %1576 = vmatpush.msra.mxu1 %v1513_v52 }
 0xf80   :  { %1577 = vmatpush.msra.mxu1 %v1511_v51 }
 0xff0   :  { %v1419_v61 = vpop.f32.mrf.mxu2  ;;  %v1456_v3 = vpop.f32.mrf.mxu3 }
 0xff1   :  { %v1422_v5 = vadd.f32 %v1419_v61, %v3690_v9  ;;  %v1538_v9 = vld [vmem:[%s4113_s2 + $0xe0] sm:$0xff] }
 0xff2   :  { %1543 = vmatpush.msra.mxu0 %v1538_v9 }
 0xff3   :  { %v1459_v6 = vadd.f32 %v1456_v3, %v1422_v5 }
 0xff4   :  { %1544 = vmatpush.msra.mxu0 %v1536_v14 }
 0xff5   :  { %1460 = vadd.xlane.f32.xlu0 %v1459_v6 }
 0xff6   :  { %1545 = vmatpush.msra.mxu0 %v1534_v16 }
 0xff8   :  { %1546 = vmatpush.msra.mxu0 %v1532_v20 }
 0xffa   :  { %1547 = vmatpush.msra.mxu0 %v1530_v23 }
 0xffc   :  { %1548 = vmatpush.msra.mxu0 %v1528_v26  ;;  %v2586_v26 = vmov 0.0  }
 0xffe   :  { %1549 = vmatpush.msra.mxu0 %v1526_v29 }
0x1000   :  { %1550 = vmatpush.msra.mxu0 %v1524_v30 }
0x1002   :  { %1551 = vmatpush.msra.mxu0 %v1522_v32 }
0x1004   :  { %1552 = vmatpush.msra.mxu0 %v1520_v36 }
0x1006   :  { %1553 = vmatpush.msra.mxu0 %v1518_v40 }
0x1008   :  { %1554 = vmatpush.msra.mxu0 %v1516_v44 }
0x100a   :  { %1555 = vmatpush.msra.mxu0 %v1514_v47 }
0x100c   :  { %1556 = vmatpush.msra.mxu0 %v1512_v50 }
0x100e   :  { %1557 = vmatpush.msra.mxu0 %v1510_v54 }
0x1068   :  { %v1461_v7 = vpop.xlane.xlu0 %1460 }
0x1069   :  { %v1462_v4 = vmul.f32 %v1461_v7, %v2864_v41 }
0x106b   :  { %v3753_v8 = vsub.f32 %v1459_v6, %v1462_v4 }
0x106d   :  { %v1464_v10 = vmul.f32 %v3753_v8, %v3753_v8 }
0x106f   :  { %1465 = vadd.xlane.f32.xlu0 %v1464_v10 }
0x10e2   :  { %v1466_v18 = vpop.xlane.xlu0 %1465 }
0x10e3   :  { %v1467_v19 = vmul.f32 %v1466_v18, %v2864_v41 }
0x10e5   :  { %v1468_v22 = vadd.f32 1e-05, %v1467_v19 }
0x10e7   :  { %2374 = vrsqrt.f32 %v1468_v22  ;;  %vm1475_vm7 = vweird.f32 %v1468_v22 }
0x10ed   :  { %v2375_v34 = vpop.eup %2374 }
0x10ee   :  { %v1470_v38 = vmul.f32 %v2375_v34, %v1468_v22  ;;  %vm1476_vm6 = vweird.f32 %v2375_v34 }
0x10ef   :  { %vm1477_vm8 = vmor %vm1475_vm7, %vm1476_vm6 }
0x10f0   :  { %v1471_v43 = vmul.f32 %v2375_v34, %v1470_v38 }
0x10f2   :  { %v1472_v46 = vmul.f32 0.5, %v1471_v43 }
0x10f4   :  { %v1473_v49 = vsub.f32 1.5, %v1472_v46 }
0x10f6   :  { %v1474_v53 = vmul.f32 %v2375_v34, %v1473_v49 }
0x10f8   :  { %v1478_v55 = vsel %vm1477_vm8, %v2375_v34, %v1474_v53 }
0x10f9   :  { %v1479_v57 = vmul.f32 %v1478_v55, %v3753_v8 }
0x10fb   :  { %v1480_v58 = vmul.f32 %v1479_v57, %v2963_v24 }
0x10fd   :  { %v1481_v59 = vadd.f32 %v1480_v58, %v2972_v28 }
0x10ff   :  { %v2129_v56 = vmul.f32 -1.442695, %v1481_v59 }
0x1101   :  { %2376 = vpow2.f32 %v2129_v56 }
0x1107   :  { %v2377_v60 = vpop.eup %2376 }
0x1108   :  { %v1485_v62 = vadd.f32 1.0, %v2377_v60 }
0x110a   :  { %2378 = vrcp.f32 %v1485_v62  ;;  %v1497_v3 = vand.u32 2147483648, %v1485_v62  ;;  %v1495_v6 = vand.u32 2147483647, %v1485_v62  ;;  %vm1491_vm10 = vweird.f32 %v1485_v62 }
0x110c   :  { %v1498_v4 = vor.u32 1.1754944e-38, %v1497_v3  ;;  %vm1496_vm12 = vcmp.eq.f32.partialorder %v1495_v6, 8.507059e+37 }
0x1110   :  { %v2379_v63 = vpop.eup %2378 }
0x1111   :  { %v1487_v2 = vmul.f32 %v2379_v63, %v1485_v62  ;;  %vm1492_vm9 = vweird.f32 %v2379_v63 }
0x1112   :  { %vm1493_vm11 = vmor %vm1491_vm10, %vm1492_vm9 }
0x1113   :  { %v1488_v61 = vsub.f32 1.0, %v1487_v2 }
0x1115   :  { %v1489_v5 = vmul.f32 %v2379_v63, %v1488_v61 }
0x1117   :  { %v1490_v7 = vadd.f32 %v2379_v63, %v1489_v5 }
0x1119   :  { %v1494_v8 = vsel %vm1493_vm11, %v2379_v63, %v1490_v7 }
0x111a   :  { %v1499_v10 = vsel %vm1496_vm12, %v1498_v4, %v1494_v8 }
0x111b   :  { %2130 = vst [vmem:[%s4120_s9 + $0x28] sm:$0xff] %v1499_v10  ;;  %1558 = vmatmul.f32.vlgmr.msra.gmra.mxu0 %v1499_v10  ;;  %1578 = vmatmul.f32.vlgmr.msra.gmra.mxu1 %v1499_v10 }
0x111c   :  { %1506 = vst [vmem:[#allocation2 + $0x30] sm:$0xff] %v1499_v10 }
0x1198   :  { %v1559_v9 = vpop.f32.mrf.mxu0  ;;  %v1579_v13 = vpop.f32.mrf.mxu1 }
0x1199   :  { %v3866_v14 = vadd.f32 %v2131_v11, %v1559_v9  ;;  %v1583_v15 = vadd.f32 %v2132_v12, %v1579_v13 }
0x119b   :  { %vm1584_vm13 = vcmp.gt.f32.partialorder %v1583_v15, 0.0 }
0x119c   :  { %v2133_v16 = vsel %vm1584_vm13, 1.0, %v2613_v35 }
0x119d   :  { %v1588_v17 = vmul.f32 %v2792_v39, %v2133_v16  ;;  %v1594_v18 = vmul.f32 %v2799_v42, %v2133_v16 }
0x119f   :  { %1589 = vadd.xlane.f32.xlu1 %v1588_v17 }
0x11a7   :  { %1595 = vadd.xlane.f32.xlu1 %v1594_v18 }
0x1212   :  { %v1590_v19 = vpop.xlane.xlu1 %1589 }
0x1213   :  { %v1591_v20 = vmax.f32 %v1590_v19, 0.0 }
0x1215   :  { %v1593_v21 = vmin.f32 %v1591_v20, 6.0 }
0x121a   :  { %v1596_v22 = vpop.xlane.xlu1 %1595 }
0x121b   :  { %v1597_v23 = vmax.f32 %v1596_v22, 0.0 }
0x121d   :  { %v1598_v25 = vmin.f32 %v1597_v23, 6.0 }
0x121e LB: > { %s2134_s11 = sshll.u32 %s2596_s10, 3  ;;  %s1610_s12 = scvt.s32.f32 %s2596_s10  ;;  %s2596_s10 = sphi %s2594_s10, %s1604_s10   ;;  %v2592_v27 = vphi %v2590_v27, %v2591_v27   ;;  %v2588_v26 = vphi %v2586_v26, %v2587_v26  }
0x121f   : > { %s1608_s13 = scalar_lea.vmem [#allocation2], %s2134_s11  ;;  %s1604_s10 = sadd.s32 1, %s2596_s10  }
0x1220   : > { %v1609_v29 = vld [vmem:[%s1608_s13] sm:$0xff]  ;;  %v1611_v0 = vstv %s1610_s12  ;;  %p1601_p6 = scmp.ge.s32.totalorder %s1604_s10, 9  }
0x1221   : > { %vm1612_vm14 = vcmp.eq.f32.partialorder %v1593_v21, %v1611_v0  ;;  %vm1617_vm15 = vcmp.eq.f32.partialorder %v1598_v25, %v1611_v0  ;;  %v1637_v34 = vld [vmem:[%s4114_s3 + $0x78] sm:$0xff] (%p1601_p6)  ;;  %v1636_v36 = vld [vmem:[%s4114_s3 + $0x70] sm:$0xff] (%p1601_p6)  ;;  %v1674_v37 = vld [vmem:[#allocation3 + $0x78] sm:$0xff] (%p1601_p6) }
0x1222   : > { %v1615_v30 = vsel %vm1612_vm14, %v1609_v29, 0.0  ;;  %v1620_v31 = vsel %vm1617_vm15, %v1609_v29, 0.0  ;;  %1603 = sbr.rel (!%p1601_p6) target bundleno = 4638 (0x121e), region = 217  ;;  %1638 = vmatpush.msra.mxu2 (%p1601_p6), %v1637_v34  ;;  %1675 = vmatpush.msra.mxu3 (%p1601_p6), %v1674_v37  ;;  %v1673_v38 = vld [vmem:[#allocation3 + $0x70] sm:$0xff] (%p1601_p6)  ;;  %v1635_v40 = vld [vmem:[%s4114_s3 + $0x68] sm:$0xff] (%p1601_p6)  ;;  %v1672_v1 = vld [vmem:[#allocation3 + $0x68] sm:$0xff] (%p1601_p6) }
0x1223   : > { %v3871_v27 = vadd.f32 %v2592_v27, %v1615_v30   ;;  %v3873_v26 = vadd.f32 %v2588_v26, %v1620_v31   ;;  %v1634_v43 = vld [vmem:[%s4114_s3 + $0x60] sm:$0xff] (%p1601_p6)  ;;  %v1671_v44 = vld [vmem:[#allocation3 + $0x60] sm:$0xff] (%p1601_p6)  ;;  %v1633_v45 = vld [vmem:[%s4114_s3 + $0x58] sm:$0xff] (%p1601_p6) }
0x1224   :  { %1639 = vmatpush.msra.mxu2 (%p1601_p6), %v1636_v36  ;;  %1676 = vmatpush.msra.mxu3 (%p1601_p6), %v1673_v38  ;;  %v1670_v46 = vld [vmem:[#allocation3 + $0x58] sm:$0xff] (%p1601_p6)  ;;  %v1632_v47 = vld [vmem:[%s4114_s3 + $0x50] sm:$0xff] (%p1601_p6)  ;;  %v1669_v48 = vld [vmem:[#allocation3 + $0x50] sm:$0xff] (%p1601_p6) }
0x1225   : > { %v4133_v32 = vmov %v3871_v27  ;;  %v4134_v33 = vmov %v3873_v26  ;;  %v1631_v49 = vld [vmem:[%s4114_s3 + $0x48] sm:$0xff] (%p1601_p6)  ;;  %v1668_v50 = vld [vmem:[#allocation3 + $0x48] sm:$0xff] (%p1601_p6)  ;;  %v1630_v52 = vld [vmem:[%s4114_s3 + $0x40] sm:$0xff] (%p1601_p6) }
0x1226   : > { %v2587_v26 = vmov %v4134_v33   ;;  %v2591_v27 = vmov %v4133_v32   ;;  %1640 = vmatpush.msra.mxu2 (%p1601_p6), %v1635_v40  ;;  %1677 = vmatpush.msra.mxu3 (%p1601_p6), %v1672_v1  ;;  %v1667_v53 = vld [vmem:[#allocation3 + $0x40] sm:$0xff] (%p1601_p6)  ;;  %v1629_v54 = vld [vmem:[%s4114_s3 + $0x38] sm:$0xff] (%p1601_p6)  ;;  %v1666_v51 = vld [vmem:[#allocation3 + $0x38] sm:$0xff] (%p1601_p6) }
0x1227   :  { %v1628_v55 = vld [vmem:[%s4114_s3 + $0x30] sm:$0xff]  ;;  %v1665_v57 = vld [vmem:[#allocation3 + $0x30] sm:$0xff]  ;;  %v1627_v58 = vld [vmem:[%s4114_s3 + $0x28] sm:$0xff] }
0x1228   :  { %1641 = vmatpush.msra.mxu2 %v1634_v43  ;;  %1678 = vmatpush.msra.mxu3 %v1671_v44  ;;  %v1664_v59 = vld [vmem:[#allocation3 + $0x28] sm:$0xff]  ;;  %v1626_v56 = vld [vmem:[%s4114_s3 + $0x20] sm:$0xff]  ;;  %v1663_v60 = vld [vmem:[#allocation3 + $0x20] sm:$0xff] }
0x1229   :  { %v1625_v62 = vld [vmem:[%s4114_s3 + $0x18] sm:$0xff]  ;;  %v1662_v63 = vld [vmem:[#allocation3 + $0x18] sm:$0xff]  ;;  %v1624_v2 = vld [vmem:[%s4114_s3 + $0x10] sm:$0xff] }
0x122a   :  { %1642 = vmatpush.msra.mxu2 %v1633_v45  ;;  %1679 = vmatpush.msra.mxu3 %v1670_v46  ;;  %v1661_v61 = vld [vmem:[#allocation3 + $0x10] sm:$0xff]  ;;  %v1623_v3 = vld [vmem:[%s4114_s3 + $0x8] sm:$0xff]  ;;  %v1660_v5 = vld [vmem:[#allocation3 + $0x8] sm:$0xff] }
0x122b   :  { %v1622_v6 = vld [vmem:[%s4114_s3] sm:$0xff]  ;;  %v1659_v7 = vld [vmem:[#allocation3] sm:$0xff]  ;;  %v1776_v16 = vld [vmem:[%s4113_s2 + $0xf0] sm:$0xff] }
0x122c   :  { %1643 = vmatpush.msra.mxu2 %v1632_v47  ;;  %1680 = vmatpush.msra.mxu3 %v1669_v48  ;;  %v1777_v17 = vld [vmem:[%s4113_s2 + $0xf8] sm:$0xff]  ;;  %v1775_v18 = vld [vmem:[%s4113_s2 + $0xe8] sm:$0xff]  ;;  %v1772_v19 = vld [vmem:[%s4113_s2 + $0xd0] sm:$0xff] }
0x122d   :  { %1778 = vmatpush.msrb.mxu0 %v1776_v16  ;;  %1798 = vmatpush.msrb.mxu1 %v1777_v17  ;;  %v1773_v20 = vld [vmem:[%s4113_s2 + $0xd8] sm:$0xff]  ;;  %v1770_v21 = vld [vmem:[%s4113_s2 + $0xc0] sm:$0xff]  ;;  %v1771_v22 = vld [vmem:[%s4113_s2 + $0xc8] sm:$0xff] }
0x122e   :  { %1644 = vmatpush.msra.mxu2 %v1631_v49  ;;  %1681 = vmatpush.msra.mxu3 %v1668_v50  ;;  %v1768_v26 = vld [vmem:[%s4113_s2 + $0xb0] sm:$0xff]  ;;  %v1769_v27 = vld [vmem:[%s4113_s2 + $0xb8] sm:$0xff]  ;;  %v1766_v0 = vld [vmem:[%s4113_s2 + $0xa0] sm:$0xff] }
0x122f   :  { %1799 = vmatpush.msrb.mxu1 %v1775_v18  ;;  %v1767_v30 = vld [vmem:[%s4113_s2 + $0xa8] sm:$0xff]  ;;  %v1764_v31 = vld [vmem:[%s4113_s2 + $0x90] sm:$0xff]  ;;  %v1761_v37 = vld [vmem:[%s4113_s2 + $0x78] sm:$0xff] }
0x1230   :  { %1645 = vmatpush.msra.mxu2 %v1630_v52  ;;  %1682 = vmatpush.msra.mxu3 %v1667_v53  ;;  %v1763_v34 = vld [vmem:[%s4113_s2 + $0x88] sm:$0xff]  ;;  %v1760_v36 = vld [vmem:[%s4113_s2 + $0x70] sm:$0xff]  ;;  %v1758_v38 = vld [vmem:[%s4113_s2 + $0x60] sm:$0xff] }
0x1231   :  { %1800 = vmatpush.msrb.mxu1 %v1773_v20  ;;  %v1759_v40 = vld [vmem:[%s4113_s2 + $0x68] sm:$0xff]  ;;  %v1756_v43 = vld [vmem:[%s4113_s2 + $0x50] sm:$0xff]  ;;  %v1757_v44 = vld [vmem:[%s4113_s2 + $0x58] sm:$0xff] }
0x1232   :  { %1646 = vmatpush.msra.mxu2 %v1629_v54  ;;  %1683 = vmatpush.msra.mxu3 %v1666_v51  ;;  %v1754_v46 = vld [vmem:[%s4113_s2 + $0x40] sm:$0xff]  ;;  %v1755_v47 = vld [vmem:[%s4113_s2 + $0x48] sm:$0xff]  ;;  %v1752_v49 = vld [vmem:[%s4113_s2 + $0x30] sm:$0xff] }
0x1233   :  { %1801 = vmatpush.msrb.mxu1 %v1771_v22  ;;  %v1753_v50 = vld [vmem:[%s4113_s2 + $0x38] sm:$0xff]  ;;  %v1750_v53 = vld [vmem:[%s4113_s2 + $0x20] sm:$0xff]  ;;  %v1751_v54 = vld [vmem:[%s4113_s2 + $0x28] sm:$0xff] }
0x1234   :  { %1647 = vmatpush.msra.mxu2 %v1628_v55  ;;  %1684 = vmatpush.msra.mxu3 %v1665_v57  ;;  %v1748_v55 = vld [vmem:[%s4113_s2 + $0x10] sm:$0xff]  ;;  %v1749_v57 = vld [vmem:[%s4113_s2 + $0x18] sm:$0xff] }
0x1235   :  { %1802 = vmatpush.msrb.mxu1 %v1769_v27  ;;  %v2137_v16 = vld [vmem:[%s4111_s0 + $0x70] sm:$0xff]  ;;  %v2138_v17 = vld [vmem:[%s4111_s0 + $0x78] sm:$0xff]  ;;  %s2606_s0 = smov 0  }
0x1236   :  { %1648 = vmatpush.msra.mxu2 %v1627_v58  ;;  %1685 = vmatpush.msra.mxu3 %v1664_v59  ;;  %v1746_v59 = vld [vmem:[%s4113_s2] sm:$0xff] }
0x1237   :  { %1803 = vmatpush.msrb.mxu1 %v1767_v30 }
0x1238   :  { %1649 = vmatpush.msra.mxu2 %v1626_v56  ;;  %1686 = vmatpush.msra.mxu3 %v1663_v60  ;;  %v1747_v56 = vld [vmem:[%s4113_s2 + $0x8] sm:$0xff] }
0x123a   :  { %1650 = vmatpush.msra.mxu2 %v1625_v62  ;;  %1687 = vmatpush.msra.mxu3 %v1662_v63 }
0x123c   :  { %1651 = vmatpush.msra.mxu2 %v1624_v2  ;;  %1688 = vmatpush.msra.mxu3 %v1661_v61 }
0x123e   :  { %1652 = vmatpush.msra.mxu2 %v1623_v3  ;;  %1689 = vmatpush.msra.mxu3 %v1660_v5 }
0x1240   :  { %1653 = vmatpush.msra.mxu2 %v1622_v6  ;;  %1690 = vmatpush.msra.mxu3 %v1659_v7 }
0x1241   :  { %1654 = vmatmul.f32.vlgmr.msra.gmra.mxu2 %v4133_v32  ;;  %1691 = vmatmul.f32.vlgmr.msra.gmra.mxu3 %v4134_v33  ;;  %v1765_v32 = vld [vmem:[%s4113_s2 + $0x98] sm:$0xff]  ;;  %v1762_v33 = vld [vmem:[%s4113_s2 + $0x80] sm:$0xff] }
0x1242   :  { %1804 = vmatpush.msrb.mxu1 %v1765_v32  ;;  %v2602_v32 = vmov 0.0  }
0x1244   :  { %1805 = vmatpush.msrb.mxu1 %v1763_v34 }
0x1246   :  { %1806 = vmatpush.msrb.mxu1 %v1761_v37 }
0x1248   :  { %1807 = vmatpush.msrb.mxu1 %v1759_v40 }
0x124a   :  { %1808 = vmatpush.msrb.mxu1 %v1757_v44 }
0x124c   :  { %1809 = vmatpush.msrb.mxu1 %v1755_v47 }
0x124e   :  { %1810 = vmatpush.msrb.mxu1 %v1753_v50 }
0x1250   :  { %1811 = vmatpush.msrb.mxu1 %v1751_v54 }
0x1252   :  { %1812 = vmatpush.msrb.mxu1 %v1749_v57 }
0x1254   :  { %1813 = vmatpush.msrb.mxu1 %v1747_v56 }
0x12c4   :  { %v1655_v4 = vpop.f32.mrf.mxu2  ;;  %v1692_v8 = vpop.f32.mrf.mxu3 }
0x12c5   :  { %v1658_v10 = vadd.f32 %v1655_v4, %v3866_v14  ;;  %v1774_v14 = vld [vmem:[%s4113_s2 + $0xe0] sm:$0xff] }
0x12c6   :  { %1779 = vmatpush.msrb.mxu0 %v1774_v14 }
0x12c7   :  { %v1695_v11 = vadd.f32 %v1692_v8, %v1658_v10 }
0x12c8   :  { %1780 = vmatpush.msrb.mxu0 %v1772_v19 }
0x12c9   :  { %1696 = vadd.xlane.f32.xlu0 %v1695_v11 }
0x12ca   :  { %1781 = vmatpush.msrb.mxu0 %v1770_v21 }
0x12cc   :  { %1782 = vmatpush.msrb.mxu0 %v1768_v26 }
0x12ce   :  { %1783 = vmatpush.msrb.mxu0 %v1766_v0 }
0x12d0   :  { %1784 = vmatpush.msrb.mxu0 %v1764_v31  ;;  %v2598_v31 = vmov 0.0  }
0x12d2   :  { %1785 = vmatpush.msrb.mxu0 %v1762_v33 }
0x12d4   :  { %1786 = vmatpush.msrb.mxu0 %v1760_v36 }
0x12d6   :  { %1787 = vmatpush.msrb.mxu0 %v1758_v38 }
0x12d8   :  { %1788 = vmatpush.msrb.mxu0 %v1756_v43 }
0x12da   :  { %1789 = vmatpush.msrb.mxu0 %v1754_v46 }
0x12dc   :  { %1790 = vmatpush.msrb.mxu0 %v1752_v49 }
0x12de   :  { %1791 = vmatpush.msrb.mxu0 %v1750_v53 }
0x12e0   :  { %1792 = vmatpush.msrb.mxu0 %v1748_v55 }
0x12e2   :  { %1793 = vmatpush.msrb.mxu0 %v1746_v59 }
0x133c   :  { %v1697_v12 = vpop.xlane.xlu0 %1696 }
0x133d   :  { %v1698_v9 = vmul.f32 %v1697_v12, %v2864_v41 }
0x133f   :  { %v3929_v13 = vsub.f32 %v1695_v11, %v1698_v9 }
0x1341   :  { %v1700_v15 = vmul.f32 %v3929_v13, %v3929_v13 }
0x1343   :  { %1701 = vadd.xlane.f32.xlu0 %v1700_v15 }
0x13b6   :  { %v1702_v23 = vpop.xlane.xlu0 %1701 }
0x13b7   :  { %v1703_v25 = vmul.f32 %v1702_v23, %v2864_v41 }
0x13b9   :  { %v1704_v29 = vadd.f32 1e-05, %v1703_v25 }
0x13bb   :  { %2380 = vrsqrt.f32 %v1704_v29  ;;  %vm1711_vm1 = vweird.f32 %v1704_v29 }
0x13c1   :  { %v2381_v1 = vpop.eup %2380 }
0x13c2   :  { %v1706_v45 = vmul.f32 %v2381_v1, %v1704_v29  ;;  %vm1712_vm0 = vweird.f32 %v2381_v1 }
0x13c3   :  { %vm1713_vm2 = vmor %vm1711_vm1, %vm1712_vm0 }
0x13c4   :  { %v1707_v48 = vmul.f32 %v2381_v1, %v1706_v45 }
0x13c6   :  { %v1708_v52 = vmul.f32 0.5, %v1707_v48 }
0x13c8   :  { %v1709_v51 = vsub.f32 1.5, %v1708_v52 }
0x13ca   :  { %v1710_v58 = vmul.f32 %v2381_v1, %v1709_v51 }
0x13cc   :  { %v1714_v60 = vsel %vm1713_vm2, %v2381_v1, %v1710_v58 }
0x13cd   :  { %v1715_v62 = vmul.f32 %v1714_v60, %v3929_v13 }
0x13cf   :  { %v1716_v63 = vmul.f32 %v1715_v62, %v2963_v24 }
0x13d1   :  { %v1717_v2 = vadd.f32 %v1716_v63, %v2972_v28 }
0x13d3   :  { %v2135_v61 = vmul.f32 -1.442695, %v1717_v2 }
0x13d5   :  { %2382 = vpow2.f32 %v2135_v61 }
0x13db   :  { %v2383_v3 = vpop.eup %2382 }
0x13dc   :  { %v1721_v5 = vadd.f32 1.0, %v2383_v3 }
0x13de   :  { %2384 = vrcp.f32 %v1721_v5  ;;  %v1733_v8 = vand.u32 2147483648, %v1721_v5  ;;  %v1731_v11 = vand.u32 2147483647, %v1721_v5  ;;  %vm1727_vm4 = vweird.f32 %v1721_v5 }
0x13e0   :  { %v1734_v9 = vor.u32 1.1754944e-38, %v1733_v8  ;;  %vm1732_vm6 = vcmp.eq.f32.partialorder %v1731_v11, 8.507059e+37 }
0x13e4   :  { %v2385_v6 = vpop.eup %2384 }
0x13e5   :  { %v1723_v7 = vmul.f32 %v2385_v6, %v1721_v5  ;;  %vm1728_vm3 = vweird.f32 %v2385_v6 }
0x13e6   :  { %vm1729_vm5 = vmor %vm1727_vm4, %vm1728_vm3 }
0x13e7   :  { %v1724_v4 = vsub.f32 1.0, %v1723_v7 }
0x13e9   :  { %v1725_v10 = vmul.f32 %v2385_v6, %v1724_v4 }
0x13eb   :  { %v1726_v12 = vadd.f32 %v2385_v6, %v1725_v10 }
0x13ed   :  { %v1730_v13 = vsel %vm1729_vm5, %v2385_v6, %v1726_v12 }
0x13ee   :  { %v1735_v15 = vsel %vm1732_vm6, %v1734_v9, %v1730_v13 }
0x13ef   :  { %2136 = vst [vmem:[%s4120_s9 + $0x30] sm:$0xff] %v1735_v15  ;;  %1794 = vmatmul.f32.vlgmr.msrb.gmra.mxu0 %v1735_v15  ;;  %1814 = vmatmul.f32.vlgmr.msrb.gmra.mxu1 %v1735_v15 }
0x13f0   :  { %1742 = vst [vmem:[#allocation2 + $0x38] sm:$0xff] %v1735_v15 }
0x146c   :  { %v1795_v14 = vpop.f32.mrf.mxu0  ;;  %v1815_v18 = vpop.f32.mrf.mxu1 }
0x146d   :  { %v4042_v19 = vadd.f32 %v2137_v16, %v1795_v14  ;;  %v1819_v20 = vadd.f32 %v2138_v17, %v1815_v18 }
0x146f   :  { %vm1820_vm7 = vcmp.gt.f32.partialorder %v1819_v20, 0.0 }
0x1470   :  { %v2139_v21 = vsel %vm1820_vm7, 1.0, %v2613_v35 }
0x1471   :  { %v1824_v22 = vmul.f32 %v2792_v39, %v2139_v21  ;;  %v1830_v23 = vmul.f32 %v2799_v42, %v2139_v21 }
0x1473   :  { %1825 = vadd.xlane.f32.xlu1 %v1824_v22 }
0x147b   :  { %1831 = vadd.xlane.f32.xlu1 %v1830_v23 }
0x14e6   :  { %v1826_v25 = vpop.xlane.xlu1 %1825 }
0x14e7   :  { %v1827_v26 = vmax.f32 %v1826_v25, 0.0 }
0x14e9   :  { %v1829_v27 = vmin.f32 %v1827_v26, 7.0 }
0x14ee   :  { %v1832_v29 = vpop.xlane.xlu1 %1831 }
0x14ef   :  { %v1833_v0 = vmax.f32 %v1832_v29, 0.0 }
0x14f1   :  { %v1834_v30 = vmin.f32 %v1833_v0, 7.0 }
0x14f2 LB: > { %s2140_s28 = sshll.u32 %s2608_s0, 3  ;;  %s1846_s29 = scvt.s32.f32 %s2608_s0  ;;  %s2608_s0 = sphi %s2606_s0, %s1840_s0   ;;  %v2604_v32 = vphi %v2602_v32, %v2603_v32   ;;  %v2600_v31 = vphi %v2598_v31, %v2599_v31  }
0x14f3   : > { %s1844_s30 = scalar_lea.vmem [#allocation2], %s2140_s28  ;;  %s1840_s0 = sadd.s32 1, %s2608_s0  }
0x14f4   : > { %v1845_v35 = vld [vmem:[%s1844_s30] sm:$0xff]  ;;  %v1847_v39 = vstv %s1846_s29  ;;  %p1837_p7 = scmp.ge.s32.totalorder %s1840_s0, 9  }
0x14f5   : > { %vm1848_vm8 = vcmp.eq.f32.partialorder %v1829_v27, %v1847_v39  ;;  %vm1853_vm9 = vcmp.eq.f32.partialorder %v1834_v30, %v1847_v39  ;;  %v1873_v37 = vld [vmem:[%s4114_s3 + $0x78] sm:$0xff] (%p1837_p7)  ;;  %v1872_v38 = vld [vmem:[%s4114_s3 + $0x70] sm:$0xff] (%p1837_p7)  ;;  %v1910_v40 = vld [vmem:[#allocation3 + $0x78] sm:$0xff] (%p1837_p7) }
0x14f6   : > { %v1851_v42 = vsel %vm1848_vm8, %v1845_v35, 0.0  ;;  %v1856_v33 = vsel %vm1853_vm9, %v1845_v35, 0.0  ;;  %1839 = sbr.rel (!%p1837_p7) target bundleno = 5362 (0x14f2), region = 228  ;;  %1874 = vmatpush.msrb.mxu2 (%p1837_p7), %v1873_v37  ;;  %1911 = vmatpush.msrb.mxu3 (%p1837_p7), %v1910_v40  ;;  %v1909_v1 = vld [vmem:[#allocation3 + $0x70] sm:$0xff] (%p1837_p7)  ;;  %v1871_v43 = vld [vmem:[%s4114_s3 + $0x68] sm:$0xff] (%p1837_p7)  ;;  %v1908_v44 = vld [vmem:[#allocation3 + $0x68] sm:$0xff] (%p1837_p7) }
0x14f7   : > { %v4047_v32 = vadd.f32 %v2604_v32, %v1851_v42   ;;  %v4049_v31 = vadd.f32 %v2600_v31, %v1856_v33   ;;  %v1870_v45 = vld [vmem:[%s4114_s3 + $0x60] sm:$0xff] (%p1837_p7)  ;;  %v1907_v46 = vld [vmem:[#allocation3 + $0x60] sm:$0xff] (%p1837_p7)  ;;  %v1869_v47 = vld [vmem:[%s4114_s3 + $0x58] sm:$0xff] (%p1837_p7) }
0x14f8   :  { %1875 = vmatpush.msrb.mxu2 (%p1837_p7), %v1872_v38  ;;  %1912 = vmatpush.msrb.mxu3 (%p1837_p7), %v1909_v1  ;;  %v1906_v48 = vld [vmem:[#allocation3 + $0x58] sm:$0xff] (%p1837_p7)  ;;  %v1868_v49 = vld [vmem:[%s4114_s3 + $0x50] sm:$0xff] (%p1837_p7)  ;;  %v1905_v50 = vld [vmem:[#allocation3 + $0x50] sm:$0xff] (%p1837_p7) }
0x14f9   : > { %v4135_v34 = vmov %v4047_v32  ;;  %v4136_v36 = vmov %v4049_v31  ;;  %v1867_v52 = vld [vmem:[%s4114_s3 + $0x48] sm:$0xff] (%p1837_p7)  ;;  %v1904_v53 = vld [vmem:[#allocation3 + $0x48] sm:$0xff] (%p1837_p7)  ;;  %v1866_v54 = vld [vmem:[%s4114_s3 + $0x40] sm:$0xff] (%p1837_p7) }
0x14fa   : > { %v2599_v31 = vmov %v4136_v36   ;;  %v2603_v32 = vmov %v4135_v34   ;;  %1876 = vmatpush.msrb.mxu2 (%p1837_p7), %v1871_v43  ;;  %1913 = vmatpush.msrb.mxu3 (%p1837_p7), %v1908_v44  ;;  %v1903_v51 = vld [vmem:[#allocation3 + $0x40] sm:$0xff] (%p1837_p7)  ;;  %v1865_v55 = vld [vmem:[%s4114_s3 + $0x38] sm:$0xff] (%p1837_p7)  ;;  %v1902_v57 = vld [vmem:[#allocation3 + $0x38] sm:$0xff] (%p1837_p7) }
0x14fb   :  { %v1864_v58 = vld [vmem:[%s4114_s3 + $0x30] sm:$0xff]  ;;  %v1901_v59 = vld [vmem:[#allocation3 + $0x30] sm:$0xff]  ;;  %v1863_v56 = vld [vmem:[%s4114_s3 + $0x28] sm:$0xff] }
0x14fc   :  { %1877 = vmatpush.msrb.mxu2 %v1870_v45  ;;  %1914 = vmatpush.msrb.mxu3 %v1907_v46  ;;  %v1900_v60 = vld [vmem:[#allocation3 + $0x28] sm:$0xff]  ;;  %v1862_v62 = vld [vmem:[%s4114_s3 + $0x20] sm:$0xff]  ;;  %v1899_v63 = vld [vmem:[#allocation3 + $0x20] sm:$0xff] }
0x14fd   :  { %v1861_v2 = vld [vmem:[%s4114_s3 + $0x18] sm:$0xff]  ;;  %v1898_v61 = vld [vmem:[#allocation3 + $0x18] sm:$0xff]  ;;  %v1860_v3 = vld [vmem:[%s4114_s3 + $0x10] sm:$0xff] }
0x14fe   :  { %1878 = vmatpush.msrb.mxu2 %v1869_v47  ;;  %1915 = vmatpush.msrb.mxu3 %v1906_v48  ;;  %v1897_v5 = vld [vmem:[#allocation3 + $0x10] sm:$0xff]  ;;  %v1859_v6 = vld [vmem:[%s4114_s3 + $0x8] sm:$0xff]  ;;  %v1896_v7 = vld [vmem:[#allocation3 + $0x8] sm:$0xff] }
0x14ff   :  { %v1858_v4 = vld [vmem:[%s4114_s3] sm:$0xff]  ;;  %v1895_v8 = vld [vmem:[#allocation3] sm:$0xff] }
0x1500   :  { %1879 = vmatpush.msrb.mxu2 %v1868_v49  ;;  %1916 = vmatpush.msrb.mxu3 %v1905_v50 }
0x1502   :  { %1880 = vmatpush.msrb.mxu2 %v1867_v52  ;;  %1917 = vmatpush.msrb.mxu3 %v1904_v53 }
0x1504   :  { %1881 = vmatpush.msrb.mxu2 %v1866_v54  ;;  %1918 = vmatpush.msrb.mxu3 %v1903_v51 }
0x1506   :  { %1882 = vmatpush.msrb.mxu2 %v1865_v55  ;;  %1919 = vmatpush.msrb.mxu3 %v1902_v57 }
0x1508   :  { %1883 = vmatpush.msrb.mxu2 %v1864_v58  ;;  %1920 = vmatpush.msrb.mxu3 %v1901_v59 }
0x150a   :  { %1884 = vmatpush.msrb.mxu2 %v1863_v56  ;;  %1921 = vmatpush.msrb.mxu3 %v1900_v60 }
0x150c   :  { %1885 = vmatpush.msrb.mxu2 %v1862_v62  ;;  %1922 = vmatpush.msrb.mxu3 %v1899_v63 }
0x150e   :  { %1886 = vmatpush.msrb.mxu2 %v1861_v2  ;;  %1923 = vmatpush.msrb.mxu3 %v1898_v61 }
0x1510   :  { %1887 = vmatpush.msrb.mxu2 %v1860_v3  ;;  %1924 = vmatpush.msrb.mxu3 %v1897_v5 }
0x1512   :  { %1888 = vmatpush.msrb.mxu2 %v1859_v6  ;;  %1925 = vmatpush.msrb.mxu3 %v1896_v7 }
0x1514   :  { %1889 = vmatpush.msrb.mxu2 %v1858_v4  ;;  %1926 = vmatpush.msrb.mxu3 %v1895_v8 }
0x1515   :  { %1890 = vmatmul.f32.vlgmr.msrb.gmra.mxu2 %v4135_v34  ;;  %1927 = vmatmul.f32.vlgmr.msrb.gmra.mxu3 %v4136_v36 }
0x1598   :  { %v1891_v10 = vpop.f32.mrf.mxu2  ;;  %v1928_v11 = vpop.f32.mrf.mxu3 }
0x1599   :  { %v1894_v12 = vadd.f32 %v1891_v10, %v4042_v19 }
0x159b   :  { %v1931_v9 = vadd.f32 %v1928_v11, %v1894_v12 }
0x159d   :  { %1932 = vadd.xlane.f32.xlu0 %v1931_v9 }
0x1610   :  { %v1933_v13 = vpop.xlane.xlu0 %1932 }
0x1611   :  { %v1934_v15 = vmul.f32 %v1933_v13, %v2864_v41 }
0x1613   :  { %v1935_v16 = vsub.f32 %v1931_v9, %v1934_v15 }
0x1615   :  { %v1936_v17 = vmul.f32 %v1935_v16, %v1935_v16 }
0x1617   :  { %1937 = vadd.xlane.f32.xlu0 %v1936_v17 }
0x168a   :  { %v1938_v14 = vpop.xlane.xlu0 %1937 }
0x168b   :  { %v1939_v18 = vmul.f32 %v1938_v14, %v2864_v41 }
0x168d   :  { %v1940_v20 = vadd.f32 1e-05, %v1939_v18 }
0x168f   :  { %2386 = vrsqrt.f32 %v1940_v20  ;;  %vm1947_vm11 = vweird.f32 %v1940_v20 }
0x1695   :  { %v2387_v21 = vpop.eup %2386 }
0x1696   :  { %v1942_v22 = vmul.f32 %v2387_v21, %v1940_v20  ;;  %vm1948_vm10 = vweird.f32 %v2387_v21 }
0x1697   :  { %vm1949_vm12 = vmor %vm1947_vm11, %vm1948_vm10 }
0x1698   :  { %v1943_v23 = vmul.f32 %v2387_v21, %v1942_v22 }
0x169a   :  { %v1944_v25 = vmul.f32 0.5, %v1943_v23 }
0x169c   :  { %v1945_v26 = vsub.f32 1.5, %v1944_v25 }
0x169e   :  { %v1946_v19 = vmul.f32 %v2387_v21, %v1945_v26 }
0x16a0   :  { %v1950_v27 = vsel %vm1949_vm12, %v2387_v21, %v1946_v19 }
0x16a1   :  { %v1951_v29 = vmul.f32 %v1950_v27, %v1935_v16 }
0x16a3   :  { %v1952_v0 = vmul.f32 %v1951_v29, %v2963_v24 }
0x16a5   :  { %v1953_v30 = vadd.f32 %v1952_v0, %v2972_v28 }
0x16a7   :  { %v2141_v31 = vmul.f32 -1.442695, %v1953_v30 }
0x16a9   :  { %2388 = vpow2.f32 %v2141_v31 }
0x16af   :  { %v2389_v41 = vpop.eup %2388 }
0x16b0   :  { %v1957_v32 = vadd.f32 1.0, %v2389_v41 }
0x16b2   :  { %2390 = vrcp.f32 %v1957_v32  ;;  %v1969_v33 = vand.u32 2147483648, %v1957_v32  ;;  %v1967_v36 = vand.u32 2147483647, %v1957_v32  ;;  %vm1963_vm14 = vweird.f32 %v1957_v32 }
0x16b4   :  { %v1970_v38 = vor.u32 1.1754944e-38, %v1969_v33  ;;  %vm1968_vm0 = vcmp.eq.f32.partialorder %v1967_v36, 8.507059e+37 }
0x16b8   :  { %v2391_v35 = vpop.eup %2390 }
0x16b9   :  { %v1959_v39 = vmul.f32 %v2391_v35, %v1957_v32  ;;  %vm1964_vm13 = vweird.f32 %v2391_v35 }
0x16ba   :  { %vm1965_vm15 = vmor %vm1963_vm14, %vm1964_vm13 }
0x16bb   :  { %v1960_v42 = vsub.f32 1.0, %v1959_v39 }
0x16bd   :  { %v1961_v34 = vmul.f32 %v2391_v35, %v1960_v42 }
0x16bf   :  { %v1962_v37 = vadd.f32 %v2391_v35, %v1961_v34 }
0x16c1   :  { %v1966_v40 = vsel %vm1965_vm15, %v2391_v35, %v1962_v37 }
0x16c2   :  { %v1971_v24 = vsel %vm1968_vm0, %v1970_v38, %v1966_v40 }
0x16c3   :  { %2142 = vst [vmem:[%s4120_s9 + $0x38] sm:$0xff] %v1971_v24 }
0x16c4   :  { %1978 = vst [vmem:[#allocation2 + $0x40] sm:$0xff] %v1971_v24 }
0x16c5   :  { %1983 = vsyncpa [#allocation4], 1 }

</bundles_post_ra>
